<compile_context>
chip_gen: v5e
topology: v5e:2x2
jax: 0.10.0
libtpu: 0.0.40
codegen_flags: <defaults>
</compile_context>

<pallas_src>
import functools

import numpy as np
import jax
import jax.numpy as jnp
from jax.experimental import pallas as pl
from jax.experimental.pallas import tpu as pltpu


_SQRT_HALF = 0.7071067811865476


def _erf(x):
    # torch.nn.GELU() uses exact erf; Abramowitz & Stegun 7.1.26 rational
    # approximation.  The approx reciprocal (EUP slot, nearly free) slightly
    # degrades the nominal |err| <= 1.5e-7 bound, but the error stays far
    # below the bf16-operand rounding already present in the matmuls.
    a1, a2, a3, a4, a5 = (0.254829592, -0.284496736, 1.421413741,
                          -1.453152027, 1.061405429)
    p = 0.3275911
    ax = jnp.abs(x)
    t = pl.reciprocal(1.0 + p * ax, approx=True)
    poly = ((((a5 * t + a4) * t + a3) * t + a2) * t + a1) * t
    y = 1.0 - poly * jnp.exp(-ax * ax)
    return jnp.where(x >= 0.0, y, -y)


def _gelu(x):
    return 0.5 * x * (1.0 + _erf(x * _SQRT_HALF))


# ------------------------------ Pallas kernel -------------------------------

def _resblock_kernel(x_ref, m1_ref, b1_ref, m2_ref, b2_ref, o_ref):
    """gelu(conv1(x)+b1) -> conv2(.)+b2 -> + x, both branches, Bt images.

    x_ref  : (Bt, H, WC)   bf16; Bt images, two branches packed on lane axis.
    m*_ref : (WC, 3*WC)    bf16 fused band matrices (kh=0|1|2 column blocks).
    b*_ref : (1, WC)       f32 biases tiled over W.
    o_ref  : (Bt, H, WC)   f32 output.
    """
    bt, h, wc = x_ref.shape
    m_rows = bt * h
    x = x_ref[...].reshape(m_rows, wc)                     # bf16 (M, WC)

    # Per-image row index; hoisted once (broadcast_in_dim is not CSE'd).
    r = jax.lax.broadcasted_iota(jnp.int32, (bt, h, wc), 1).reshape(m_rows, wc)
    not_top = r != 0          # keep the kh=0 (input row r-1) contribution
    not_bot = r != h - 1      # keep the kh=2 (input row r+1) contribution

    def conv3x3(rows_bf16, m_ref, b_ref):
        # One matmul per conv: (M, WC) @ (WC, 3*WC), f32 accumulation on MXU.
        y = jnp.dot(rows_bf16, m_ref[...], preferred_element_type=jnp.float32)
        y0 = y[:, 0 * wc:1 * wc]          # kh=0 taps (need input row r-1)
        y1 = y[:, 1 * wc:2 * wc]          # kh=1 taps (input row r)
        y2 = y[:, 2 * wc:3 * wc]          # kh=2 taps (need input row r+1)
        # +/-1-row shifts on the XLU; the mask zeroes wrapped rows, which both
        # implements the padding=1 zero halo and stops the Bt images stacked
        # on the M axis from leaking into each other.
        acc = y1
        acc = acc + jnp.where(not_top, pltpu.roll(y0, shift=1, axis=0), 0.0)
        acc = acc + jnp.where(not_bot,
                              pltpu.roll(y2, shift=m_rows - 1, axis=0), 0.0)
        return acc + b_ref[...]

    hidden = _gelu(conv3x3(x, m1_ref, b1_ref))              # BasicConv(relu=True)
    out = conv3x3(hidden.astype(jnp.bfloat16), m2_ref, b2_ref)   # relu=False
    o_ref[...] = (out + x.astype(jnp.float32)).reshape(bt, h, wc)


# --------------------------- weight folding (host) ---------------------------

def _band_matrices_fused(w_oihw, width):
    """Fold kw taps + channel mixing of a 3x3 conv into ONE fused band matrix.

    Returns m of shape (width*Cin, 3*width*Cout) where column block kh holds
      m[x_in*Cin + ci, kh*W*Cout + x_out*Cout + co] = w[co, ci, kh, x_in-x_out+1]
    for |x_in - x_out| <= 1 and zero elsewhere (exact padding=1 along W).
    Weight-sized, not activation-sized; built once per parameter update.
    """
    cout, cin = w_oihw.shape[0], w_oihw.shape[1]
    sel = np.zeros((3, width, width), np.float32)        # sel[kw, x_in, x_out]
    for kw in range(3):
        for x_out in range(width):
            x_in = x_out + kw - 1
            if 0 <= x_in < width:
                sel[kw, x_in, x_out] = 1.0
    m = jnp.einsum("kpx,oiyk->ypixo", jnp.asarray(sel), w_oihw)
    m = m.reshape(3, width * cin, width * cout)
    # Fuse the three kh taps side-by-side along N -> one matmul per conv.
    return jnp.transpose(m, (1, 0, 2)).reshape(width * cin, 3 * width * cout)


def _pack_branch_conv(wa, ba, wb, bb, width):
    """Pack both branches on the channel axis (block-diagonal 3x3 weights, no
    cross-branch mixing) -> fused bf16 band matrix + tiled f32 bias."""
    c = wa.shape[0]
    w = jnp.zeros((2 * c, 2 * c, 3, 3), wa.dtype)
    w = w.at[:c, :c].set(wa).at[c:, c:].set(wb)
    m = _band_matrices_fused(w, width)                         # (W*2C, 3*W*2C)
    bias = jnp.tile(jnp.concatenate([ba, bb]), width)[None, :]  # (1, W*2C)
    return m.astype(jnp.bfloat16), bias.astype(jnp.float32)


def fold_resblock_params(params, width):
    """Fold PyTorch-layout (OIHW) weights into the kernel's fused band
    matrices.  Call ONCE per parameter update, outside the jitted forward."""
    pm, pm1 = params["main"], params["main1"]
    m1, b1 = _pack_branch_conv(pm["w1"], pm["b1"], pm1["w1"], pm1["b1"], width)
    m2, b2 = _pack_branch_conv(pm["w2"], pm["b2"], pm1["w2"], pm1["b2"], width)
    return {"m1": m1, "b1": b1, "m2": m2, "b2": b2}


# ------------------------------ forward wrappers ------------------------------

def _pick_batch_tile(n, h, target_rows=128):
    """Smallest divisor Bt of n with Bt*h >= target_rows (fills the MXU's M
    dimension); falls back to n.  Remaining grid steps are megacore-parallel."""
    for bt in range(1, n + 1):
        if n % bt == 0 and bt * h >= target_rows:
            return bt
    return n


def resblock1_forward_packed(x_packed, folded, *, single_buffer_weights=True):
    """Packed-layout ResBlock1 core.

    x_packed: (N, H, W*2C) channels-last, the two branches concatenated on the
    channel axis.  Returns the same layout in f32.  Keep activations in this
    layout across a stack of ResBlocks; only pay the NCHW<->packed transpose
    once at the model boundary.
    """
    n, h, wc = x_packed.shape
    assert wc % 128 == 0, (
        f"lane dim W*2C={wc} must be a multiple of 128 (pad W or C)")
    assert h % 8 == 0, f"H={h} must be a multiple of 8 (pad H)"
    bt = _pick_batch_tile(n, h)

    m1, b1, m2, b2 = folded["m1"], folded["b1"], folded["m2"], folded["b2"]
    assert m1.shape == (wc, 3 * wc) and m2.shape == (wc, 3 * wc)

    def const_spec(shape):
        # Weights/biases never change across grid steps; single-buffer them
        # (halves their VMEM residency) when per-spec pipeline_mode exists.
        if single_buffer_weights:
            return pl.BlockSpec(shape, lambda i: (0,) * len(shape),
                                pipeline_mode=pl.Buffered(1))
        return pl.BlockSpec(shape, lambda i: (0,) * len(shape))

    return pl.pallas_call(
        _resblock_kernel,
        out_shape=jax.ShapeDtypeStruct((n, h, wc), jnp.float32),
        grid=(n // bt,),
        in_specs=[
            pl.BlockSpec((bt, h, wc), lambda i: (i, 0, 0)),   # activations
            const_spec((wc, 3 * wc)),                         # conv1 band mat
            const_spec((1, wc)),                              # conv1 bias
            const_spec((wc, 3 * wc)),                         # conv2 band mat
            const_spec((1, wc)),                              # conv2 bias
        ],
        out_specs=pl.BlockSpec((bt, h, wc), lambda i: (i, 0, 0)),
        compiler_params=pltpu.CompilerParams(
            dimension_semantics=("parallel",)),
    )(x_packed.astype(jnp.bfloat16), m1, b1, m2, b2)


def resblock1_forward(x1, x2, folded, *, single_buffer_weights=True):
    """ResBlock1.forward: (main(x1)+x1, main1(x2)+x2); NCHW f32 in/out."""
    n, c, h, w = x1.shape
    assert x2.shape == x1.shape
    # NCHW -> packed channels-last row slabs (model-boundary transpose only).
    x = jnp.concatenate([x1, x2], axis=1)                     # (N, 2C, H, W)
    x = jnp.transpose(x, (0, 2, 3, 1)).reshape(n, h, w * 2 * c)
    out = resblock1_forward_packed(
        x, folded, single_buffer_weights=single_buffer_weights)
    out = out.reshape(n, h, w, 2 * c).transpose(0, 3, 1, 2)   # back to NCHW
    return out[:, :c], out[:, c:]


# ------------------------- pure-XLA reference + demo -------------------------

def _reference_forward(x1, x2, params):
    def conv(x, w, b):
        y = jax.lax.conv_general_dilated(
            x, w, window_strides=(1, 1), padding=((1, 1), (1, 1)),
            dimension_numbers=("NCHW", "OIHW", "NCHW"))
        return y + b[None, :, None, None]

    def branch(x, q):
        hidden = jax.nn.gelu(conv(x, q["w1"], q["b1"]), approximate=False)
        return conv(hidden, q["w2"], q["b2"]) + x

    return branch(x1, params["main"]), branch(x2, params["main1"])


def init_params(key, c):
    params = {}
    for branch in ("main", "main1"):
        key, k1, k2, k3, k4 = jax.random.split(key, 5)
        params[branch] = {
            "w1": 0.1 * jax.random.normal(k1, (c, c, 3, 3), jnp.float32),
            "b1": 0.1 * jax.random.normal(k2, (c,), jnp.float32),
            "w2": 0.1 * jax.random.normal(k3, (c, c, 3, 3), jnp.float32),
            "b2": 0.1 * jax.random.normal(k4, (c,), jnp.float32),
        }
    return params


if __name__ == "__main__":
    # W*2C = 128 -> fully lane-dense; Bt=8 -> (128, 128)@(128, 384) matmuls,
    # grid of 2 parallel steps (one per v7x TensorCore).
    N, C, H, W = 16, 4, 16, 16
    kx1, kx2, kp = jax.random.split(jax.random.PRNGKey(0), 3)
    x1 = jax.random.normal(kx1, (N, C, H, W), jnp.float32)
    x2 = jax.random.normal(kx2, (N, C, H, W), jnp.float32)
    params = init_params(kp, C)

    # Weight folding hoisted out of the forward path (once per param update).
    folded = fold_resblock_params(params, W)

    def run(single_buffer_weights):
        fwd = jax.jit(functools.partial(
            resblock1_forward, single_buffer_weights=single_buffer_weights))
        return jax.block_until_ready(fwd(x1, x2, folded))

    try:
        y1, y2 = run(True)
    except Exception:
        # Installed Pallas lacks per-BlockSpec pipeline_mode; fall back to the
        # default double-buffered weight blocks (same semantics).
        y1, y2 = run(False)

    assert y1.shape == (N, C, H, W) and y2.shape == (N, C, H, W)
    assert bool(jnp.all(jnp.isfinite(y1))) and bool(jnp.all(jnp.isfinite(y2)))

    # Check against a plain-XLA reference of the PyTorch module (exact-erf
    # GELU).  Tolerance covers the bf16 operand cast (f32 accumulation).
    r1, r2 = _reference_forward(x1, x2, params)
    err = max(float(jnp.max(jnp.abs(y1 - r1))),
              float(jnp.max(jnp.abs(y2 - r2))))
    assert err < 5e-2, f"max abs error vs reference: {err}"
    print("KERNEL_OK")
</pallas_src>

<mosaic_0001>
module attributes {stable_mosaic.version = 11 : i64} {
  func.func @_resblock_kernel(%arg0: i32, %arg1: memref<8x16x128xbf16, #tpu.memory_space<vmem>>, %arg2: memref<128x384xbf16, #tpu.memory_space<vmem>>, %arg3: memref<1x128xf32, #tpu.memory_space<vmem>>, %arg4: memref<128x384xbf16, #tpu.memory_space<vmem>>, %arg5: memref<1x128xf32, #tpu.memory_space<vmem>>, %arg6: memref<8x16x128xf32, #tpu.memory_space<vmem>>) attributes {dimension_semantics = [#tpu.dimension_semantics<parallel>], iteration_bounds = array<i64: 2>, scalar_prefetch = 0 : i64, scratch_operands = 0 : i64, tpu.core_type = #tpu.core_type<tc>, window_params = [{transform_indices = @transform_0, window_bounds = array<i64: 8, 16, 128>}, {pipeline_mode = #tpu.pipeline_mode<synchronous>, transform_indices = @transform_1, window_bounds = array<i64: 128, 384>}, {pipeline_mode = #tpu.pipeline_mode<synchronous>, transform_indices = @transform_2, window_bounds = array<i64: 1, 128>}, {pipeline_mode = #tpu.pipeline_mode<synchronous>, transform_indices = @transform_3, window_bounds = array<i64: 128, 384>}, {pipeline_mode = #tpu.pipeline_mode<synchronous>, transform_indices = @transform_4, window_bounds = array<i64: 1, 128>}, {transform_indices = @transform_5, window_bounds = array<i64: 8, 16, 128>}]} {
    %c0 = arith.constant 0 : index
    %c0_0 = arith.constant 0 : index
    %c0_1 = arith.constant 0 : index
    %0 = vector.load %arg1[%c0, %c0_0, %c0_1] : memref<8x16x128xbf16, #tpu.memory_space<vmem>>, vector<8x16x128xbf16>
    %1 = vector.shape_cast %0 : vector<8x16x128xbf16> to vector<128x128xbf16>
    %2 = tpu.iota {dimensions = array<i32: 1>} : vector<8x16x128xi32>
    %3 = vector.shape_cast %2 : vector<8x16x128xi32> to vector<128x128xi32>
    %c0_i32 = arith.constant 0 : i32
    %4 = vector.broadcast %c0_i32 : i32 to vector<128x128xi32>
    %5 = arith.cmpi ne, %3, %4 : vector<128x128xi32>
    %c15_i32 = arith.constant 15 : i32
    %6 = vector.broadcast %c15_i32 : i32 to vector<128x128xi32>
    %7 = arith.cmpi ne, %3, %6 : vector<128x128xi32>
    %c0_2 = arith.constant 0 : index
    %c0_3 = arith.constant 0 : index
    %8 = vector.load %arg2[%c0_2, %c0_3] : memref<128x384xbf16, #tpu.memory_space<vmem>>, vector<128x384xbf16>
    %cst = arith.constant dense<0.000000e+00> : vector<128x384xf32>
    %9 = tpu.matmul %1, %8, %cst {dimension_numbers = #tpu.dot_dimension_numbers<[1], [0], [0], [1], [0, 0, 1, 1], [], []>} : vector<128x128xbf16>, vector<128x384xbf16>, vector<128x384xf32> -> vector<128x384xf32>
    %10 = vector.extract_strided_slice %9 {offsets = [0, 0], sizes = [128, 128], strides = [1, 1]} : vector<128x384xf32> to vector<128x128xf32>
    %11 = vector.extract_strided_slice %9 {offsets = [0, 128], sizes = [128, 128], strides = [1, 1]} : vector<128x384xf32> to vector<128x128xf32>
    %12 = vector.extract_strided_slice %9 {offsets = [0, 256], sizes = [128, 128], strides = [1, 1]} : vector<128x384xf32> to vector<128x128xf32>
    %c1_i32 = arith.constant 1 : i32
    %13 = tpu.dynamic_rotate %10 by %c1_i32 dim 0 : vector<128x128xf32>, i32 -> vector<128x128xf32>
    %cst_4 = arith.constant 0.000000e+00 : f32
    %14 = vector.broadcast %cst_4 : f32 to vector<128x128xf32>
    %15 = arith.select %5, %13, %14 : vector<128x128xi1>, vector<128x128xf32>
    %16 = arith.addf %11, %15 : vector<128x128xf32>
    %c127_i32 = arith.constant 127 : i32
    %17 = tpu.dynamic_rotate %12 by %c127_i32 dim 0 : vector<128x128xf32>, i32 -> vector<128x128xf32>
    %cst_5 = arith.constant 0.000000e+00 : f32
    %18 = vector.broadcast %cst_5 : f32 to vector<128x128xf32>
    %19 = arith.select %7, %17, %18 : vector<128x128xi1>, vector<128x128xf32>
    %20 = arith.addf %16, %19 : vector<128x128xf32>
    %c0_6 = arith.constant 0 : index
    %c0_7 = arith.constant 0 : index
    %21 = vector.load %arg3[%c0_6, %c0_7] : memref<1x128xf32, #tpu.memory_space<vmem>>, vector<1x128xf32>
    %22 = vector.broadcast %21 : vector<1x128xf32> to vector<128x128xf32>
    %23 = arith.addf %20, %22 : vector<128x128xf32>
    %cst_8 = arith.constant 5.000000e-01 : f32
    %24 = vector.broadcast %cst_8 : f32 to vector<128x128xf32>
    %25 = arith.mulf %24, %23 : vector<128x128xf32>
    %cst_9 = arith.constant 0.707106769 : f32
    %26 = vector.broadcast %cst_9 : f32 to vector<128x128xf32>
    %27 = arith.mulf %23, %26 : vector<128x128xf32>
    %28 = math.absf %27 : vector<128x128xf32>
    %cst_10 = arith.constant 0.327591091 : f32
    %29 = vector.broadcast %cst_10 : f32 to vector<128x128xf32>
    %30 = arith.mulf %29, %28 : vector<128x128xf32>
    %cst_11 = arith.constant 1.000000e+00 : f32
    %31 = vector.broadcast %cst_11 : f32 to vector<128x128xf32>
    %32 = arith.addf %31, %30 : vector<128x128xf32>
    %33 = tpu.reciprocal %32 {approx = true} : vector<128x128xf32> -> vector<128x128xf32>
    %cst_12 = arith.constant 1.06140542 : f32
    %34 = vector.broadcast %cst_12 : f32 to vector<128x128xf32>
    %35 = arith.mulf %34, %33 : vector<128x128xf32>
    %cst_13 = arith.constant -1.45315206 : f32
    %36 = vector.broadcast %cst_13 : f32 to vector<128x128xf32>
    %37 = arith.addf %35, %36 : vector<128x128xf32>
    %38 = arith.mulf %37, %33 : vector<128x128xf32>
    %cst_14 = arith.constant 1.42141378 : f32
    %39 = vector.broadcast %cst_14 : f32 to vector<128x128xf32>
    %40 = arith.addf %38, %39 : vector<128x128xf32>
    %41 = arith.mulf %40, %33 : vector<128x128xf32>
    %cst_15 = arith.constant -0.284496725 : f32
    %42 = vector.broadcast %cst_15 : f32 to vector<128x128xf32>
    %43 = arith.addf %41, %42 : vector<128x128xf32>
    %44 = arith.mulf %43, %33 : vector<128x128xf32>
    %cst_16 = arith.constant 0.254829586 : f32
    %45 = vector.broadcast %cst_16 : f32 to vector<128x128xf32>
    %46 = arith.addf %44, %45 : vector<128x128xf32>
    %47 = arith.mulf %46, %33 : vector<128x128xf32>
    %cst_17 = arith.constant 0.000000e+00 : f32
    %48 = vector.broadcast %cst_17 : f32 to vector<128x128xf32>
    %49 = arith.subf %48, %28 : vector<128x128xf32>
    %50 = arith.mulf %49, %28 : vector<128x128xf32>
    %51 = math.exp %50 : vector<128x128xf32>
    %52 = arith.mulf %47, %51 : vector<128x128xf32>
    %cst_18 = arith.constant 1.000000e+00 : f32
    %53 = vector.broadcast %cst_18 : f32 to vector<128x128xf32>
    %54 = arith.subf %53, %52 : vector<128x128xf32>
    %cst_19 = arith.constant 0.000000e+00 : f32
    %55 = vector.broadcast %cst_19 : f32 to vector<128x128xf32>
    %56 = arith.cmpf oge, %27, %55 : vector<128x128xf32>
    %cst_20 = arith.constant 0.000000e+00 : f32
    %57 = vector.broadcast %cst_20 : f32 to vector<128x128xf32>
    %58 = arith.subf %57, %54 : vector<128x128xf32>
    %59 = arith.select %56, %54, %58 : vector<128x128xi1>, vector<128x128xf32>
    %cst_21 = arith.constant 1.000000e+00 : f32
    %60 = vector.broadcast %cst_21 : f32 to vector<128x128xf32>
    %61 = arith.addf %60, %59 : vector<128x128xf32>
    %62 = arith.mulf %25, %61 : vector<128x128xf32>
    %63 = arith.truncf %62 : vector<128x128xf32> to vector<128x128xbf16>
    %c0_22 = arith.constant 0 : index
    %c0_23 = arith.constant 0 : index
    %64 = vector.load %arg4[%c0_22, %c0_23] : memref<128x384xbf16, #tpu.memory_space<vmem>>, vector<128x384xbf16>
    %cst_24 = arith.constant dense<0.000000e+00> : vector<128x384xf32>
    %65 = tpu.matmul %63, %64, %cst_24 {dimension_numbers = #tpu.dot_dimension_numbers<[1], [0], [0], [1], [0, 0, 1, 1], [], []>} : vector<128x128xbf16>, vector<128x384xbf16>, vector<128x384xf32> -> vector<128x384xf32>
    %66 = vector.extract_strided_slice %65 {offsets = [0, 0], sizes = [128, 128], strides = [1, 1]} : vector<128x384xf32> to vector<128x128xf32>
    %67 = vector.extract_strided_slice %65 {offsets = [0, 128], sizes = [128, 128], strides = [1, 1]} : vector<128x384xf32> to vector<128x128xf32>
    %68 = vector.extract_strided_slice %65 {offsets = [0, 256], sizes = [128, 128], strides = [1, 1]} : vector<128x384xf32> to vector<128x128xf32>
    %c1_i32_25 = arith.constant 1 : i32
    %69 = tpu.dynamic_rotate %66 by %c1_i32_25 dim 0 : vector<128x128xf32>, i32 -> vector<128x128xf32>
    %cst_26 = arith.constant 0.000000e+00 : f32
    %70 = vector.broadcast %cst_26 : f32 to vector<128x128xf32>
    %71 = arith.select %5, %69, %70 : vector<128x128xi1>, vector<128x128xf32>
    %72 = arith.addf %67, %71 : vector<128x128xf32>
    %c127_i32_27 = arith.constant 127 : i32
    %73 = tpu.dynamic_rotate %68 by %c127_i32_27 dim 0 : vector<128x128xf32>, i32 -> vector<128x128xf32>
    %cst_28 = arith.constant 0.000000e+00 : f32
    %74 = vector.broadcast %cst_28 : f32 to vector<128x128xf32>
    %75 = arith.select %7, %73, %74 : vector<128x128xi1>, vector<128x128xf32>
    %76 = arith.addf %72, %75 : vector<128x128xf32>
    %c0_29 = arith.constant 0 : index
    %c0_30 = arith.constant 0 : index
    %77 = vector.load %arg5[%c0_29, %c0_30] : memref<1x128xf32, #tpu.memory_space<vmem>>, vector<1x128xf32>
    %78 = vector.broadcast %77 : vector<1x128xf32> to vector<128x128xf32>
    %79 = arith.addf %76, %78 : vector<128x128xf32>
    %80 = arith.extf %1 : vector<128x128xbf16> to vector<128x128xf32>
    %81 = arith.addf %79, %80 : vector<128x128xf32>
    %82 = vector.shape_cast %81 : vector<128x128xf32> to vector<8x16x128xf32>
    %c0_31 = arith.constant 0 : index
    %c0_32 = arith.constant 0 : index
    %c0_33 = arith.constant 0 : index
    %83 = vector.load %arg6[%c0_31, %c0_32, %c0_33] : memref<8x16x128xf32, #tpu.memory_space<vmem>>, vector<8x16x128xf32>
    tpu.vector_store %arg6[%c0_31, %c0_32, %c0_33], %82 {strides = array<i32>} : memref<8x16x128xf32, #tpu.memory_space<vmem>>, vector<8x16x128xf32>,
    return
  }
  func.func @transform_0(%arg0: i32) -> (i32, i32, i32) {
    %c0_i32 = arith.constant 0 : i32
    %c0_i32_0 = arith.constant 0 : i32
    %c0_i32_1 = arith.constant 0 : i32
    return %arg0, %c0_i32, %c0_i32_0 : i32, i32, i32
  }
  func.func @transform_1(%arg0: i32) -> (i32, i32) {
    %c0_i32 = arith.constant 0 : i32
    %c0_i32_0 = arith.constant 0 : i32
    %c0_i32_1 = arith.constant 0 : i32
    return %c0_i32, %c0_i32_0 : i32, i32
  }
  func.func @transform_2(%arg0: i32) -> (i32, i32) {
    %c0_i32 = arith.constant 0 : i32
    %c0_i32_0 = arith.constant 0 : i32
    %c0_i32_1 = arith.constant 0 : i32
    return %c0_i32, %c0_i32_0 : i32, i32
  }
  func.func @transform_3(%arg0: i32) -> (i32, i32) {
    %c0_i32 = arith.constant 0 : i32
    %c0_i32_0 = arith.constant 0 : i32
    %c0_i32_1 = arith.constant 0 : i32
    return %c0_i32, %c0_i32_0 : i32, i32
  }
  func.func @transform_4(%arg0: i32) -> (i32, i32) {
    %c0_i32 = arith.constant 0 : i32
    %c0_i32_0 = arith.constant 0 : i32
    %c0_i32_1 = arith.constant 0 : i32
    return %c0_i32, %c0_i32_0 : i32, i32
  }
  func.func @transform_5(%arg0: i32) -> (i32, i32, i32) {
    %c0_i32 = arith.constant 0 : i32
    %c0_i32_0 = arith.constant 0 : i32
    %c0_i32_1 = arith.constant 0 : i32
    return %arg0, %c0_i32, %c0_i32_0 : i32, i32, i32
  }
}

module attributes {stable_mosaic.version = 11 : i64} {
  func.func @_resblock_kernel(%arg0: i32, %arg1: memref<8x16x128xbf16, #tpu.memory_space<vmem>>, %arg2: memref<128x384xbf16, #tpu.memory_space<vmem>>, %arg3: memref<1x128xf32, #tpu.memory_space<vmem>>, %arg4: memref<128x384xbf16, #tpu.memory_space<vmem>>, %arg5: memref<1x128xf32, #tpu.memory_space<vmem>>, %arg6: memref<8x16x128xf32, #tpu.memory_space<vmem>>) attributes {dimension_semantics = [#tpu.dimension_semantics<parallel>], iteration_bounds = array<i64: 2>, scalar_prefetch = 0 : i64, scratch_operands = 0 : i64, tpu.core_type = #tpu.core_type<tc>, window_params = [{transform_indices = @transform_0, window_bounds = array<i64: 8, 16, 128>}, {pipeline_mode = #tpu.pipeline_mode<synchronous>, transform_indices = @transform_1, window_bounds = array<i64: 128, 384>}, {pipeline_mode = #tpu.pipeline_mode<synchronous>, transform_indices = @transform_2, window_bounds = array<i64: 1, 128>}, {pipeline_mode = #tpu.pipeline_mode<synchronous>, transform_indices = @transform_3, window_bounds = array<i64: 128, 384>}, {pipeline_mode = #tpu.pipeline_mode<synchronous>, transform_indices = @transform_4, window_bounds = array<i64: 1, 128>}, {transform_indices = @transform_5, window_bounds = array<i64: 8, 16, 128>}]} {
    %c0 = arith.constant 0 : index
    %c0_0 = arith.constant 0 : index
    %c0_1 = arith.constant 0 : index
    %0 = vector.load %arg1[%c0, %c0_0, %c0_1] : memref<8x16x128xbf16, #tpu.memory_space<vmem>>, vector<8x16x128xbf16>
    %1 = vector.shape_cast %0 : vector<8x16x128xbf16> to vector<128x128xbf16>
    %2 = tpu.iota {dimensions = array<i32: 1>} : vector<8x16x128xi32>
    %3 = vector.shape_cast %2 : vector<8x16x128xi32> to vector<128x128xi32>
    %c0_i32 = arith.constant 0 : i32
    %4 = vector.broadcast %c0_i32 : i32 to vector<128x128xi32>
    %5 = arith.cmpi ne, %3, %4 : vector<128x128xi32>
    %c15_i32 = arith.constant 15 : i32
    %6 = vector.broadcast %c15_i32 : i32 to vector<128x128xi32>
    %7 = arith.cmpi ne, %3, %6 : vector<128x128xi32>
    %c0_2 = arith.constant 0 : index
    %c0_3 = arith.constant 0 : index
    %8 = vector.load %arg2[%c0_2, %c0_3] : memref<128x384xbf16, #tpu.memory_space<vmem>>, vector<128x384xbf16>
    %cst = arith.constant dense<0.000000e+00> : vector<128x384xf32>
    %9 = tpu.matmul %1, %8, %cst {dimension_numbers = #tpu.dot_dimension_numbers<[1], [0], [0], [1], [0, 0, 1, 1], [], []>} : vector<128x128xbf16>, vector<128x384xbf16>, vector<128x384xf32> -> vector<128x384xf32>
    %10 = vector.extract_strided_slice %9 {offsets = [0, 0], sizes = [128, 128], strides = [1, 1]} : vector<128x384xf32> to vector<128x128xf32>
    %11 = vector.extract_strided_slice %9 {offsets = [0, 128], sizes = [128, 128], strides = [1, 1]} : vector<128x384xf32> to vector<128x128xf32>
    %12 = vector.extract_strided_slice %9 {offsets = [0, 256], sizes = [128, 128], strides = [1, 1]} : vector<128x384xf32> to vector<128x128xf32>
    %c1_i32 = arith.constant 1 : i32
    %13 = tpu.dynamic_rotate %10 by %c1_i32 dim 0 : vector<128x128xf32>, i32 -> vector<128x128xf32>
    %cst_4 = arith.constant 0.000000e+00 : f32
    %14 = vector.broadcast %cst_4 : f32 to vector<128x128xf32>
    %15 = arith.select %5, %13, %14 : vector<128x128xi1>, vector<128x128xf32>
    %16 = arith.addf %11, %15 : vector<128x128xf32>
    %c127_i32 = arith.constant 127 : i32
    %17 = tpu.dynamic_rotate %12 by %c127_i32 dim 0 : vector<128x128xf32>, i32 -> vector<128x128xf32>
    %cst_5 = arith.constant 0.000000e+00 : f32
    %18 = vector.broadcast %cst_5 : f32 to vector<128x128xf32>
    %19 = arith.select %7, %17, %18 : vector<128x128xi1>, vector<128x128xf32>
    %20 = arith.addf %16, %19 : vector<128x128xf32>
    %c0_6 = arith.constant 0 : index
    %c0_7 = arith.constant 0 : index
    %21 = vector.load %arg3[%c0_6, %c0_7] : memref<1x128xf32, #tpu.memory_space<vmem>>, vector<1x128xf32>
    %22 = vector.broadcast %21 : vector<1x128xf32> to vector<128x128xf32>
    %23 = arith.addf %20, %22 : vector<128x128xf32>
    %cst_8 = arith.constant 5.000000e-01 : f32
    %24 = vector.broadcast %cst_8 : f32 to vector<128x128xf32>
    %25 = arith.mulf %24, %23 : vector<128x128xf32>
    %cst_9 = arith.constant 0.707106769 : f32
    %26 = vector.broadcast %cst_9 : f32 to vector<128x128xf32>
    %27 = arith.mulf %23, %26 : vector<128x128xf32>
    %28 = math.absf %27 : vector<128x128xf32>
    %cst_10 = arith.constant 0.327591091 : f32
    %29 = vector.broadcast %cst_10 : f32 to vector<128x128xf32>
    %30 = arith.mulf %29, %28 : vector<128x128xf32>
    %cst_11 = arith.constant 1.000000e+00 : f32
    %31 = vector.broadcast %cst_11 : f32 to vector<128x128xf32>
    %32 = arith.addf %31, %30 : vector<128x128xf32>
    %33 = tpu.reciprocal %32 {approx = true} : vector<128x128xf32> -> vector<128x128xf32>
    %cst_12 = arith.constant 1.06140542 : f32
    %34 = vector.broadcast %cst_12 : f32 to vector<128x128xf32>
    %35 = arith.mulf %34, %33 : vector<128x128xf32>
    %cst_13 = arith.constant -1.45315206 : f32
    %36 = vector.broadcast %cst_13 : f32 to vector<128x128xf32>
    %37 = arith.addf %35, %36 : vector<128x128xf32>
    %38 = arith.mulf %37, %33 : vector<128x128xf32>
    %cst_14 = arith.constant 1.42141378 : f32
    %39 = vector.broadcast %cst_14 : f32 to vector<128x128xf32>
    %40 = arith.addf %38, %39 : vector<128x128xf32>
    %41 = arith.mulf %40, %33 : vector<128x128xf32>
    %cst_15 = arith.constant -0.284496725 : f32
    %42 = vector.broadcast %cst_15 : f32 to vector<128x128xf32>
    %43 = arith.addf %41, %42 : vector<128x128xf32>
    %44 = arith.mulf %43, %33 : vector<128x128xf32>
    %cst_16 = arith.constant 0.254829586 : f32
    %45 = vector.broadcast %cst_16 : f32 to vector<128x128xf32>
    %46 = arith.addf %44, %45 : vector<128x128xf32>
    %47 = arith.mulf %46, %33 : vector<128x128xf32>
    %cst_17 = arith.constant 0.000000e+00 : f32
    %48 = vector.broadcast %cst_17 : f32 to vector<128x128xf32>
    %49 = arith.subf %48, %28 : vector<128x128xf32>
    %50 = arith.mulf %49, %28 : vector<128x128xf32>
    %51 = math.exp %50 : vector<128x128xf32>
    %52 = arith.mulf %47, %51 : vector<128x128xf32>
    %cst_18 = arith.constant 1.000000e+00 : f32
    %53 = vector.broadcast %cst_18 : f32 to vector<128x128xf32>
    %54 = arith.subf %53, %52 : vector<128x128xf32>
    %cst_19 = arith.constant 0.000000e+00 : f32
    %55 = vector.broadcast %cst_19 : f32 to vector<128x128xf32>
    %56 = arith.cmpf oge, %27, %55 : vector<128x128xf32>
    %cst_20 = arith.constant 0.000000e+00 : f32
    %57 = vector.broadcast %cst_20 : f32 to vector<128x128xf32>
    %58 = arith.subf %57, %54 : vector<128x128xf32>
    %59 = arith.select %56, %54, %58 : vector<128x128xi1>, vector<128x128xf32>
    %cst_21 = arith.constant 1.000000e+00 : f32
    %60 = vector.broadcast %cst_21 : f32 to vector<128x128xf32>
    %61 = arith.addf %60, %59 : vector<128x128xf32>
    %62 = arith.mulf %25, %61 : vector<128x128xf32>
    %63 = arith.truncf %62 : vector<128x128xf32> to vector<128x128xbf16>
    %c0_22 = arith.constant 0 : index
    %c0_23 = arith.constant 0 : index
    %64 = vector.load %arg4[%c0_22, %c0_23] : memref<128x384xbf16, #tpu.memory_space<vmem>>, vector<128x384xbf16>
    %cst_24 = arith.constant dense<0.000000e+00> : vector<128x384xf32>
    %65 = tpu.matmul %63, %64, %cst_24 {dimension_numbers = #tpu.dot_dimension_numbers<[1], [0], [0], [1], [0, 0, 1, 1], [], []>} : vector<128x128xbf16>, vector<128x384xbf16>, vector<128x384xf32> -> vector<128x384xf32>
    %66 = vector.extract_strided_slice %65 {offsets = [0, 0], sizes = [128, 128], strides = [1, 1]} : vector<128x384xf32> to vector<128x128xf32>
    %67 = vector.extract_strided_slice %65 {offsets = [0, 128], sizes = [128, 128], strides = [1, 1]} : vector<128x384xf32> to vector<128x128xf32>
    %68 = vector.extract_strided_slice %65 {offsets = [0, 256], sizes = [128, 128], strides = [1, 1]} : vector<128x384xf32> to vector<128x128xf32>
    %c1_i32_25 = arith.constant 1 : i32
    %69 = tpu.dynamic_rotate %66 by %c1_i32_25 dim 0 : vector<128x128xf32>, i32 -> vector<128x128xf32>
    %cst_26 = arith.constant 0.000000e+00 : f32
    %70 = vector.broadcast %cst_26 : f32 to vector<128x128xf32>
    %71 = arith.select %5, %69, %70 : vector<128x128xi1>, vector<128x128xf32>
    %72 = arith.addf %67, %71 : vector<128x128xf32>
    %c127_i32_27 = arith.constant 127 : i32
    %73 = tpu.dynamic_rotate %68 by %c127_i32_27 dim 0 : vector<128x128xf32>, i32 -> vector<128x128xf32>
    %cst_28 = arith.constant 0.000000e+00 : f32
    %74 = vector.broadcast %cst_28 : f32 to vector<128x128xf32>
    %75 = arith.select %7, %73, %74 : vector<128x128xi1>, vector<128x128xf32>
    %76 = arith.addf %72, %75 : vector<128x128xf32>
    %c0_29 = arith.constant 0 : index
    %c0_30 = arith.constant 0 : index
    %77 = vector.load %arg5[%c0_29, %c0_30] : memref<1x128xf32, #tpu.memory_space<vmem>>, vector<1x128xf32>
    %78 = vector.broadcast %77 : vector<1x128xf32> to vector<128x128xf32>
    %79 = arith.addf %76, %78 : vector<128x128xf32>
    %80 = arith.extf %1 : vector<128x128xbf16> to vector<128x128xf32>
    %81 = arith.addf %79, %80 : vector<128x128xf32>
    %82 = vector.shape_cast %81 : vector<128x128xf32> to vector<8x16x128xf32>
    %c0_31 = arith.constant 0 : index
    %c0_32 = arith.constant 0 : index
    %c0_33 = arith.constant 0 : index
    %83 = vector.load %arg6[%c0_31, %c0_32, %c0_33] : memref<8x16x128xf32, #tpu.memory_space<vmem>>, vector<8x16x128xf32>
    tpu.vector_store %arg6[%c0_31, %c0_32, %c0_33], %82 {strides = array<i32>} : memref<8x16x128xf32, #tpu.memory_space<vmem>>, vector<8x16x128xf32>,
    return
  }
  func.func @transform_0(%arg0: i32) -> (i32, i32, i32) {
    %c0_i32 = arith.constant 0 : i32
    %c0_i32_0 = arith.constant 0 : i32
    %c0_i32_1 = arith.constant 0 : i32
    return %arg0, %c0_i32, %c0_i32_0 : i32, i32, i32
  }
  func.func @transform_1(%arg0: i32) -> (i32, i32) {
    %c0_i32 = arith.constant 0 : i32
    %c0_i32_0 = arith.constant 0 : i32
    %c0_i32_1 = arith.constant 0 : i32
    return %c0_i32, %c0_i32_0 : i32, i32
  }
  func.func @transform_2(%arg0: i32) -> (i32, i32) {
    %c0_i32 = arith.constant 0 : i32
    %c0_i32_0 = arith.constant 0 : i32
    %c0_i32_1 = arith.constant 0 : i32
    return %c0_i32, %c0_i32_0 : i32, i32
  }
  func.func @transform_3(%arg0: i32) -> (i32, i32) {
    %c0_i32 = arith.constant 0 : i32
    %c0_i32_0 = arith.constant 0 : i32
    %c0_i32_1 = arith.constant 0 : i32
    return %c0_i32, %c0_i32_0 : i32, i32
  }
  func.func @transform_4(%arg0: i32) -> (i32, i32) {
    %c0_i32 = arith.constant 0 : i32
    %c0_i32_0 = arith.constant 0 : i32
    %c0_i32_1 = arith.constant 0 : i32
    return %c0_i32, %c0_i32_0 : i32, i32
  }
  func.func @transform_5(%arg0: i32) -> (i32, i32, i32) {
    %c0_i32 = arith.constant 0 : i32
    %c0_i32_0 = arith.constant 0 : i32
    %c0_i32_1 = arith.constant 0 : i32
    return %arg0, %c0_i32, %c0_i32_0 : i32, i32, i32
  }
}

</mosaic_0001>

<bundles_post_ra>
// kernel: resblock1_forward.1
= control target key start
LH: loop header
LB: loop body
LE: loop exit
PB: predicated region body
PF: predicated region fallthrough
CT: control target
= control target key end

     0   :  { %s2170_s18 = smov 0   ;;  %s3196_s0 = inlined_call_operand.vmem [shape: bf16[16,16,128], index: 0, kind: input, shape index: {}]   ;;  %s3197_s1 = inlined_call_operand.vmem [shape: bf16[128,384], index: 1, kind: input, shape index: {}]   ;;  %s3198_s2 = inlined_call_operand.vmem [shape: f32[1,128], index: 2, kind: input, shape index: {}]   ;;  %s3199_s3 = inlined_call_operand.vmem [shape: bf16[128,384], index: 3, kind: input, shape index: {}]   ;;  %s3200_s4 = inlined_call_operand.vmem [shape: f32[1,128], index: 4, kind: input, shape index: {}]   ;;  %s3201_s5 = inlined_call_operand.vmem [shape: f32[16,16,128], index: 5, kind: output, shape index: {}]  }
   0x1 LB: > { %s1746_s19 = sadd.s32 4294967295, %s2138_s18   ;;  %p1750_p0 = scmp.ge.s32.totalorder %s2138_s18, 1  ;;  %s2138_s18 = sphi %s2170_s18, %s15_s18  }
   0x2   : > { %p189_p1 = scmp.lt.s32.totalorder %s2138_s18, 3 }
   0x4   : > { %p190_p2 = pnand %p1750_p0, %p189_p1 }
   0x5   : > { %s1751_s12 = sshll.u32 (!%p190_p2), %s1746_s19, 3 }
   0x6   : > { %193 = sbr.rel (%p190_p2) target bundleno = 576 (0x240), region = 40  ;;  %p220_p3 = scmp.lt.s32.totalorder (!%p190_p2), %s1751_s12, 15 }
   0xb   : > { %v1875_v0 = vld [vmem:[%s3197_s1 + $0xa8] sm:$0xf]  ;;  %v2015_v1 = vld [vmem:[%s3197_s1 + $0xb0] sm:$0xf0]  ;;  %v2014_v2 = vld [vmem:[%s3197_s1 + $0xac] sm:$0xf] }
   0xc   : > { %v1876_v3 = vor.u32 %v2015_v1, %v1875_v0  ;;  %v1877_v4 = vld [vmem:[%s3197_s1 + $0xb4] sm:$0xf0]  ;;  %v1863_v5 = vld [vmem:[%s3197_s1 + $0x90] sm:$0xf]  ;;  %v2012_v6 = vld [vmem:[%s3197_s1 + $0x98] sm:$0xf0] }
   0xd   : > { %v1880_v7 = vor.u32 %v2014_v2, %v1877_v4  ;;  %v2011_v8 = vld [vmem:[%s3197_s1 + $0x94] sm:$0xf]  ;;  %v1865_v9 = vld [vmem:[%s3197_s1 + $0x9c] sm:$0xf0]  ;;  %v1864_v10 = vor.u32 %v2012_v6, %v1863_v5  ;;  %v1851_v12 = vld [vmem:[%s3197_s1 + $0x78] sm:$0xf] }
   0xe   : > { %464 = vmatpush.bf16.msra.mxu0 %v1876_v3  ;;  %2041 = vmatpush.bf16.msra.mxu2 %v1876_v3  ;;  %v1868_v11 = vor.u32 %v2011_v8, %v1865_v9  ;;  %v2009_v13 = vld [vmem:[%s3197_s1 + $0x80] sm:$0xf0]  ;;  %v2008_v14 = vld [vmem:[%s3197_s1 + $0x7c] sm:$0xf]  ;;  %v1853_v15 = vld [vmem:[%s3197_s1 + $0x84] sm:$0xf0] }
   0xf   : > { %2049 = vmatpush.bf16.msra.mxu3 %v1880_v7  ;;  %513 = vmatpush.bf16.msra.mxu1 %v1880_v7  ;;  %v1852_v16 = vor.u32 %v2009_v13, %v1851_v12  ;;  %v1856_v17 = vor.u32 %v2008_v14, %v1853_v15  ;;  %v1839_v18 = vld [vmem:[%s3197_s1 + $0x60] sm:$0xf]  ;;  %v2006_v19 = vld [vmem:[%s3197_s1 + $0x68] sm:$0xf0]  ;;  %v2005_v20 = vld [vmem:[%s3197_s1 + $0x64] sm:$0xf] }
  0x10   : > { %v1841_v21 = vld [vmem:[%s3197_s1 + $0x6c] sm:$0xf0]  ;;  %v1840_v22 = vor.u32 %v2006_v19, %v1839_v18  ;;  %v1827_v23 = vld [vmem:[%s3197_s1 + $0x48] sm:$0xf]  ;;  %v2003_v25 = vld [vmem:[%s3197_s1 + $0x50] sm:$0xf0] }
  0x11   : > { %v1844_v24 = vor.u32 %v2005_v20, %v1841_v21  ;;  %v2002_v26 = vld [vmem:[%s3197_s1 + $0x4c] sm:$0xf]  ;;  %v1829_v27 = vld [vmem:[%s3197_s1 + $0x54] sm:$0xf0]  ;;  %v1828_v28 = vor.u32 %v2003_v25, %v1827_v23  ;;  %v1815_v30 = vld [vmem:[%s3197_s1 + $0x30] sm:$0xf] }
  0x12   : > { %465 = vmatpush.bf16.msra.mxu0 %v1864_v10  ;;  %2042 = vmatpush.bf16.msra.mxu2 %v1864_v10  ;;  %v1832_v29 = vor.u32 %v2002_v26, %v1829_v27  ;;  %v2000_v31 = vld [vmem:[%s3197_s1 + $0x38] sm:$0xf0]  ;;  %v1999_v32 = vld [vmem:[%s3197_s1 + $0x34] sm:$0xf]  ;;  %v1817_v33 = vld [vmem:[%s3197_s1 + $0x3c] sm:$0xf0] }
  0x13   : > { %2050 = vmatpush.bf16.msra.mxu3 %v1868_v11  ;;  %514 = vmatpush.bf16.msra.mxu1 %v1868_v11  ;;  %v1816_v34 = vor.u32 %v2000_v31, %v1815_v30  ;;  %v1820_v35 = vor.u32 %v1999_v32, %v1817_v33  ;;  %v1803_v36 = vld [vmem:[%s3197_s1 + $0x18] sm:$0xf]  ;;  %v1997_v37 = vld [vmem:[%s3197_s1 + $0x20] sm:$0xf0]  ;;  %s3203_s12 = smov (!%p220_p3, %s1751_s12), 15 }
  0x14   : > { %v1996_v38 = vld [vmem:[%s3197_s1 + $0x1c] sm:$0xf]  ;;  %v1805_v39 = vld [vmem:[%s3197_s1 + $0x24] sm:$0xf0]  ;;  %v1804_v40 = vor.u32 %v1997_v37, %v1803_v36  ;;  %v1791_v41 = vld [vmem:[%s3197_s1] sm:$0xf] }
  0x15   : > { %v1808_v42 = vor.u32 %v1996_v38, %v1805_v39  ;;  %v1994_v43 = vld [vmem:[%s3197_s1 + $0x8] sm:$0xf0]  ;;  %s1983_s9 = sshll.u32 %s3203_s12, 3  ;;  %v1993_v44 = vld [vmem:[%s3197_s1 + $0x4] sm:$0xf]  ;;  %s1984_s19 = sshll.u32 %s3203_s12, 4 }
  0x16   : > { %466 = vmatpush.bf16.msra.mxu0 %v1852_v16  ;;  %2043 = vmatpush.bf16.msra.mxu2 %v1852_v16  ;;  %v1793_v45 = vld [vmem:[%s3197_s1 + $0xc] sm:$0xf0]  ;;  %v2016_v47 = vld [vmem:[%s3197_s1 + $0xb8] sm:$0xf0]  ;;  %v1792_v48 = vor.u32 %v1994_v43, %v1791_v41  ;;  %s2288_s22 = scalar_lea.vmem %s3196_s0, %s1983_s9  ;;  %v1871_v51 = vld [vmem:[%s3197_s1 + $0x98] sm:$0xf]  ;;  %s3058_s24 = scalar_lea.vmem %s3201_s5, %s1984_s19 }
  0x17   : > { %2051 = vmatpush.bf16.msra.mxu3 %v1856_v17  ;;  %515 = vmatpush.bf16.msra.mxu1 %v1856_v17  ;;  %v1883_v46 = vld [vmem:[%s3197_s1 + $0xb0] sm:$0xf]  ;;  %v1796_v49 = vor.u32 %v1993_v44, %v1793_v45  ;;  %v2013_v52 = vld [vmem:[%s3197_s1 + $0xa0] sm:$0xf0]  ;;  %v1859_v56 = vld [vmem:[%s3197_s1 + $0x80] sm:$0xf]  ;;  %v249_v17 = vlaneseq }
  0x18   : > { %v1884_v50 = vor.u32 %v2016_v47, %v1883_v46  ;;  %v1985_v53 = vld [vmem:[%s2288_s22] sm:$0xff]  ;;  %v1872_v55 = vor.u32 %v2013_v52, %v1871_v51  ;;  %v2010_v57 = vld [vmem:[%s3197_s1 + $0x88] sm:$0xf0]  ;;  %v1847_v59 = vld [vmem:[%s3197_s1 + $0x68] sm:$0xf] }
  0x19   : > { %v1989_v54 = vld [vmem:[%s2288_s22 + $0x20] sm:$0xff]  ;;  %v1860_v58 = vor.u32 %v2010_v57, %v1859_v56  ;;  %v2007_v60 = vld [vmem:[%s3197_s1 + $0x70] sm:$0xf0]  ;;  %v1835_v62 = vld [vmem:[%s3197_s1 + $0x50] sm:$0xf]  ;;  %v2342_v18 = vshrl.u32 %v249_v17, 7 }
  0x1a   : > { %467 = vmatpush.bf16.msra.mxu0 %v1840_v22  ;;  %2044 = vmatpush.bf16.msra.mxu2 %v1840_v22  ;;  %v1848_v61 = vor.u32 %v2007_v60, %v1847_v59  ;;  %v2004_v63 = vld [vmem:[%s3197_s1 + $0x58] sm:$0xf0]  ;;  %v1823_v1 = vld [vmem:[%s3197_s1 + $0x38] sm:$0xf]  ;;  %v2001_v2 = vld [vmem:[%s3197_s1 + $0x40] sm:$0xf0] }
  0x1b   : > { %2052 = vmatpush.bf16.msra.mxu3 %v1844_v24  ;;  %516 = vmatpush.bf16.msra.mxu1 %v1844_v24  ;;  %v1836_v0 = vor.u32 %v2004_v63, %v1835_v62  ;;  %v1986_v3 = vld [vmem:[%s2288_s22 + $0x8] sm:$0xff]  ;;  %v1824_v5 = vor.u32 %v2001_v2, %v1823_v1  ;;  %v1811_v6 = vld [vmem:[%s3197_s1 + $0x20] sm:$0xf]  ;;  %v1995_v10 = vld [vmem:[%s3197_s1 + $0x10] sm:$0xf0]  ;;  %vm627_vm0 = vcmp.lt.s32.totalorder %v2342_v18, 1 }
  0x1c   : > { %v1990_v4 = vld [vmem:[%s2288_s22 + $0x28] sm:$0xff]  ;;  %v1987_v12 = vld [vmem:[%s2288_s22 + $0x10] sm:$0xff]  ;;  %v1988_v14 = vld [vmem:[%s2288_s22 + $0x18] sm:$0xff]  ;;  %vm252_vm1 = vcmp.ne.s32.totalorder %v2342_v18, 0  ;;  %vm692_vm2 = vcmp.lt.s32.totalorder %v2342_v18, 7 }
  0x1d   : > { %v1998_v7 = vld [vmem:[%s3197_s1 + $0x28] sm:$0xf0]  ;;  %v1799_v9 = vld [vmem:[%s3197_s1 + $0x8] sm:$0xf]  ;;  %v1991_v13 = vld [vmem:[%s2288_s22 + $0x30] sm:$0xff] }
  0x1e   : > { %468 = vmatpush.bf16.msra.mxu0 %v1828_v28  ;;  %2045 = vmatpush.bf16.msra.mxu2 %v1828_v28  ;;  %v1812_v8 = vor.u32 %v1998_v7, %v1811_v6  ;;  %v1800_v11 = vor.u32 %v1995_v10, %v1799_v9  ;;  %v1992_v15 = vld [vmem:[%s2288_s22 + $0x38] sm:$0xff]  ;;  %v1971_v32 = vld [vmem:[%s3199_s3 + $0xa8] sm:$0xf]  ;;  %v2039_v33 = vld [vmem:[%s3199_s3 + $0xb0] sm:$0xf0] }
  0x1f   : > { %2053 = vmatpush.bf16.msra.mxu3 %v1832_v29  ;;  %517 = vmatpush.bf16.msra.mxu1 %v1832_v29  ;;  %v1959_v47 = vld [vmem:[%s3199_s3 + $0x90] sm:$0xf]  ;;  %v1973_v59 = vld [vmem:[%s3199_s3 + $0xb4] sm:$0xf0]  ;;  %v2033_v63 = vld [vmem:[%s3199_s3 + $0x80] sm:$0xf0] }
  0x20   : > { %v1947_v60 = vld [vmem:[%s3199_s3 + $0x78] sm:$0xf]  ;;  %v2037_v1 = vld [vmem:[%s3199_s3 + $0xa0] sm:$0xf0]  ;;  %v2434_v7 = vld [vmem:[%s3198_s2] ss:$0 sm:$0xff] }
  0x21   : > { %v2035_v10 = vld [vmem:[%s3199_s3 + $0x94] sm:$0xf]  ;;  %v2030_v17 = vld [vmem:[%s3199_s3 + $0x68] sm:$0xf0] }
  0x22   : > { %469 = vmatpush.bf16.msra.mxu0 %v1816_v34  ;;  %2046 = vmatpush.bf16.msra.mxu2 %v1816_v34  ;;  %v1972_v34 = vor.u32 %v2039_v33, %v1971_v32  ;;  %v1949_v32 = vld [vmem:[%s3199_s3 + $0x84] sm:$0xf0] }
  0x23   : > { %2054 = vmatpush.bf16.msra.mxu3 %v1820_v35  ;;  %518 = vmatpush.bf16.msra.mxu1 %v1820_v35 }
  0x26   : > { %470 = vmatpush.bf16.msra.mxu0 %v1804_v40  ;;  %2047 = vmatpush.bf16.msra.mxu2 %v1804_v40 }
  0x27   : > { %2055 = vmatpush.bf16.msra.mxu3 %v1808_v42  ;;  %519 = vmatpush.bf16.msra.mxu1 %v1808_v42 }
  0x2a   : > { %471 = vmatpush.bf16.msra.mxu0 %v1792_v48  ;;  %2048 = vmatpush.bf16.msra.mxu2 %v1792_v48  ;;  %v2036_v48 = vld [vmem:[%s3199_s3 + $0x98] sm:$0xf0] }
  0x2b   : > { %2056 = vmatpush.bf16.msra.mxu3 %v1796_v49  ;;  %520 = vmatpush.bf16.msra.mxu1 %v1796_v49  ;;  %v1979_v49 = vld [vmem:[%s3199_s3 + $0xb0] sm:$0xf]  ;;  %v1960_v52 = vor.u32 %v2036_v48, %v1959_v47  ;;  %v2031_v47 = vld [vmem:[%s3199_s3 + $0x70] sm:$0xf0] }
  0x2d   : > { %472 = vmatmul.bf16.vlgmr.msra.gmra.mxu0 %v1985_v53  ;;  %492 = vmatmul.bf16.vlgmr.msra.gmra.mxu2 %v1989_v54 }
  0x2e   : > { %562 = vmatpush.bf16.msrb.mxu2 %v1884_v50  ;;  %541 = vmatmul.bf16.vlgmr.msra.gmra.mxu3 %v1989_v54 }
  0x2f   : > { %521 = vmatmul.bf16.vlgmr.msra.gmra.mxu1 %v1985_v53  ;;  %1345 = vmatpush.bf16.msrb.mxu3 %v1972_v34 }
  0x32   : > { %563 = vmatpush.bf16.msrb.mxu2 %v1872_v55 }
  0x33   : > { %1346 = vmatpush.bf16.msrb.mxu3 %v1960_v52  ;;  %v2029_v52 = vld [vmem:[%s3199_s3 + $0x64] sm:$0xf] }
  0x36   : > { %564 = vmatpush.bf16.msrb.mxu2 %v1860_v58  ;;  %v2038_v58 = vld [vmem:[%s3199_s3 + $0xac] sm:$0xf] }
  0x37   : > { %v1976_v62 = vor.u32 %v2038_v58, %v1973_v59  ;;  %v1923_v58 = vld [vmem:[%s3199_s3 + $0x48] sm:$0xf]  ;;  %v2027_v59 = vld [vmem:[%s3199_s3 + $0x50] sm:$0xf0] }
  0x39   : > { %1394 = vmatpush.bf16.msrb.mxu0 %v1976_v62 }
  0x3a   : > { %565 = vmatpush.bf16.msrb.mxu2 %v1848_v61 }
  0x3d   : > { %477 = vmatmul.bf16.gmra.mxu0 %v1986_v3  ;;  %497 = vmatmul.bf16.gmra.mxu2 %v1990_v4 }
  0x3e   : > { %566 = vmatpush.bf16.msrb.mxu2 %v1836_v0  ;;  %546 = vmatmul.bf16.gmra.mxu3 %v1990_v4  ;;  %v1967_v0 = vld [vmem:[%s3199_s3 + $0x98] sm:$0xf] }
  0x3f   : > { %526 = vmatmul.bf16.gmra.mxu1 %v1986_v3 }
  0x42   : > { %567 = vmatpush.bf16.msrb.mxu2 %v1824_v5 }
  0x46   : > { %568 = vmatpush.bf16.msrb.mxu2 %v1812_v8 }
  0x4a   : > { %569 = vmatpush.bf16.msrb.mxu2 %v1800_v11  ;;  %v1961_v11 = vld [vmem:[%s3199_s3 + $0x9c] sm:$0xf0] }
  0x4d   : > { %482 = vmatmul.bf16.gmra.mxu0 %v1987_v12  ;;  %502 = vmatmul.bf16.gmra.mxu2 %v1991_v13 }
  0x4e   : > { %551 = vmatmul.bf16.gmra.mxu3 %v1991_v13 }
  0x4f   : > { %531 = vmatmul.bf16.gmra.mxu1 %v1987_v12 }
  0x5d   : > { %487 = vmatmul.bf16.gmra.mxu0 %v1988_v14  ;;  %507 = vmatmul.bf16.gmra.mxu2 %v1992_v15 }
  0x5e   : > { %556 = vmatmul.bf16.gmra.mxu3 %v1992_v15 }
  0x5f   : > { %536 = vmatmul.bf16.gmra.mxu1 %v1988_v14 }
  0x6d   : > { %570 = vmatmul.bf16.vlgmr.msrb.gmra.mxu2 %v1985_v53  ;;  %v2040_v53 = vld [vmem:[%s3199_s3 + $0xb8] sm:$0xf0] }
  0x7d   : > { %575 = vmatmul.bf16.gmra.mxu2 %v1986_v3  ;;  %v1948_v3 = vor.u32 %v2033_v63, %v1947_v60 }
  0x7f   : > { %1347 = vmatpush.bf16.msrb.mxu3 %v1948_v3  ;;  %v1931_v3 = vld [vmem:[%s3199_s3 + $0x50] sm:$0xf] }
  0x8d   : > { %580 = vmatmul.bf16.gmra.mxu2 %v1987_v12 }
  0x9d   : > { %585 = vmatmul.bf16.gmra.mxu2 %v1988_v14  ;;  %v1964_v14 = vor.u32 %v2035_v10, %v1961_v11  ;;  %v1925_v10 = vld [vmem:[%s3199_s3 + $0x54] sm:$0xf0] }
  0x9f   : > { %1395 = vmatpush.bf16.msrb.mxu0 %v1964_v14 }
  0xaa   : > { %v2360_v29 = vpop.f32.mrf.mxu0 }
  0xab   : > { %v611_v55 = vrot.slane %v2360_v29, 7 }
  0xac   : > { %v522_v44 = vpop.f32.mrf.mxu1 }
  0xad   : > { %590 = vmatmul.bf16.gmra.mxu2 %v1989_v54  ;;  %v1980_v54 = vor.u32 %v2040_v53, %v1979_v49  ;;  %v1937_v53 = vld [vmem:[%s3199_s3 + $0x6c] sm:$0xf0] }
  0xae   : > { %v1940_v60 = vor.u32 %v2029_v52, %v1937_v53 }
  0xaf   : > { %1443 = vmatpush.bf16.msrb.mxu1 %v1980_v54 }
  0xb0   : > { %v2340_v16 = vpop.f32.mrf.mxu2 }
  0xb1   : > { %v619_v20 = vrot.slane %v2340_v16, 7 }
  0xb2   : > { %v2372_v36 = vpop.f32.mrf.mxu0 }
  0xb4   : > { %v524_v57 = vpop.f32.mrf.mxu1 }
  0xb8   : > { %v495_v19 = vpop.f32.mrf.mxu2 }
  0xb9   : > { %v620_v21 = vrot.slane %v495_v19, 7  ;;  %v1955_v19 = vld [vmem:[%s3199_s3 + $0x80] sm:$0xf] }
  0xba   : > { %v2378_v41 = vpop.f32.mrf.mxu0 }
  0xbb   : > { %v2350_v22 = vsel %vm627_vm0, %v619_v20, %v620_v21 }
  0xbd   : > { %595 = vmatmul.bf16.gmra.mxu2 %v1990_v4  ;;  %v1968_v4 = vor.u32 %v2037_v1, %v1967_v0  ;;  %v1924_v0 = vor.u32 %v2027_v59, %v1923_v58  ;;  %v1907_v59 = vld [vmem:[%s3199_s3 + $0x20] sm:$0xf] }
  0xbf   : > { %1444 = vmatpush.bf16.msrb.mxu1 %v1968_v4  ;;  %v2028_v4 = vld [vmem:[%s3199_s3 + $0x58] sm:$0xf0] }
  0xc0   : > { %v498_v23 = vpop.f32.mrf.mxu2 }
  0xc1   : > { %v621_v24 = vrot.slane %v498_v23, 7 }
  0xc2   : > { %v2393_v50 = vpop.f32.mrf.mxu0 }
  0xc3   : > { %v2354_v25 = vsel %vm627_vm0, %v620_v21, %v621_v24 }
  0xc8   : > { %v500_v26 = vpop.f32.mrf.mxu2 }
  0xc9   : > { %v622_v27 = vrot.slane %v500_v26, 7  ;;  %v612_v26 = vrot.slane %v2372_v36, 7 }
  0xca   : > { %v2425_v2 = vpop.f32.mrf.mxu0 }
  0xcb   : > { %v2358_v28 = vsel %vm627_vm0, %v621_v24, %v622_v27  ;;  %v2034_v24 = vld [vmem:[%s3199_s3 + $0x88] sm:$0xf0] }
  0xcc   : > { %v1956_v29 = vor.u32 %v2034_v24, %v1955_v19 }
  0xcd   : > { %600 = vmatmul.bf16.gmra.mxu2 %v1991_v13  ;;  %v2443_v13 = vpop.f32.mrf.mxu1 }
  0xce   : > { %1445 = vmatpush.bf16.msrb.mxu1 %v1956_v29  ;;  %v2025_v29 = vld [vmem:[%s3199_s3 + $0x40] sm:$0xf0] }
  0xd0   : > { %v503_v30 = vpop.f32.mrf.mxu2 }
  0xd1   : > { %v623_v31 = vrot.slane %v503_v30, 7  ;;  %v2463_v30 = vadd.s32 8, %v2342_v18 }
  0xd2   : > { %v2474_v36 = vpop.f32.mrf.mxu0 }
  0xd3   : > { %v2370_v35 = vsel %vm627_vm0, %v622_v27, %v623_v31  ;;  %vm255_vm3 = vcmp.ne.s32.totalorder %v2463_v30, 15 }
  0xd5   : > { %v2515_v63 = vpop.f32.mrf.mxu1 }
  0xd8   : > { %v505_v37 = vpop.f32.mrf.mxu2 }
  0xd9   : > { %v624_v38 = vrot.slane %v505_v37, 7  ;;  %v613_v37 = vrot.slane %v2378_v41, 7 }
  0xdb   : > { %v2376_v39 = vsel %vm627_vm0, %v623_v31, %v624_v38  ;;  %v2032_v31 = vld [vmem:[%s3199_s3 + $0x7c] sm:$0xf]  ;;  %v641_v62 = vsel %vm627_vm0, %v612_v26, %v613_v37 }
  0xdc   : > { %v1952_v34 = vor.u32 %v2032_v31, %v1949_v32  ;;  %v646_v11 = vsel %vm252_vm1, %v641_v62, 0.0 }
  0xdd   : > { %605 = vmatmul.bf16.gmra.mxu2 %v1992_v15  ;;  %v1935_v15 = vld [vmem:[%s3199_s3 + $0x60] sm:$0xf]  ;;  %v662_v24 = vadd.f32 %v646_v11, %v2443_v13  ;;  %v2575_v58 = vpop.f32.mrf.mxu1 }
  0xde   : > { %v1936_v23 = vor.u32 %v2030_v17, %v1935_v15  ;;  %1396 = vmatpush.bf16.msrb.mxu0 %v1952_v34  ;;  %v2534_v17 = vpop.f32.mrf.mxu0 }
  0xe0   : > { %v508_v40 = vpop.f32.mrf.mxu2  ;;  %1348 = vmatpush.bf16.msrb.mxu3 %v1936_v23  ;;  %v1911_v23 = vld [vmem:[%s3199_s3 + $0x30] sm:$0xf] }
  0xe1   : > { %v625_v42 = vrot.slane %v508_v40, 7 }
  0xe2   : > { %1397 = vmatpush.bf16.msrb.mxu0 %v1940_v60  ;;  %v2022_v60 = vld [vmem:[%s3199_s3 + $0x28] sm:$0xf0] }
  0xe3   : > { %v2382_v43 = vsel %vm627_vm0, %v624_v38, %v625_v42  ;;  %v642_v38 = vsel %vm627_vm0, %v611_v55, %v612_v26  ;;  %v2024_v26 = vld [vmem:[%s3199_s3 + $0x38] sm:$0xf0] }
  0xe4   : > { %v661_v54 = vadd.f32 %v642_v38, %v524_v57  ;;  %1349 = vmatpush.bf16.msrb.mxu3 %v1924_v0  ;;  %v1912_v34 = vor.u32 %v2024_v26, %v1911_v23  ;;  %v2020_v0 = vld [vmem:[%s3199_s3 + $0x1c] sm:$0xf]  ;;  %v2017_v23 = vld [vmem:[%s3199_s3 + $0x4] sm:$0xf] }
  0xe8   : > { %v510_v45 = vpop.f32.mrf.mxu2  ;;  %1350 = vmatpush.bf16.msrb.mxu3 %v1912_v34  ;;  %v1895_v34 = vld [vmem:[%s3199_s3 + $0x8] sm:$0xf] }
  0xe9   : > { %v626_v46 = vrot.slane %v510_v45, 7 }
  0xeb   : > { %v2397_v51 = vsel %vm627_vm0, %v625_v42, %v626_v46  ;;  %v643_v61 = vsel %vm627_vm0, %v626_v46, %v611_v55  ;;  %v1943_v46 = vld [vmem:[%s3199_s3 + $0x68] sm:$0xf] }
  0xec   : > { %v644_v5 = vsel %vm252_vm1, %v643_v61, 0.0  ;;  %v1944_v49 = vor.u32 %v2031_v47, %v1943_v46  ;;  %v1913_v46 = vld [vmem:[%s3199_s3 + $0x3c] sm:$0xf0]  ;;  %v614_v47 = vrot.slane %v2393_v50, 7  ;;  %v2021_v50 = vld [vmem:[%s3199_s3 + $0x20] sm:$0xf0] }
  0xed   : > { %v660_v12 = vadd.f32 %v644_v5, %v522_v44  ;;  %v2482_v44 = vpop.f32.mrf.mxu3  ;;  %v2026_v5 = vld [vmem:[%s3199_s3 + $0x4c] sm:$0xf] }
  0xee   : > { %1446 = vmatpush.bf16.msrb.mxu1 %v1944_v49  ;;  %v1928_v14 = vor.u32 %v2026_v5, %v1925_v10 }
  0xf0   : > { %v2403_v56 = vpop.f32.mrf.mxu2  ;;  %1398 = vmatpush.bf16.msrb.mxu0 %v1928_v14  ;;  %v1887_v14 = vld [vmem:[%s3199_s3] sm:$0xf] }
  0xf1   : > { %v676_v8 = vrot.slane %v2403_v56, 1 }
  0xf5   : > { %v2552_v31 = vpop.f32.mrf.mxu3 }
  0xf6   : > { %v2671_v16 = vadd.f32 %v2350_v22, %v2552_v31 }
  0xf8   : > { %v573_v6 = vpop.f32.mrf.mxu2 }
  0xf9   : > { %v677_v9 = vrot.slane %v573_v6, 1 }
  0xfb   : > { %v707_v21 = vsel %vm692_vm2, %v676_v8, %v677_v9 }
  0xfc   : > { %v725_v27 = vadd.f32 %v707_v21, %v660_v12 }
  0xfe   : > { %v2472_v33 = vadd.f32 %v2434_v7, %v725_v27  ;;  %v1919_v27 = vld [vmem:[%s3199_s3 + $0x38] sm:$0xf] }
  0xff   : > { %v1920_v38 = vor.u32 %v2025_v29, %v1919_v27 }
 0x100   : > { %v2480_v40 = vmul.f32 0.70710677, %v2472_v33  ;;  %v576_v42 = vpop.f32.mrf.mxu2 }
 0x101   : > { %v678_v45 = vrot.slane %v576_v42, 1  ;;  %v2023_v42 = vld [vmem:[%s3199_s3 + $0x34] sm:$0xf] }
 0x102   : > { %v2492_v48 = vand.u32 2147483647, %v2480_v40  ;;  %v1916_v52 = vor.u32 %v2023_v42, %v1913_v46  ;;  %vm1097_vm4 = vcmp.ge.f32.partialorder %v2480_v40, 0.0 }
 0x103   : > { %v706_v55 = vsel %vm692_vm2, %v677_v9, %v678_v45  ;;  %v1932_v9 = vor.u32 %v2028_v4, %v1931_v3  ;;  %v615_v3 = vrot.slane %v2425_v2, 7  ;;  %v640_v4 = vsel %vm627_vm0, %v613_v37, %v614_v47  ;;  %v2018_v37 = vld [vmem:[%s3199_s3 + $0x8] sm:$0xf0] }
 0x104   : > { %v809_v61 = vmul.f32 0.3275911, %v2492_v48  ;;  %v710_v57 = vsel %vm255_vm3, %v706_v55, 0.0  ;;  %1399 = vmatpush.bf16.msrb.mxu0 %v1916_v52  ;;  %v1001_v10 = vsub.f32 0.0, %v2492_v48  ;;  %v663_v26 = vadd.f32 %v640_v4, %v2515_v63  ;;  %v534_v4 = vpop.f32.mrf.mxu1 }
 0x105   : > { %v726_v1 = vadd.f32 %v710_v57, %v661_v54  ;;  %1447 = vmatpush.bf16.msrb.mxu1 %v1932_v9  ;;  %v1908_v57 = vor.u32 %v2022_v60, %v1907_v59  ;;  %v1888_v29 = vor.u32 %v2018_v37, %v1887_v14  ;;  %v639_v63 = vsel %vm627_vm0, %v614_v47, %v615_v3 }
 0x106   : > { %v825_v6 = vadd.f32 1.0, %v809_v61  ;;  %v1017_v59 = vmul.f32 %v1001_v10, %v2492_v48  ;;  %v648_v47 = vsel %vm252_vm1, %v639_v63, 0.0  ;;  %v616_v48 = vrot.slane %v2474_v36, 7 }
 0x107   : > { %v2532_v12 = vadd.f32 %v2434_v7, %v726_v1  ;;  %v1901_v1 = vld [vmem:[%s3199_s3 + $0x24] sm:$0xf0]  ;;  %v617_v10 = vrot.slane %v2534_v17, 7 }
 0x108   : > { %2067 = vrcp.f32 %v825_v6  ;;  %v578_v15 = vpop.f32.mrf.mxu2  ;;  %v1904_v9 = vor.u32 %v2020_v0, %v1901_v1  ;;  %v654_v1 = vsel %vm252_vm1, %v2354_v25, 0.0  ;;  %v1033_v36 = vmul.f32 1.442695, %v1017_v59 }
 0x109   : > { %v2537_v19 = vmul.f32 0.70710677, %v2532_v12  ;;  %v679_v21 = vrot.slane %v578_v15, 1  ;;  %1448 = vmatpush.bf16.msrb.mxu1 %v1920_v38  ;;  %v2019_v38 = vld [vmem:[%s3199_s3 + $0x10] sm:$0xf0]  ;;  %v637_v31 = vsel %vm627_vm0, %v616_v48, %v617_v10 }
 0x10a   : > { %1400 = vmatpush.bf16.msrb.mxu0 %v1904_v9 }
 0x10b   : > { %v2555_v32 = vand.u32 2147483647, %v2537_v19  ;;  %v705_v13 = vsel %vm692_vm2, %v678_v45, %v679_v21  ;;  %v1899_v45 = vld [vmem:[%s3199_s3 + $0x18] sm:$0xf]  ;;  %vm1098_vm5 = vcmp.ge.f32.partialorder %v2537_v19, 0.0 }
 0x10c   : > { %v727_v49 = vadd.f32 %v705_v13, %v662_v24  ;;  %v1900_v62 = vor.u32 %v2021_v50, %v1899_v45  ;;  %v2614_v24 = vpop.f32.mrf.mxu0  ;;  %v1889_v13 = vld [vmem:[%s3199_s3 + $0xc] sm:$0xf0] }
 0x10d   : > { %v810_v53 = vmul.f32 0.3275911, %v2555_v32  ;;  %1449 = vmatpush.bf16.msrb.mxu1 %v1908_v57  ;;  %v1892_v46 = vor.u32 %v2017_v23, %v1889_v13  ;;  %v618_v50 = vrot.slane %v2614_v24, 7  ;;  %v664_v23 = vadd.f32 %v648_v47, %v2575_v58 }
 0x10e   : > { %v2570_v54 = vpop.eup %2067  ;;  %v2573_v55 = vadd.f32 %v2434_v7, %v727_v49  ;;  %1351 = vmatpush.bf16.msrb.mxu3 %v1900_v62  ;;  %v547_v49 = vpop.f32.mrf.mxu3  ;;  %v1002_v62 = vsub.f32 0.0, %v2555_v32 }
 0x10f   : > { %v826_v61 = vadd.f32 1.0, %v810_v53  ;;  %v857_v41 = vmul.f32 1.0614054, %v2570_v54  ;;  %v1896_v53 = vor.u32 %v2019_v38, %v1895_v34  ;;  %1401 = vmatpush.bf16.msrb.mxu0 %v1892_v46  ;;  %v635_v25 = vsel %vm627_vm0, %v618_v50, %v619_v20 }
 0x110   : > { %v2598_v5 = vmul.f32 0.70710677, %v2573_v55  ;;  %v581_v6 = vpop.f32.mrf.mxu2  ;;  %v2673_v38 = vadd.f32 %v654_v1, %v547_v49  ;;  %v650_v1 = vsel %vm252_vm1, %v637_v31, 0.0 }
 0x111   : > { %2069 = vrcp.f32 %v826_v61  ;;  %v680_v11 = vrot.slane %v581_v6, 1  ;;  %v873_v45 = vadd.f32 -1.4531521, %v857_v41  ;;  %1450 = vmatpush.bf16.msrb.mxu1 %v1896_v53 }
 0x112   : > { %v2606_v15 = vand.u32 2147483647, %v2598_v5  ;;  %1352 = vmatpush.bf16.msrb.mxu3 %v1888_v29  ;;  %vm1099_vm6 = vcmp.ge.f32.partialorder %v2598_v5, 0.0 }
 0x113   : > { %v704_v27 = vsel %vm692_vm2, %v679_v21, %v680_v11  ;;  %v889_v0 = vmul.f32 %v2570_v54, %v873_v45 }
 0x114   : > { %v811_v42 = vmul.f32 0.3275911, %v2606_v15  ;;  %v712_v21 = vsel %vm255_vm3, %v704_v27, 0.0  ;;  %v1018_v27 = vmul.f32 %v1002_v62, %v2555_v32  ;;  %v2679_v32 = vsel %vm252_vm1, %v2370_v35, 0.0 }
 0x115   : > { %v728_v52 = vadd.f32 %v712_v21, %v663_v26  ;;  %v905_v37 = vadd.f32 1.4214138, %v889_v0  ;;  %v1003_v59 = vsub.f32 0.0, %v2606_v15 }
 0x116   : > { %v827_v60 = vadd.f32 1.0, %v811_v42  ;;  %v2683_v42 = vsel %vm252_vm1, %v635_v25, 0.0  ;;  %v549_v46 = vpop.f32.mrf.mxu3  ;;  %v1035_v49 = vmul.f32 1.442695, %v1018_v27  ;;  %v537_v25 = vpop.f32.mrf.mxu1 }
 0x117   : > { %v2637_v61 = vpop.eup %2069  ;;  %v2643_v57 = vadd.f32 %v2434_v7, %v728_v52  ;;  %v921_v34 = vmul.f32 %v2570_v54, %v905_v37  ;;  %v2709_v37 = vadd.f32 %v2358_v28, %v549_v46 }
 0x118   : > { %2071 = vrcp.f32 %v827_v60  ;;  %v583_v6 = vpop.f32.mrf.mxu2  ;;  %v858_v9 = vmul.f32 1.0614054, %v2637_v61  ;;  %v638_v60 = vsel %vm627_vm0, %v615_v3, %v616_v48 }
 0x119   : > { %v2653_v14 = vmul.f32 0.70710677, %v2643_v57  ;;  %v681_v41 = vrot.slane %v583_v6, 1  ;;  %v937_v63 = vadd.f32 -0.28449672, %v921_v34  ;;  %2073 = vpow2.f32 %v1033_v36 }
 0x11a   : > { %v874_v26 = vadd.f32 -1.4531521, %v858_v9  ;;  %v665_v36 = vadd.f32 %v638_v60, %v534_v4 }
 0x11b   : > { %v2664_v29 = vand.u32 2147483647, %v2653_v14  ;;  %v703_v13 = vsel %vm692_vm2, %v680_v11, %v681_v41  ;;  %v953_v53 = vmul.f32 %v2570_v54, %v937_v63  ;;  %vm1100_vm7 = vcmp.ge.f32.partialorder %v2653_v14, 0.0 }
 0x11c   : > { %v729_v20 = vadd.f32 %v703_v13, %v664_v23  ;;  %v890_v58 = vmul.f32 %v2637_v61, %v874_v26  ;;  %v1019_v13 = vmul.f32 %v1003_v59, %v2606_v15 }
 0x11d   : > { %v812_v11 = vmul.f32 0.3275911, %v2664_v29  ;;  %v969_v9 = vadd.f32 0.2548296, %v953_v53  ;;  %v1004_v31 = vsub.f32 0.0, %v2664_v29 }
 0x11e   : > { %v2686_v21 = vpop.eup %2071  ;;  %v2689_v22 = vadd.f32 %v2434_v7, %v729_v20  ;;  %v906_v35 = vadd.f32 1.4214138, %v890_v58  ;;  %v666_v58 = vadd.f32 %v650_v1, %v537_v25  ;;  %v1037_v53 = vmul.f32 1.442695, %v1019_v13 }
 0x11f   : > { %v828_v52 = vadd.f32 1.0, %v812_v11  ;;  %v859_v45 = vmul.f32 1.0614054, %v2686_v21  ;;  %v985_v26 = vmul.f32 %v2570_v54, %v969_v9  ;;  %v2074_v27 = vpop.eup %2073  ;;  %v761_v54 = vmul.f32 0.5, %v2472_v33 }
 0x120   : > { %v2703_v62 = vmul.f32 0.70710677, %v2689_v22  ;;  %v586_v47 = vpop.f32.mrf.mxu2  ;;  %v922_v0 = vmul.f32 %v2637_v61, %v906_v35  ;;  %v1020_v25 = vmul.f32 %v1004_v31, %v2664_v29 }
 0x121   : > { %2075 = vrcp.f32 %v828_v52  ;;  %v682_v6 = vrot.slane %v586_v47, 1  ;;  %v875_v48 = vadd.f32 -1.4531521, %v859_v45  ;;  %v1065_v63 = vmul.f32 %v2074_v27, %v985_v26 }
 0x122   : > { %v2712_v2 = vand.u32 2147483647, %v2703_v62  ;;  %v938_v3 = vadd.f32 -0.28449672, %v922_v0  ;;  %2077 = vpow2.f32 %v1035_v49  ;;  %v636_v26 = vsel %vm627_vm0, %v617_v10, %v618_v50  ;;  %v539_v10 = vpop.f32.mrf.mxu1 }
 0x123   : > { %v702_v23 = vsel %vm692_vm2, %v681_v41, %v682_v6  ;;  %v891_v4 = vmul.f32 %v2686_v21, %v875_v48  ;;  %v1081_v49 = vsub.f32 1.0, %v1065_v63  ;;  %v1039_v17 = vmul.f32 1.442695, %v1020_v25 }
 0x124   : > { %v813_v34 = vmul.f32 0.3275911, %v2712_v2  ;;  %v714_v28 = vsel %vm255_vm3, %v702_v23, 0.0  ;;  %v954_v20 = vmul.f32 %v2637_v61, %v938_v3  ;;  %v762_v3 = vmul.f32 0.5, %v2532_v12 }
 0x125   : > { %v730_v11 = vadd.f32 %v714_v28, %v665_v36  ;;  %v907_v52 = vadd.f32 1.4214138, %v891_v4  ;;  %v1113_v1 = vsub.f32 0.0, %v1081_v49  ;;  %v1005_v31 = vsub.f32 0.0, %v2712_v2 }
 0x126   : > { %v829_v41 = vadd.f32 1.0, %v813_v34  ;;  %v970_v35 = vadd.f32 0.2548296, %v954_v20  ;;  %vm1101_vm8 = vcmp.ge.f32.partialorder %v2703_v62, 0.0 }
 0x127   : > { %v2725_v46 = vpop.eup %2075  ;;  %v2728_v15 = vadd.f32 %v2434_v7, %v730_v11  ;;  %v923_v9 = vmul.f32 %v2686_v21, %v907_v52  ;;  %v1129_v12 = vsel %vm1097_vm4, %v1081_v49, %v1113_v1  ;;  %v667_v52 = vadd.f32 %v636_v26, %v539_v10 }
 0x128   : > { %2079 = vrcp.f32 %v829_v41  ;;  %v588_v45 = vpop.f32.mrf.mxu2  ;;  %v986_v59 = vmul.f32 %v2637_v61, %v970_v35  ;;  %v860_v60 = vmul.f32 1.0614054, %v2725_v46  ;;  %v2078_v47 = vpop.eup %2077  ;;  %v1145_v11 = vadd.f32 1.0, %v1129_v12 }
 0x129   : > { %v2734_v33 = vmul.f32 0.70710677, %v2728_v15  ;;  %v683_v0 = vrot.slane %v588_v45, 1  ;;  %v939_v27 = vadd.f32 -0.28449672, %v923_v9  ;;  %2081 = vpow2.f32 %v1037_v53 }
 0x12a   : > { %v1066_v48 = vmul.f32 %v2078_v47, %v986_v59  ;;  %v876_v36 = vadd.f32 -1.4531521, %v860_v60 }
 0x12b   : > { %v2740_v23 = vand.u32 2147483647, %v2734_v33  ;;  %v701_v61 = vsel %vm692_vm2, %v682_v6, %v683_v0  ;;  %v955_v24 = vmul.f32 %v2686_v21, %v939_v27  ;;  %vm1102_vm9 = vcmp.ge.f32.partialorder %v2734_v33, 0.0 }
 0x12c   : > { %v731_v13 = vadd.f32 %v701_v61, %v666_v58  ;;  %v1082_v29 = vsub.f32 1.0, %v1066_v48  ;;  %v892_v34 = vmul.f32 %v2725_v46, %v876_v36  ;;  %v1161_v48 = vmul.f32 %v1145_v11, %v761_v54 }
 0x12d   : > { %v814_v28 = vmul.f32 0.3275911, %v2740_v23  ;;  %v971_v63 = vadd.f32 0.2548296, %v955_v24  ;;  %v1021_v61 = vmul.f32 %v1005_v31, %v2712_v2  ;;  %v1006_v54 = vsub.f32 0.0, %v2740_v23 }
 0x12e   : > { %v2756_v6 = vpop.eup %2079  ;;  %v2759_v50 = vadd.f32 %v2434_v7, %v731_v13  ;;  %v1114_v20 = vsub.f32 0.0, %v1082_v29  ;;  %v908_v58 = vadd.f32 1.4214138, %v892_v34 }
 0x12f   : > { %v830_v40 = vadd.f32 1.0, %v814_v28  ;;  %v861_v4 = vmul.f32 1.0614054, %v2756_v6  ;;  %v987_v47 = vmul.f32 %v2686_v21, %v971_v63  ;;  %v2082_v9 = vpop.eup %2081  ;;  %v668_v28 = vadd.f32 %v2683_v42, %v2482_v44 }
 0x130   : > { %v2764_v19 = vmul.f32 0.70710677, %v2759_v50  ;;  %v591_v41 = vpop.f32.mrf.mxu2  ;;  %v1130_v35 = vsel %vm1098_vm5, %v1082_v29, %v1114_v20  ;;  %v924_v49 = vmul.f32 %v2725_v46, %v908_v58  ;;  %v1041_v58 = vmul.f32 1.442695, %v1021_v61 }
 0x131   : > { %2083 = vrcp.f32 %v830_v40  ;;  %v684_v53 = vrot.slane %v591_v41, 1  ;;  %v1146_v45 = vadd.f32 1.0, %v1130_v35  ;;  %v877_v1 = vadd.f32 -1.4531521, %v861_v4 }
 0x132   : > { %v2768_v59 = vand.u32 2147483647, %v2764_v19  ;;  %v940_v60 = vadd.f32 -0.28449672, %v924_v49  ;;  %2085 = vpow2.f32 %v1039_v17  ;;  %v1067_v21 = vmul.f32 %v2082_v9, %v987_v47 }
 0x133   : > { %v700_v25 = vsel %vm692_vm2, %v683_v0, %v684_v53  ;;  %v1162_v36 = vmul.f32 %v1146_v45, %v762_v3  ;;  %v893_v34 = vmul.f32 %v2756_v6, %v877_v1  ;;  %v763_v17 = vmul.f32 0.5, %v2573_v55 }
 0x134   : > { %v815_v26 = vmul.f32 0.3275911, %v2768_v59  ;;  %v716_v27 = vsel %vm255_vm3, %v700_v25, 0.0  ;;  %v956_v13 = vmul.f32 %v2725_v46, %v940_v60  ;;  %v1083_v10 = vsub.f32 1.0, %v1067_v21 }
 0x135   : > { %v732_v29 = vadd.f32 %v716_v27, %v667_v52  ;;  %v1177_v12 = vpack.c.bf16 %v1162_v36, %v1161_v48  ;;  %v909_v20 = vadd.f32 1.4214138, %v893_v34  ;;  %v1022_v55 = vmul.f32 %v1006_v54, %v2740_v23 }
 0x136   : > { %v831_v0 = vadd.f32 1.0, %v815_v26  ;;  %v972_v3 = vadd.f32 0.2548296, %v956_v13  ;;  %v1115_v31 = vsub.f32 0.0, %v1083_v10  ;;  %v764_v45 = vmul.f32 0.5, %v2643_v57  ;;  %v552_v26 = vpop.f32.mrf.mxu3 }
 0x137   : > { %v2782_v2 = vpop.eup %2083  ;;  %v2785_v24 = vadd.f32 %v2434_v7, %v732_v29  ;;  %1353 = vmatmul.bf16.vlgmr.msrb.gmra.mxu3 %v1177_v12  ;;  %1402 = vmatmul.bf16.vlgmr.msrb.gmra.mxu0 %v1177_v12  ;;  %v925_v41 = vmul.f32 %v2756_v6, %v909_v20  ;;  %v1043_v36 = vmul.f32 1.442695, %v1022_v55  ;;  %v1007_v21 = vsub.f32 0.0, %v2768_v59 }
 0x138   : > { %2087 = vrcp.f32 %v831_v0  ;;  %1451 = vmatmul.bf16.vlgmr.msrb.gmra.mxu1 %v1177_v12  ;;  %v593_v40 = vpop.f32.mrf.mxu2  ;;  %v988_v44 = vmul.f32 %v2725_v46, %v972_v3  ;;  %v862_v42 = vmul.f32 1.0614054, %v2782_v2  ;;  %v2086_v11 = vpop.eup %2085  ;;  %v1131_v9 = vsel %vm1099_vm6, %v1083_v10, %v1115_v31 }
 0x139   : > { %v2791_v63 = vmul.f32 0.70710677, %v2785_v24  ;;  %v685_v4 = vrot.slane %v593_v40, 1  ;;  %v941_v60 = vadd.f32 -0.28449672, %v925_v41  ;;  %2089 = vpow2.f32 %v1041_v58 }
 0x13a   : > { %v1068_v35 = vmul.f32 %v2086_v11, %v988_v44  ;;  %v878_v49 = vadd.f32 -1.4531521, %v862_v42  ;;  %v1147_v13 = vadd.f32 1.0, %v1131_v9  ;;  %v1023_v55 = vmul.f32 %v1007_v21, %v2768_v59 }
 0x13b   : > { %v800_v52 = vand.u32 2147483647, %v2791_v63  ;;  %v699_v46 = vsel %vm692_vm2, %v684_v53, %v685_v4  ;;  %v957_v5 = vmul.f32 %v2756_v6, %v941_v60  ;;  %v2828_v9 = vadd.f32 %v2679_v32, %v552_v26 }
 0x13c   : > { %v733_v47 = vadd.f32 %v699_v46, %v668_v28  ;;  %v1084_v1 = vsub.f32 1.0, %v1068_v35  ;;  %v894_v25 = vmul.f32 %v2782_v2, %v878_v49  ;;  %v1163_v31 = vmul.f32 %v1147_v13, %v763_v17 }
 0x13d   : > { %v816_v48 = vmul.f32 0.3275911, %v800_v52  ;;  %v973_v29 = vadd.f32 0.2548296, %v957_v5  ;;  %v1008_v0 = vsub.f32 0.0, %v800_v52  ;;  %v765_v21 = vmul.f32 0.5, %v2689_v22 }
 0x13e   : > { %v2803_v23 = vpop.eup %2087  ;;  %v2806_v61 = vadd.f32 %v2434_v7, %v733_v47  ;;  %v1116_v53 = vsub.f32 0.0, %v1084_v1  ;;  %v910_v57 = vadd.f32 1.4214138, %v894_v25  ;;  %v2835_v25 = vsel %vm252_vm1, %v2382_v43, 0.0  ;;  %v554_v26 = vpop.f32.mrf.mxu3 }
 0x13f   : > { %v832_v27 = vadd.f32 1.0, %v816_v48  ;;  %v863_v12 = vmul.f32 1.0614054, %v2803_v23  ;;  %v989_v40 = vmul.f32 %v2756_v6, %v973_v29  ;;  %v2090_v42 = vpop.eup %2089  ;;  %v1024_v17 = vmul.f32 %v1008_v0, %v800_v52 }
 0x140   : > { %v2811_v14 = vmul.f32 0.70710677, %v2806_v61  ;;  %v596_v34 = vpop.f32.mrf.mxu2  ;;  %v1132_v28 = vsel %vm1100_vm7, %v1084_v1, %v1116_v53  ;;  %v926_v54 = vmul.f32 %v2782_v2, %v910_v57  ;;  %vm1103_vm10 = vcmp.ge.f32.partialorder %v2764_v19, 0.0 }
 0x141   : > { %2091 = vrcp.f32 %v832_v27  ;;  %v686_v3 = vrot.slane %v596_v34, 1  ;;  %v1148_v10 = vadd.f32 1.0, %v1132_v28  ;;  %v879_v44 = vadd.f32 -1.4531521, %v863_v12 }
 0x142   : > { %v2815_v20 = vand.u32 2147483647, %v2811_v14  ;;  %v942_v58 = vadd.f32 -0.28449672, %v926_v54  ;;  %2093 = vpow2.f32 %v1043_v36  ;;  %v1069_v47 = vmul.f32 %v2090_v42, %v989_v40 }
 0x143   : > { %v698_v11 = vsel %vm692_vm2, %v685_v4, %v686_v3  ;;  %v1164_v41 = vmul.f32 %v1148_v10, %v764_v45  ;;  %v895_v1 = vmul.f32 %v2803_v23, %v879_v44  ;;  %v1045_v36 = vmul.f32 1.442695, %v1023_v55 }
 0x144   : > { %v817_v35 = vmul.f32 0.3275911, %v2815_v20  ;;  %v718_v49 = vsel %vm255_vm3, %v698_v11, 0.0  ;;  %v958_v46 = vmul.f32 %v2782_v2, %v942_v58  ;;  %v1047_v12 = vmul.f32 1.442695, %v1024_v17 }
 0x145   : > { %v734_v60 = vadd.f32 %v718_v49, %v2671_v16  ;;  %v1178_v6 = vpack.c.bf16 %v1164_v41, %v1163_v31  ;;  %v1085_v16 = vsub.f32 1.0, %v1069_v47  ;;  %v911_v5 = vadd.f32 1.4214138, %v895_v1 }
 0x146   : > { %v833_v4 = vadd.f32 1.0, %v817_v35  ;;  %v974_v45 = vadd.f32 0.2548296, %v958_v46  ;;  %v1009_v49 = vsub.f32 0.0, %v2815_v20  ;;  %v766_v1 = vmul.f32 0.5, %v2728_v15 }
 0x147   : > { %v2830_v59 = vpop.eup %2091  ;;  %v2838_v48 = vadd.f32 %v2434_v7, %v734_v60  ;;  %1358 = vmatmul.bf16.gmra.mxu3 %v1178_v6  ;;  %1407 = vmatmul.bf16.gmra.mxu0 %v1178_v6  ;;  %v1117_v13 = vsub.f32 0.0, %v1085_v16  ;;  %v927_v29 = vmul.f32 %v2803_v23, %v911_v5  ;;  %vm1104_vm11 = vcmp.ge.f32.partialorder %v2791_v63, 0.0 }
 0x148   : > { %2095 = vrcp.f32 %v833_v4  ;;  %1456 = vmatmul.bf16.gmra.mxu1 %v1178_v6  ;;  %v598_v32 = vpop.f32.mrf.mxu2  ;;  %v990_v52 = vmul.f32 %v2782_v2, %v974_v45  ;;  %v864_v53 = vmul.f32 1.0614054, %v2830_v59  ;;  %v2094_v57 = vpop.eup %2093  ;;  %vm1105_vm12 = vcmp.ge.f32.partialorder %v2811_v14, 0.0 }
 0x149   : > { %v2843_v43 = vmul.f32 0.70710677, %v2838_v48  ;;  %v687_v27 = vrot.slane %v598_v32, 1  ;;  %v943_v0 = vadd.f32 -0.28449672, %v927_v29  ;;  %v1133_v40 = vsel %vm1101_vm8, %v1085_v16, %v1117_v13  ;;  %v557_v32 = vpop.f32.mrf.mxu3 }
 0x14a   : > { %v1070_v34 = vmul.f32 %v2094_v57, %v990_v52  ;;  %v880_v28 = vadd.f32 -1.4531521, %v864_v53  ;;  %2097 = vpow2.f32 %v1045_v36 }
 0x14b   : > { %v802_v54 = vand.u32 2147483647, %v2843_v43  ;;  %v697_v2 = vsel %vm692_vm2, %v686_v3, %v687_v27  ;;  %v959_v22 = vmul.f32 %v2803_v23, %v943_v0  ;;  %2099 = vpow2.f32 %v1047_v12 }
 0x14c   : > { %v735_v10 = vadd.f32 %v697_v2, %v2673_v38  ;;  %v1086_v58 = vsub.f32 1.0, %v1070_v34  ;;  %v896_v44 = vmul.f32 %v2830_v59, %v880_v28  ;;  %v1149_v38 = vadd.f32 1.0, %v1133_v40 }
 0x14d   : > { %v818_v42 = vmul.f32 0.3275911, %v802_v54  ;;  %v975_v55 = vadd.f32 0.2548296, %v959_v22  ;;  %v1010_v52 = vsub.f32 0.0, %v802_v54  ;;  %v1025_v12 = vmul.f32 %v1009_v49, %v2815_v20 }
 0x14e   : > { %v2855_v11 = vpop.eup %2095  ;;  %v2858_v3 = vadd.f32 %v2434_v7, %v735_v10  ;;  %v1118_v62 = vsub.f32 0.0, %v1086_v58  ;;  %v912_v31 = vadd.f32 1.4214138, %v896_v44  ;;  %v1165_v57 = vmul.f32 %v1149_v38, %v765_v21 }
 0x14f   : > { %v834_v41 = vadd.f32 1.0, %v818_v42  ;;  %v865_v35 = vmul.f32 1.0614054, %v2855_v11  ;;  %v991_v16 = vmul.f32 %v2803_v23, %v975_v55  ;;  %v2884_v21 = vadd.f32 %v2835_v25, %v557_v32 }
 0x150   : > { %v2863_v46 = vmul.f32 0.70710677, %v2858_v3  ;;  %v601_v33 = vpop.f32.mrf.mxu2  ;;  %v1134_v60 = vsel %vm1102_vm9, %v1086_v58, %v1118_v62  ;;  %v928_v6 = vmul.f32 %v2830_v59, %v912_v31  ;;  %v2098_v36 = vpop.eup %2097  ;;  %v1026_v44 = vmul.f32 %v1010_v52, %v802_v54 }
 0x151   : > { %2101 = vrcp.f32 %v834_v41  ;;  %v688_v47 = vrot.slane %v601_v33, 1  ;;  %v1150_v17 = vadd.f32 1.0, %v1134_v60  ;;  %v881_v5 = vadd.f32 -1.4531521, %v865_v35  ;;  %v2100_v29 = vpop.eup %2099 }
 0x152   : > { %v2868_v4 = vand.u32 2147483647, %v2863_v46  ;;  %v944_v45 = vadd.f32 -0.28449672, %v928_v6  ;;  %v1071_v0 = vmul.f32 %v2098_v36, %v991_v16  ;;  %v1049_v62 = vmul.f32 1.442695, %v1025_v12 }
 0x153   : > { %v696_v53 = vsel %vm692_vm2, %v687_v27, %v688_v47  ;;  %v1166_v13 = vmul.f32 %v1150_v17, %v766_v1  ;;  %v897_v10 = vmul.f32 %v2855_v11, %v881_v5  ;;  %v2881_v27 = vadd.f32 %v2376_v39, %v554_v26 }
 0x154   : > { %v819_v15 = vmul.f32 0.3275911, %v2868_v4  ;;  %v720_v34 = vsel %vm255_vm3, %v696_v53, 0.0  ;;  %v960_v28 = vmul.f32 %v2830_v59, %v944_v45  ;;  %v767_v55 = vmul.f32 0.5, %v2759_v50 }
 0x155   : > { %v736_v23 = vadd.f32 %v720_v34, %v2709_v37  ;;  %v1179_v2 = vpack.c.bf16 %v1166_v13, %v1165_v57  ;;  %v1087_v37 = vsub.f32 1.0, %v1071_v0  ;;  %v913_v22 = vadd.f32 1.4214138, %v897_v10  ;;  %v559_v34 = vpop.f32.mrf.mxu3 }
 0x156   : > { %v835_v20 = vadd.f32 1.0, %v819_v15  ;;  %v976_v58 = vadd.f32 0.2548296, %v960_v28  ;;  %v1051_v33 = vmul.f32 1.442695, %v1026_v44  ;;  %v1011_v36 = vsub.f32 0.0, %v2868_v4 }
 0x157   : > { %v2886_v40 = vpop.eup %2101  ;;  %v2889_v42 = vadd.f32 %v2434_v7, %v736_v23  ;;  %1363 = vmatmul.bf16.gmra.mxu3 %v1179_v2  ;;  %1412 = vmatmul.bf16.gmra.mxu0 %v1179_v2  ;;  %v1119_v54 = vsub.f32 0.0, %v1087_v37  ;;  %v929_v38 = vmul.f32 %v2855_v11, %v913_v22  ;;  %v768_v23 = vmul.f32 0.5, %v2785_v24 }
 0x158   : > { %2103 = vrcp.f32 %v835_v20  ;;  %1461 = vmatmul.bf16.gmra.mxu1 %v1179_v2  ;;  %v603_v39 = vpop.f32.mrf.mxu2  ;;  %v992_v26 = vmul.f32 %v2830_v59, %v976_v58  ;;  %v866_v25 = vmul.f32 1.0614054, %v2886_v40  ;;  %vm1106_vm13 = vcmp.ge.f32.partialorder %v2843_v43, 0.0 }
 0x159   : > { %v2894_v31 = vmul.f32 0.70710677, %v2889_v42  ;;  %v689_v41 = vrot.slane %v603_v39, 1  ;;  %v945_v6 = vadd.f32 -0.28449672, %v929_v38  ;;  %v1135_v45 = vsel %vm1103_vm10, %v1087_v37, %v1119_v54 }
 0x15a   : > { %v1072_v35 = vmul.f32 %v2100_v29, %v992_v26  ;;  %v882_v49 = vadd.f32 -1.4531521, %v866_v25  ;;  %2105 = vpow2.f32 %v1049_v62  ;;  %v1151_v53 = vadd.f32 1.0, %v1135_v45 }
 0x15b   : > { %v2900_v60 = vand.u32 2147483647, %v2894_v31  ;;  %v695_v59 = vsel %vm692_vm2, %v688_v47, %v689_v41  ;;  %v961_v19 = vmul.f32 %v2855_v11, %v945_v6  ;;  %2107 = vpow2.f32 %v1051_v33 }
 0x15c   : > { %v737_v1 = vadd.f32 %v695_v59, %v2828_v9  ;;  %v1088_v17 = vsub.f32 1.0, %v1072_v35  ;;  %v898_v16 = vmul.f32 %v2886_v40, %v882_v49  ;;  %v1027_v37 = vmul.f32 %v1011_v36, %v2868_v4 }
 0x15d   : > { %v820_v50 = vmul.f32 0.3275911, %v2900_v60  ;;  %v977_v57 = vadd.f32 0.2548296, %v961_v19  ;;  %v1167_v62 = vmul.f32 %v1151_v53, %v767_v55  ;;  %v675_v26 = vadd.f32 %v2397_v51, %v559_v34 }
 0x15e   : > { %v2909_v5 = vpop.eup %2103  ;;  %v2913_v47 = vadd.f32 %v2434_v7, %v737_v1  ;;  %v1120_v32 = vsub.f32 0.0, %v1088_v17  ;;  %v914_v9 = vadd.f32 1.4214138, %v898_v16  ;;  %v1053_v59 = vmul.f32 1.442695, %v1027_v37 }
 0x15f   : > { %v836_v52 = vadd.f32 1.0, %v820_v50  ;;  %v867_v13 = vmul.f32 1.0614054, %v2909_v5  ;;  %v993_v20 = vmul.f32 %v2855_v11, %v977_v57  ;;  %v770_v45 = vmul.f32 0.5, %v2838_v48 }
 0x160   : > { %v2917_v29 = vmul.f32 0.70710677, %v2913_v47  ;;  %v606_v63 = vpop.f32.mrf.mxu2  ;;  %v1136_v12 = vsel %vm1104_vm11, %v1088_v17, %v1120_v32  ;;  %v930_v15 = vmul.f32 %v2886_v40, %v914_v9  ;;  %v2106_v44 = vpop.eup %2105  ;;  %v1012_v50 = vsub.f32 0.0, %v2900_v60 }
 0x161   : > { %2109 = vrcp.f32 %v836_v52  ;;  %v690_v28 = vrot.slane %v606_v63, 1  ;;  %v1152_v2 = vadd.f32 1.0, %v1136_v12  ;;  %v883_v58 = vadd.f32 -1.4531521, %v867_v13  ;;  %v2108_v49 = vpop.eup %2107 }
 0x162   : > { %v2922_v0 = vand.u32 2147483647, %v2917_v29  ;;  %v946_v10 = vadd.f32 -0.28449672, %v930_v15  ;;  %v1073_v35 = vmul.f32 %v2106_v44, %v993_v20  ;;  %v1028_v15 = vmul.f32 %v1012_v50, %v2900_v60 }
 0x163   : > { %v694_v22 = vsel %vm692_vm2, %v689_v41, %v690_v28  ;;  %v1168_v39 = vmul.f32 %v1152_v2, %v768_v23  ;;  %v899_v4 = vmul.f32 %v2909_v5, %v883_v58  ;;  %v769_v41 = vmul.f32 0.5, %v2806_v61  ;;  %v2131_v2 = vld [vmem:[%s3198_s2] ss:$0 sm:$0xff] }
 0x164   : > { %v821_v24 = vmul.f32 0.3275911, %v2922_v0  ;;  %v722_v25 = vsel %vm255_vm3, %v694_v22, 0.0  ;;  %v962_v54 = vmul.f32 %v2886_v40, %v946_v10  ;;  %vm1107_vm14 = vcmp.ge.f32.partialorder %v2863_v46, 0.0 }
 0x165   : > { %v738_v11 = vadd.f32 %v722_v25, %v2881_v27  ;;  %v1180_v38 = vpack.c.bf16 %v1168_v39, %v1167_v62  ;;  %v1089_v27 = vsub.f32 1.0, %v1073_v35  ;;  %v915_v1 = vadd.f32 1.4214138, %v899_v4 }
 0x166   : > { %v837_v33 = vadd.f32 1.0, %v821_v24  ;;  %v978_v55 = vadd.f32 0.2548296, %v962_v54  ;;  %v1055_v24 = vmul.f32 1.442695, %v1028_v15  ;;  %vm1108_vm15 = vcmp.ge.f32.partialorder %v2894_v31, 0.0 }
 0x167   : > { %v2937_v51 = vpop.eup %2109  ;;  %v2940_v6 = vadd.f32 %v2434_v7, %v738_v11  ;;  %1368 = vmatmul.bf16.gmra.mxu3 %v1180_v38  ;;  %1417 = vmatmul.bf16.gmra.mxu0 %v1180_v38  ;;  %v1121_v36 = vsub.f32 0.0, %v1089_v27  ;;  %v931_v52 = vmul.f32 %v2909_v5, %v915_v1  ;;  %vm1109_vm4 = vcmp.ge.f32.partialorder %v2917_v29, 0.0 }
 0x168   : > { %2111 = vrcp.f32 %v837_v33  ;;  %1466 = vmatmul.bf16.gmra.mxu1 %v1180_v38  ;;  %v608_v17 = vpop.f32.mrf.mxu2  ;;  %v994_v61 = vmul.f32 %v2886_v40, %v978_v55  ;;  %v868_v16 = vmul.f32 1.0614054, %v2937_v51 }
 0x169   : > { %v2947_v19 = vmul.f32 0.70710677, %v2940_v6  ;;  %v691_v7 = vrot.slane %v608_v17, 1  ;;  %2113 = vpow2.f32 %v1053_v59  ;;  %v1137_v12 = vsel %vm1105_vm12, %v1089_v27, %v1121_v36 }
 0x16a   : > { %v1074_v32 = vmul.f32 %v2108_v49, %v994_v61  ;;  %v884_v9 = vadd.f32 -1.4531521, %v868_v16  ;;  %v947_v14 = vadd.f32 -0.28449672, %v931_v52  ;;  %v1153_v60 = vadd.f32 1.0, %v1137_v12 }
 0x16b   : > { %v2952_v48 = vand.u32 2147483647, %v2947_v19  ;;  %v693_v40 = vsel %vm692_vm2, %v690_v28, %v691_v7  ;;  %v708_v53 = vsel %vm692_vm2, %v691_v7, %v676_v8  ;;  %v1013_v8 = vsub.f32 0.0, %v2922_v0 }
 0x16c   : > { %v724_v57 = vsel %vm255_vm3, %v708_v53, 0.0  ;;  %v739_v13 = vadd.f32 %v693_v40, %v2884_v21  ;;  %v1090_v63 = vsub.f32 1.0, %v1074_v32  ;;  %v900_v28 = vmul.f32 %v2937_v51, %v884_v9 }
 0x16d   : > { %v822_v34 = vmul.f32 0.3275911, %v2952_v48  ;;  %v740_v23 = vadd.f32 %v724_v57, %v675_v26  ;;  %v963_v62 = vmul.f32 %v2909_v5, %v947_v14  ;;  %v1029_v43 = vmul.f32 %v1013_v8, %v2922_v0 }
 0x16e   : > { %v2968_v56 = vpop.eup %2111  ;;  %v2974_v21 = vadd.f32 %v2131_v2, %v739_v13  ;;  %v1122_v10 = vsub.f32 0.0, %v1090_v63  ;;  %v916_v44 = vadd.f32 1.4214138, %v900_v28  ;;  %v1169_v33 = vmul.f32 %v1153_v60, %v769_v41 }
 0x16f   : > { %v838_v20 = vadd.f32 1.0, %v822_v34  ;;  %v2976_v58 = vadd.f32 %v2131_v2, %v740_v23  ;;  %v869_v39 = vmul.f32 1.0614054, %v2968_v56  ;;  %v2114_v26 = vpop.eup %2113  ;;  %v979_v35 = vadd.f32 0.2548296, %v963_v62 }
 0x170   : > { %v2979_v37 = vmul.f32 0.70710677, %v2974_v21  ;;  %v1138_v22 = vsel %vm1106_vm13, %v1090_v63, %v1122_v10  ;;  %v932_v38 = vmul.f32 %v2937_v51, %v916_v44  ;;  %v1057_v0 = vmul.f32 1.442695, %v1029_v43 }
 0x171   : > { %2115 = vrcp.f32 %v838_v20  ;;  %v2986_v25 = vmul.f32 0.70710677, %v2976_v58  ;;  %v1154_v54 = vadd.f32 1.0, %v1138_v22  ;;  %v885_v4 = vadd.f32 -1.4531521, %v869_v39 }
 0x172   : > { %v2989_v11 = vand.u32 2147483647, %v2979_v37  ;;  %v948_v27 = vadd.f32 -0.28449672, %v932_v38  ;;  %v995_v1 = vmul.f32 %v2909_v5, %v979_v35  ;;  %2117 = vpow2.f32 %v1055_v24 }
 0x173   : > { %v808_v49 = vand.u32 2147483647, %v2986_v25  ;;  %v1170_v55 = vmul.f32 %v1154_v54, %v770_v45  ;;  %v901_v16 = vmul.f32 %v2968_v56, %v885_v4  ;;  %v1014_v45 = vsub.f32 0.0, %v2952_v48 }
 0x174   : > { %v823_v59 = vmul.f32 0.3275911, %v2989_v11  ;;  %v964_v7 = vmul.f32 %v2937_v51, %v948_v27  ;;  %v1075_v36 = vmul.f32 %v2114_v26, %v995_v1  ;;  %v771_v28 = vmul.f32 0.5, %v2858_v3 }
 0x175   : > { %v824_v17 = vmul.f32 0.3275911, %v808_v49  ;;  %v1181_v61 = vpack.c.bf16 %v1170_v55, %v1169_v33  ;;  %v917_v41 = vadd.f32 1.4214138, %v901_v16  ;;  %v1030_v34 = vmul.f32 %v1014_v45, %v2952_v48 }
 0x176   : > { %v839_v50 = vadd.f32 1.0, %v823_v59  ;;  %v980_v5 = vadd.f32 0.2548296, %v964_v7  ;;  %v1091_v52 = vsub.f32 1.0, %v1075_v36  ;;  %v1016_v20 = vsub.f32 0.0, %v808_v49 }
 0x177   : > { %v2998_v32 = vpop.eup %2115  ;;  %v840_v9 = vadd.f32 1.0, %v824_v17  ;;  %1373 = vmatmul.bf16.gmra.mxu3 %v1181_v61  ;;  %1422 = vmatmul.bf16.gmra.mxu0 %v1181_v61  ;;  %v933_v53 = vmul.f32 %v2968_v56, %v917_v41  ;;  %v772_v60 = vmul.f32 0.5, %v2889_v42  ;;  %v1059_v26 = vmul.f32 1.442695, %v1030_v34 }
 0x178   : > { %2119 = vrcp.f32 %v839_v50  ;;  %1471 = vmatmul.bf16.gmra.mxu1 %v1181_v61  ;;  %v870_v40 = vmul.f32 1.0614054, %v2998_v32  ;;  %v996_v57 = vmul.f32 %v2937_v51, %v980_v5  ;;  %v1123_v13 = vsub.f32 0.0, %v1091_v52  ;;  %v2118_v63 = vpop.eup %2117 }
 0x179   : > { %2121 = vrcp.f32 %v840_v9  ;;  %v949_v15 = vadd.f32 -0.28449672, %v933_v53  ;;  %v1015_v51 = vsub.f32 0.0, %v2989_v11  ;;  %v1032_v42 = vmul.f32 %v1016_v20, %v808_v49 }
 0x17a   : > { %v886_v12 = vadd.f32 -1.4531521, %v870_v40  ;;  %2123 = vpow2.f32 %v1057_v0  ;;  %v1076_v23 = vmul.f32 %v2118_v63, %v996_v57  ;;  %v1139_v8 = vsel %vm1107_vm14, %v1091_v52, %v1123_v13 }
 0x17b   : > { %v965_v10 = vmul.f32 %v2968_v56, %v949_v15  ;;  %v1155_v24 = vadd.f32 1.0, %v1139_v8  ;;  %v1031_v43 = vmul.f32 %v1015_v51, %v2989_v11  ;;  %2125 = vpow2.f32 %v1059_v26 }
 0x17c   : > { %v902_v2 = vmul.f32 %v2998_v32, %v886_v12  ;;  %v1092_v44 = vsub.f32 1.0, %v1076_v23  ;;  %v1063_v9 = vmul.f32 1.442695, %v1032_v42  ;;  %vm1110_vm5 = vcmp.ge.f32.partialorder %v2947_v19, 0.0 }
 0x17d   : > { %v981_v48 = vadd.f32 0.2548296, %v965_v10  ;;  %v1171_v61 = vmul.f32 %v1155_v24, %v771_v28  ;;  %vm1111_vm6 = vcmp.ge.f32.partialorder %v2979_v37, 0.0  ;;  %vm1112_vm7 = vcmp.ge.f32.partialorder %v2986_v25, 0.0 }
 0x17e   : > { %v2120_v14 = vpop.eup %2119  ;;  %v918_v62 = vadd.f32 1.4214138, %v902_v2  ;;  %v1124_v46 = vsub.f32 0.0, %v1092_v44 }
 0x17f   : > { %v2122_v22 = vpop.eup %2121  ;;  %v871_v39 = vmul.f32 1.0614054, %v2120_v14  ;;  %v997_v38 = vmul.f32 %v2968_v56, %v981_v48  ;;  %v1061_v56 = vmul.f32 1.442695, %v1031_v43  ;;  %v774_v48 = vmul.f32 0.5, %v2940_v6 }
 0x180   : > { %v872_v3 = vmul.f32 1.0614054, %v2122_v22  ;;  %v934_v54 = vmul.f32 %v2998_v32, %v918_v62  ;;  %v2124_v4 = vpop.eup %2123  ;;  %v1140_v33 = vsel %vm1108_vm15, %v1092_v44, %v1124_v46  ;;  %v773_v62 = vmul.f32 0.5, %v2913_v47 }
 0x181   : > { %v887_v35 = vadd.f32 -1.4531521, %v871_v39  ;;  %v1156_v59 = vadd.f32 1.0, %v1140_v33  ;;  %v1077_v1 = vmul.f32 %v2124_v4, %v997_v38  ;;  %v2126_v53 = vpop.eup %2125  ;;  %2127 = vpow2.f32 %v1061_v56 }
 0x182   : > { %v888_v55 = vadd.f32 -1.4531521, %v872_v3  ;;  %v950_v27 = vadd.f32 -0.28449672, %v934_v54  ;;  %2129 = vpow2.f32 %v1063_v9  ;;  %v775_v38 = vmul.f32 0.5, %v2974_v21 }
 0x183   : > { %v903_v17 = vmul.f32 %v2120_v14, %v887_v35  ;;  %v1172_v50 = vmul.f32 %v1156_v59, %v772_v60  ;;  %v1093_v7 = vsub.f32 1.0, %v1077_v1  ;;  %v776_v6 = vmul.f32 0.5, %v2976_v58 }
 0x184   : > { %v904_v16 = vmul.f32 %v2122_v22, %v888_v55  ;;  %v966_v31 = vmul.f32 %v2998_v32, %v950_v27 }
 0x185   : > { %v919_v36 = vadd.f32 1.4214138, %v903_v17  ;;  %v1182_v41 = vpack.c.bf16 %v1172_v50, %v1171_v61  ;;  %v1125_v52 = vsub.f32 0.0, %v1093_v7 }
 0x186   : > { %v920_v0 = vadd.f32 1.4214138, %v904_v16  ;;  %v982_v11 = vadd.f32 0.2548296, %v966_v31 }
 0x187   : > { %v935_v49 = vmul.f32 %v2120_v14, %v919_v36  ;;  %1378 = vmatmul.bf16.gmra.mxu3 %v1182_v41  ;;  %1427 = vmatmul.bf16.gmra.mxu0 %v1182_v41  ;;  %v1141_v34 = vsel %vm1109_vm4, %v1093_v7, %v1125_v52  ;;  %v2128_v10 = vpop.eup %2127 }
 0x188   : > { %v936_v45 = vmul.f32 %v2122_v22, %v920_v0  ;;  %v998_v5 = vmul.f32 %v2998_v32, %v982_v11  ;;  %1476 = vmatmul.bf16.gmra.mxu1 %v1182_v41  ;;  %v1157_v32 = vadd.f32 1.0, %v1141_v34  ;;  %v2130_v20 = vpop.eup %2129  ;;  %v234_v0 = vld [vmem:[%s2288_s22 + $0x4] sm:$0xff]   ;;  %v3049_v41 = vld [vmem:[%s3200_s4] ss:$0 sm:$0xff] }
 0x189   : > { %v951_v40 = vadd.f32 -0.28449672, %v935_v49 }
 0x18a   : > { %v952_v57 = vadd.f32 -0.28449672, %v936_v45  ;;  %v1078_v13 = vmul.f32 %v2126_v53, %v998_v5  ;;  %v1173_v46 = vmul.f32 %v1157_v32, %v773_v62  ;;  %v1641_v45 = vunpack.c.l.bf16 %v234_v0 }
 0x18b   : > { %v967_v63 = vmul.f32 %v2120_v14, %v951_v40 }
 0x18c   : > { %v968_v12 = vmul.f32 %v2122_v22, %v952_v57  ;;  %v1094_v15 = vsub.f32 1.0, %v1078_v13 }
 0x18d   : > { %v983_v23 = vadd.f32 0.2548296, %v967_v63 }
 0x18e   : > { %v984_v28 = vadd.f32 0.2548296, %v968_v12  ;;  %v1126_v8 = vsub.f32 0.0, %v1094_v15 }
 0x18f   : > { %v999_v2 = vmul.f32 %v2120_v14, %v983_v23 }
 0x190   : > { %v1000_v51 = vmul.f32 %v2122_v22, %v984_v28  ;;  %v1142_v60 = vsel %vm1110_vm5, %v1094_v15, %v1126_v8  ;;  %v1642_v8 = vunpack.c.h.bf16 %v234_v0 }
 0x191   : > { %v1079_v44 = vmul.f32 %v2128_v10, %v999_v2  ;;  %v1158_v29 = vadd.f32 1.0, %v1142_v60 }
 0x192   : > { %v1080_v39 = vmul.f32 %v2130_v20, %v1000_v51 }
 0x193   : > { %v1095_v26 = vsub.f32 1.0, %v1079_v44  ;;  %v1174_v24 = vmul.f32 %v1158_v29, %v774_v48  ;;  %v236_v29 = vld [vmem:[%s2288_s22 + $0xc] sm:$0xff]  }
 0x194   : > { %v1096_v3 = vsub.f32 1.0, %v1080_v39 }
 0x195   : > { %v1127_v54 = vsub.f32 0.0, %v1095_v26  ;;  %v1183_v14 = vpack.c.bf16 %v1174_v24, %v1173_v46  ;;  %v1643_v24 = vunpack.c.l.bf16 %v236_v29 }
 0x196   : > { %v1128_v19 = vsub.f32 0.0, %v1096_v3 }
 0x197   : > { %v1143_v22 = vsel %vm1111_vm6, %v1095_v26, %v1127_v54  ;;  %1383 = vmatmul.bf16.gmra.mxu3 %v1183_v14  ;;  %1432 = vmatmul.bf16.gmra.mxu0 %v1183_v14 }
 0x198   : > { %v1144_v35 = vsel %vm1112_vm7, %v1096_v3, %v1128_v19  ;;  %v1159_v47 = vadd.f32 1.0, %v1143_v22  ;;  %1481 = vmatmul.bf16.gmra.mxu1 %v1183_v14 }
 0x199   : > { %v1160_v4 = vadd.f32 1.0, %v1144_v35 }
 0x19a   : > { %v1175_v43 = vmul.f32 %v1159_v47, %v775_v38 }
 0x19b   : > { %v1176_v42 = vmul.f32 %v1160_v4, %v776_v6 }
 0x19d   : > { %v1184_v33 = vpack.c.bf16 %v1176_v42, %v1175_v43 }
 0x1a7   : > { %1388 = vmatmul.bf16.gmra.mxu3 %v1184_v33  ;;  %1437 = vmatmul.bf16.gmra.mxu0 %v1184_v33 }
 0x1a8   : > { %1486 = vmatmul.bf16.gmra.mxu1 %v1184_v33  ;;  %v1644_v33 = vunpack.c.h.bf16 %v236_v29 }
 0x1b4   : > { %v3025_v37 = vpop.f32.mrf.mxu0 }
 0x1b5   : > { %v3027_v25 = vpop.f32.mrf.mxu1 }
 0x1b6   : > { %v1556_v58 = vrot.slane %v3027_v25, 1 }
 0x1ba   : > { %v3029_v21 = vpop.f32.mrf.mxu3 }
 0x1bb   : > { %v1492_v61 = vrot.slane %v3029_v21, 7 }
 0x1bc   : > { %v1405_v55 = vpop.f32.mrf.mxu0 }
 0x1bd   : > { %v1454_v59 = vpop.f32.mrf.mxu1 }
 0x1be   : > { %v1557_v27 = vrot.slane %v1454_v59, 1 }
 0x1c0   : > { %v3036_v1 = vsel %vm692_vm2, %v1556_v58, %v1557_v27 }
 0x1c2   : > { %v1356_v17 = vpop.f32.mrf.mxu3 }
 0x1c3   : > { %v1493_v16 = vrot.slane %v1356_v17, 7 }
 0x1c4   : > { %v1408_v50 = vpop.f32.mrf.mxu0 }
 0x1c5   : > { %v1522_v31 = vsel %vm627_vm0, %v1492_v61, %v1493_v16  ;;  %v1457_v7 = vpop.f32.mrf.mxu1 }
 0x1c6   : > { %v1541_v36 = vadd.f32 %v1522_v31, %v1405_v55  ;;  %v1558_v56 = vrot.slane %v1457_v7, 1 }
 0x1c8   : > { %v1585_v9 = vsel %vm692_vm2, %v1557_v27, %v1558_v56 }
 0x1c9   : > { %v1589_v11 = vsel %vm255_vm3, %v1585_v9, 0.0 }
 0x1ca   : > { %v1605_v49 = vadd.f32 %v1589_v11, %v1541_v36  ;;  %v1359_v5 = vpop.f32.mrf.mxu3 }
 0x1cb   : > { %v1494_v52 = vrot.slane %v1359_v5, 7 }
 0x1cc   : > { %v1625_v40 = vadd.f32 %v3049_v41, %v1605_v49  ;;  %v1410_v53 = vpop.f32.mrf.mxu0 }
 0x1cd   : > { %v1521_v57 = vsel %vm627_vm0, %v1493_v16, %v1494_v52  ;;  %v1459_v13 = vpop.f32.mrf.mxu1 }
 0x1ce   : > { %v1657_v63 = vadd.f32 %v1641_v45, %v1625_v40  ;;  %v1526_v12 = vsel %vm252_vm1, %v1521_v57, 0.0  ;;  %v1559_v15 = vrot.slane %v1459_v13, 1 }
 0x1cf   : > { %v1542_v34 = vadd.f32 %v1526_v12, %v1408_v50 }
 0x1d0   : > { %1673 = vst [vmem:[%s3058_s24 + $0x8] sm:$0xff] %v1657_v63  ;;  %v1584_v23 = vsel %vm692_vm2, %v1558_v56, %v1559_v15  ;;  %v238_v56 = vld [vmem:[%s2288_s22 + $0x14] sm:$0xff]  }
 0x1d1   : > { %v1606_v28 = vadd.f32 %v1584_v23, %v1542_v34  ;;  %v1645_v49 = vunpack.c.l.bf16 %v238_v56 }
 0x1d2   : > { %v1361_v2 = vpop.f32.mrf.mxu3 }
 0x1d3   : > { %v1626_v10 = vadd.f32 %v3049_v41, %v1606_v28  ;;  %v1495_v32 = vrot.slane %v1361_v2, 7  ;;  %v1646_v28 = vunpack.c.h.bf16 %v238_v56 }
 0x1d4   : > { %v1413_v51 = vpop.f32.mrf.mxu0 }
 0x1d5   : > { %v1658_v20 = vadd.f32 %v1642_v8, %v1626_v10  ;;  %v1520_v60 = vsel %vm627_vm0, %v1494_v52, %v1495_v32  ;;  %v1462_v44 = vpop.f32.mrf.mxu1 }
 0x1d6   : > { %v1543_v62 = vadd.f32 %v1520_v60, %v1410_v53  ;;  %v1560_v48 = vrot.slane %v1462_v44, 1 }
 0x1d7   : > { %1674 = vst [vmem:[%s3058_s24 + $0x10] sm:$0xff] %v1658_v20 }
 0x1d8   : > { %v1583_v39 = vsel %vm692_vm2, %v1559_v15, %v1560_v48 }
 0x1d9   : > { %v1591_v26 = vsel %vm255_vm3, %v1583_v39, 0.0 }
 0x1da   : > { %v1607_v46 = vadd.f32 %v1591_v26, %v1543_v62  ;;  %v1364_v3 = vpop.f32.mrf.mxu3 }
 0x1db   : > { %v1496_v54 = vrot.slane %v1364_v3, 7 }
 0x1dc   : > { %v1627_v14 = vadd.f32 %v3049_v41, %v1607_v46  ;;  %v1415_v19 = vpop.f32.mrf.mxu0 }
 0x1dd   : > { %v1519_v22 = vsel %vm627_vm0, %v1495_v32, %v1496_v54  ;;  %v1464_v38 = vpop.f32.mrf.mxu1 }
 0x1de   : > { %v1659_v35 = vadd.f32 %v1643_v24, %v1627_v14  ;;  %v1528_v47 = vsel %vm252_vm1, %v1519_v22, 0.0  ;;  %v1561_v6 = vrot.slane %v1464_v38, 1 }
 0x1df   : > { %v1544_v4 = vadd.f32 %v1528_v47, %v1413_v51 }
 0x1e0   : > { %1675 = vst [vmem:[%s3058_s24 + $0x18] sm:$0xff] %v1659_v35  ;;  %v1582_v43 = vsel %vm692_vm2, %v1560_v48, %v1561_v6  ;;  %v240_v48 = vld [vmem:[%s2288_s22 + $0x1c] sm:$0xff]  }
 0x1e1   : > { %v1608_v42 = vadd.f32 %v1582_v43, %v1544_v4  ;;  %v1647_v46 = vunpack.c.l.bf16 %v240_v48 }
 0x1e2   : > { %v1366_v55 = vpop.f32.mrf.mxu3 }
 0x1e3   : > { %v1628_v59 = vadd.f32 %v3049_v41, %v1608_v42  ;;  %v1497_v27 = vrot.slane %v1366_v55, 7  ;;  %v1648_v42 = vunpack.c.h.bf16 %v240_v48 }
 0x1e4   : > { %v1418_v17 = vpop.f32.mrf.mxu0 }
 0x1e5   : > { %v1660_v16 = vadd.f32 %v1644_v33, %v1628_v59  ;;  %v1518_v50 = vsel %vm627_vm0, %v1496_v54, %v1497_v27  ;;  %v1467_v31 = vpop.f32.mrf.mxu1 }
 0x1e6   : > { %v1545_v7 = vadd.f32 %v1518_v50, %v1415_v19  ;;  %v1562_v36 = vrot.slane %v1467_v31, 1 }
 0x1e7   : > { %1676 = vst [vmem:[%s3058_s24 + $0x20] sm:$0xff] %v1660_v16 }
 0x1e8   : > { %v1581_v0 = vsel %vm692_vm2, %v1561_v6, %v1562_v36 }
 0x1e9   : > { %v1593_v9 = vsel %vm255_vm3, %v1581_v0, 0.0 }
 0x1ea   : > { %v1609_v11 = vadd.f32 %v1593_v9, %v1545_v7  ;;  %v1369_v45 = vpop.f32.mrf.mxu3 }
 0x1eb   : > { %v1498_v5 = vrot.slane %v1369_v45, 7 }
 0x1ec   : > { %v1629_v52 = vadd.f32 %v3049_v41, %v1609_v11  ;;  %v1420_v40 = vpop.f32.mrf.mxu0 }
 0x1ed   : > { %v1517_v53 = vsel %vm627_vm0, %v1497_v27, %v1498_v5  ;;  %v1469_v57 = vpop.f32.mrf.mxu1 }
 0x1ee   : > { %v1661_v13 = vadd.f32 %v1645_v49, %v1629_v52  ;;  %v1530_v63 = vsel %vm252_vm1, %v1517_v53, 0.0  ;;  %v1563_v12 = vrot.slane %v1469_v57, 1 }
 0x1ef   : > { %v1546_v15 = vadd.f32 %v1530_v63, %v1418_v17 }
 0x1f0   : > { %1677 = vst [vmem:[%s3058_s24 + $0x28] sm:$0xff] %v1661_v13  ;;  %v1580_v34 = vsel %vm692_vm2, %v1562_v36, %v1563_v12  ;;  %v242_v36 = vld [vmem:[%s2288_s22 + $0x24] sm:$0xff]  }
 0x1f1   : > { %v1610_v23 = vadd.f32 %v1580_v34, %v1546_v15  ;;  %v1649_v11 = vunpack.c.l.bf16 %v242_v36 }
 0x1f2   : > { %v1371_v8 = vpop.f32.mrf.mxu3 }
 0x1f3   : > { %v1630_v2 = vadd.f32 %v3049_v41, %v1610_v23  ;;  %v1499_v10 = vrot.slane %v1371_v8, 7  ;;  %v1650_v23 = vunpack.c.h.bf16 %v242_v36 }
 0x1f4   : > { %v1423_v32 = vpop.f32.mrf.mxu0 }
 0x1f5   : > { %v1662_v51 = vadd.f32 %v1646_v28, %v1630_v2  ;;  %v1516_v20 = vsel %vm627_vm0, %v1498_v5, %v1499_v10  ;;  %v1472_v60 = vpop.f32.mrf.mxu1 }
 0x1f6   : > { %v1547_v44 = vadd.f32 %v1516_v20, %v1420_v40  ;;  %v1564_v62 = vrot.slane %v1472_v60, 1 }
 0x1f7   : > { %1678 = vst [vmem:[%s3058_s24 + $0x30] sm:$0xff] %v1662_v51 }
 0x1f8   : > { %v1579_v29 = vsel %vm692_vm2, %v1563_v12, %v1564_v62 }
 0x1f9   : > { %v1595_v39 = vsel %vm255_vm3, %v1579_v29, 0.0 }
 0x1fa   : > { %v1611_v26 = vadd.f32 %v1595_v39, %v1547_v44  ;;  %v1374_v24 = vpop.f32.mrf.mxu3 }
 0x1fb   : > { %v1500_v3 = vrot.slane %v1374_v24, 7 }
 0x1fc   : > { %v1631_v54 = vadd.f32 %v3049_v41, %v1611_v26  ;;  %v1425_v14 = vpop.f32.mrf.mxu0 }
 0x1fd   : > { %v1515_v19 = vsel %vm627_vm0, %v1499_v10, %v1500_v3  ;;  %v1474_v22 = vpop.f32.mrf.mxu1 }
 0x1fe   : > { %v1663_v38 = vadd.f32 %v1647_v46, %v1631_v54  ;;  %v1532_v35 = vsel %vm252_vm1, %v1515_v19, 0.0  ;;  %v1565_v47 = vrot.slane %v1474_v22, 1 }
 0x1ff   : > { %v1548_v6 = vadd.f32 %v1532_v35, %v1423_v32 }
 0x200   : > { %1679 = vst [vmem:[%s3058_s24 + $0x38] sm:$0xff] %v1663_v38  ;;  %v1578_v4 = vsel %vm692_vm2, %v1564_v62, %v1565_v47  ;;  %v244_v62 = vld [vmem:[%s2288_s22 + $0x2c] sm:$0xff]  }
 0x201   : > { %v1612_v43 = vadd.f32 %v1578_v4, %v1548_v6  ;;  %v1651_v26 = vunpack.c.l.bf16 %v244_v62 }
 0x202   : > { %v1376_v33 = vpop.f32.mrf.mxu3 }
 0x203   : > { %v1632_v55 = vadd.f32 %v3049_v41, %v1612_v43  ;;  %v1501_v59 = vrot.slane %v1376_v33, 7  ;;  %v1652_v43 = vunpack.c.h.bf16 %v244_v62 }
 0x204   : > { %v1428_v16 = vpop.f32.mrf.mxu0 }
 0x205   : > { %v1664_v27 = vadd.f32 %v1648_v42, %v1632_v55  ;;  %v1514_v17 = vsel %vm627_vm0, %v1500_v3, %v1501_v59  ;;  %v1477_v50 = vpop.f32.mrf.mxu1 }
 0x206   : > { %v1549_v31 = vadd.f32 %v1514_v17, %v1425_v14  ;;  %v1566_v7 = vrot.slane %v1477_v50, 1 }
 0x207   : > { %1680 = vst [vmem:[%s3058_s24 + $0x40] sm:$0xff] %v1664_v27 }
 0x208   : > { %v1577_v56 = vsel %vm692_vm2, %v1565_v47, %v1566_v7 }
 0x209   : > { %v1597_v0 = vsel %vm255_vm3, %v1577_v56, 0.0 }
 0x20a   : > { %v1613_v9 = vadd.f32 %v1597_v0, %v1549_v31  ;;  %v1379_v49 = vpop.f32.mrf.mxu3  ;;  %v246_v31 = vld [vmem:[%s2288_s22 + $0x34] sm:$0xff]  }
 0x20b   : > { %v1502_v45 = vrot.slane %v1379_v49, 7  ;;  %v1653_v0 = vunpack.c.l.bf16 %v246_v31 }
 0x20c   : > { %v1633_v5 = vadd.f32 %v3049_v41, %v1613_v9  ;;  %v1430_v40 = vpop.f32.mrf.mxu0 }
 0x20d   : > { %v1513_v52 = vsel %vm627_vm0, %v1501_v59, %v1502_v45  ;;  %v1479_v53 = vpop.f32.mrf.mxu1 }
 0x20e   : > { %v1665_v57 = vadd.f32 %v1649_v11, %v1633_v5  ;;  %v1534_v13 = vsel %vm252_vm1, %v1513_v52, 0.0  ;;  %v1567_v63 = vrot.slane %v1479_v53, 1 }
 0x20f   : > { %v1550_v12 = vadd.f32 %v1534_v13, %v1428_v16 }
 0x210   : > { %1681 = vst [vmem:[%s3058_s24 + $0x48] sm:$0xff] %v1665_v57  ;;  %v1576_v15 = vsel %vm692_vm2, %v1566_v7, %v1567_v63 }
 0x211   : > { %v1614_v34 = vadd.f32 %v1576_v15, %v1550_v12  ;;  %v1654_v15 = vunpack.c.h.bf16 %v246_v31 }
 0x212   : > { %v1381_v28 = vpop.f32.mrf.mxu3 }
 0x213   : > { %v1634_v8 = vadd.f32 %v3049_v41, %v1614_v34  ;;  %v1503_v2 = vrot.slane %v1381_v28, 7 }
 0x214   : > { %v1433_v44 = vpop.f32.mrf.mxu0 }
 0x215   : > { %v1666_v10 = vadd.f32 %v1650_v23, %v1634_v8  ;;  %v1512_v32 = vsel %vm627_vm0, %v1502_v45, %v1503_v2  ;;  %v1482_v51 = vpop.f32.mrf.mxu1 }
 0x216   : > { %v1551_v20 = vadd.f32 %v1512_v32, %v1430_v40  ;;  %v1568_v60 = vrot.slane %v1482_v51, 1  ;;  %v248_v32 = vld [vmem:[%s2288_s22 + $0x3c] sm:$0xf] }
 0x217   : > { %1682 = vst [vmem:[%s3058_s24 + $0x50] sm:$0xff] %v1666_v10 }
 0x218   : > { %v1575_v48 = vsel %vm692_vm2, %v1567_v63, %v1568_v60 }
 0x219   : > { %v1599_v29 = vsel %vm255_vm3, %v1575_v48, 0.0 }
 0x21a   : > { %v1615_v39 = vadd.f32 %v1599_v29, %v1551_v20  ;;  %v1384_v46 = vpop.f32.mrf.mxu3  ;;  %v1655_v29 = vunpack.c.l.bf16 %v248_v32 }
 0x21b   : > { %v1504_v24 = vrot.slane %v1384_v46, 7 }
 0x21c   : > { %v1635_v3 = vadd.f32 %v3049_v41, %v1615_v39  ;;  %v1435_v6 = vpop.f32.mrf.mxu0 }
 0x21d   : > { %v1511_v54 = vsel %vm627_vm0, %v1503_v2, %v1504_v24  ;;  %v1484_v14 = vpop.f32.mrf.mxu1 }
 0x21e   : > { %v1667_v19 = vadd.f32 %v1651_v26, %v1635_v3  ;;  %v1536_v22 = vsel %vm252_vm1, %v1511_v54, 0.0  ;;  %v1569_v38 = vrot.slane %v1484_v14, 1 }
 0x21f   : > { %v1552_v35 = vadd.f32 %v1536_v22, %v1433_v44 }
 0x220   : > { %1683 = vst [vmem:[%s3058_s24 + $0x58] sm:$0xff] %v1667_v19  ;;  %v1574_v47 = vsel %vm692_vm2, %v1568_v60, %v1569_v38  ;;  %v233_v60 = vld [vmem:[%s2288_s22] sm:$0xf] }
 0x221   : > { %v1616_v4 = vadd.f32 %v1574_v47, %v1552_v35  ;;  %v1640_v39 = vunpack.c.l.bf16 %v233_v60 }
 0x222   : > { %v1386_v42 = vpop.f32.mrf.mxu3 }
 0x223   : > { %v1636_v33 = vadd.f32 %v3049_v41, %v1616_v4  ;;  %v1505_v55 = vrot.slane %v1386_v42, 7 }
 0x224   : > { %v1438_v11 = vpop.f32.mrf.mxu0 }
 0x225   : > { %v1668_v59 = vadd.f32 %v1652_v43, %v1636_v33  ;;  %v1510_v27 = vsel %vm627_vm0, %v1504_v24, %v1505_v55  ;;  %v1487_v17 = vpop.f32.mrf.mxu1 }
 0x226   : > { %v1553_v16 = vadd.f32 %v1510_v27, %v1435_v6  ;;  %v1570_v50 = vrot.slane %v1487_v17, 1 }
 0x227   : > { %1684 = vst [vmem:[%s3058_s24 + $0x60] sm:$0xff] %v1668_v59 }
 0x228   : > { %v1573_v7 = vsel %vm692_vm2, %v1569_v38, %v1570_v50 }
 0x229   : > { %v1601_v36 = vsel %vm255_vm3, %v1573_v7, 0.0 }
 0x22a   : > { %v1617_v56 = vadd.f32 %v1601_v36, %v1553_v16  ;;  %v1389_v9 = vpop.f32.mrf.mxu3 }
 0x22b   : > { %v1506_v49 = vrot.slane %v1389_v9, 7 }
 0x22c   : > { %v1637_v45 = vadd.f32 %v3049_v41, %v1617_v56  ;;  %v1440_v2 = vpop.f32.mrf.mxu0 }
 0x22d   : > { %v1509_v5 = vsel %vm627_vm0, %v1505_v55, %v1506_v49  ;;  %v1489_v52 = vpop.f32.mrf.mxu1 }
 0x22e   : > { %v1669_v40 = vadd.f32 %v1653_v0, %v1637_v45  ;;  %v1538_v53 = vsel %vm252_vm1, %v1509_v5, 0.0  ;;  %v1571_v57 = vrot.slane %v1489_v52, 1 }
 0x22f   : > { %v1554_v13 = vadd.f32 %v1538_v53, %v1438_v11 }
 0x230   : > { %1685 = vst [vmem:[%s3058_s24 + $0x68] sm:$0xff] %v1669_v40  ;;  %v1572_v63 = vsel %vm692_vm2, %v1570_v50, %v1571_v57  ;;  %v1587_v8 = vsel %vm692_vm2, %v1571_v57, %v1556_v58 }
 0x231   : > { %v1618_v12 = vadd.f32 %v1572_v63, %v1554_v13  ;;  %v1603_v58 = vsel %vm255_vm3, %v1587_v8, 0.0 }
 0x232   : > { %v1391_v34 = vpop.f32.mrf.mxu3 }
 0x233   : > { %v1638_v23 = vadd.f32 %v3049_v41, %v1618_v12  ;;  %v1507_v28 = vrot.slane %v1391_v34, 7 }
 0x235   : > { %v1670_v10 = vadd.f32 %v1654_v15, %v1638_v23  ;;  %v1508_v51 = vsel %vm627_vm0, %v1506_v49, %v1507_v28  ;;  %v1523_v20 = vsel %vm627_vm0, %v1507_v28, %v1492_v61 }
 0x236   : > { %v1524_v25 = vsel %vm252_vm1, %v1523_v20, 0.0  ;;  %v1555_v44 = vadd.f32 %v1508_v51, %v1440_v2 }
 0x237   : > { %1686 = vst [vmem:[%s3058_s24 + $0x70] sm:$0xff] %v1670_v10  ;;  %v1540_v62 = vadd.f32 %v1524_v25, %v3025_v37 }
 0x238   : > { %v1619_v48 = vadd.f32 %v1603_v58, %v1555_v44 }
 0x239   : > { %v1604_v21 = vadd.f32 %v3036_v1, %v1540_v62 }
 0x23a   : > { %v1639_v26 = vadd.f32 %v3049_v41, %v1619_v48 }
 0x23b   : > { %v1624_v61 = vadd.f32 %v3049_v41, %v1604_v21 }
 0x23c   : > { %v1671_v46 = vadd.f32 %v1655_v29, %v1639_v26 }
 0x23d   : > { %v1656_v24 = vadd.f32 %v1640_v39, %v1624_v61 }
 0x23e   : > { %1687 = vst [vmem:[%s3058_s24 + $0x78] sm:$0xff] %v1671_v46 }
 0x23f   : > { %1672 = vst [vmem:[%s3058_s24] sm:$0xff] %v1656_v24 }
 0x240 PF: > { %s15_s18 = sadd.s32 1, %s2138_s18  }
 0x241   : > { %p12_p4 = scmp.ge.s32.totalorder %s15_s18, 4  }
 0x243   :  { %14 = sbr.rel (!%p12_p4) target bundleno = 1 (0x1), region = 70 }

// kernel: resblock1_forward.1
= control target key start
LH: loop header
LB: loop body
LE: loop exit
PB: predicated region body
PF: predicated region fallthrough
CT: control target
= control target key end

     0   :  { %s2170_s18 = smov 0   ;;  %s3196_s0 = inlined_call_operand.vmem [shape: bf16[16,16,128], index: 0, kind: input, shape index: {}]   ;;  %s3197_s1 = inlined_call_operand.vmem [shape: bf16[128,384], index: 1, kind: input, shape index: {}]   ;;  %s3198_s2 = inlined_call_operand.vmem [shape: f32[1,128], index: 2, kind: input, shape index: {}]   ;;  %s3199_s3 = inlined_call_operand.vmem [shape: bf16[128,384], index: 3, kind: input, shape index: {}]   ;;  %s3200_s4 = inlined_call_operand.vmem [shape: f32[1,128], index: 4, kind: input, shape index: {}]   ;;  %s3201_s5 = inlined_call_operand.vmem [shape: f32[16,16,128], index: 5, kind: output, shape index: {}]  }
   0x1 LB: > { %s1746_s19 = sadd.s32 4294967295, %s2138_s18   ;;  %p1750_p0 = scmp.ge.s32.totalorder %s2138_s18, 1  ;;  %s2138_s18 = sphi %s2170_s18, %s15_s18  }
   0x2   : > { %p189_p1 = scmp.lt.s32.totalorder %s2138_s18, 3 }
   0x4   : > { %p190_p2 = pnand %p1750_p0, %p189_p1 }
   0x5   : > { %s1751_s12 = sshll.u32 (!%p190_p2), %s1746_s19, 3 }
   0x6   : > { %193 = sbr.rel (%p190_p2) target bundleno = 576 (0x240), region = 40  ;;  %p220_p3 = scmp.lt.s32.totalorder (!%p190_p2), %s1751_s12, 15 }
   0xb   : > { %v1875_v0 = vld [vmem:[%s3197_s1 + $0xa8] sm:$0xf]  ;;  %v2015_v1 = vld [vmem:[%s3197_s1 + $0xb0] sm:$0xf0]  ;;  %v2014_v2 = vld [vmem:[%s3197_s1 + $0xac] sm:$0xf] }
   0xc   : > { %v1876_v3 = vor.u32 %v2015_v1, %v1875_v0  ;;  %v1877_v4 = vld [vmem:[%s3197_s1 + $0xb4] sm:$0xf0]  ;;  %v1863_v5 = vld [vmem:[%s3197_s1 + $0x90] sm:$0xf]  ;;  %v2012_v6 = vld [vmem:[%s3197_s1 + $0x98] sm:$0xf0] }
   0xd   : > { %v1880_v7 = vor.u32 %v2014_v2, %v1877_v4  ;;  %v2011_v8 = vld [vmem:[%s3197_s1 + $0x94] sm:$0xf]  ;;  %v1865_v9 = vld [vmem:[%s3197_s1 + $0x9c] sm:$0xf0]  ;;  %v1864_v10 = vor.u32 %v2012_v6, %v1863_v5  ;;  %v1851_v12 = vld [vmem:[%s3197_s1 + $0x78] sm:$0xf] }
   0xe   : > { %464 = vmatpush.bf16.msra.mxu0 %v1876_v3  ;;  %2041 = vmatpush.bf16.msra.mxu2 %v1876_v3  ;;  %v1868_v11 = vor.u32 %v2011_v8, %v1865_v9  ;;  %v2009_v13 = vld [vmem:[%s3197_s1 + $0x80] sm:$0xf0]  ;;  %v2008_v14 = vld [vmem:[%s3197_s1 + $0x7c] sm:$0xf]  ;;  %v1853_v15 = vld [vmem:[%s3197_s1 + $0x84] sm:$0xf0] }
   0xf   : > { %2049 = vmatpush.bf16.msra.mxu3 %v1880_v7  ;;  %513 = vmatpush.bf16.msra.mxu1 %v1880_v7  ;;  %v1852_v16 = vor.u32 %v2009_v13, %v1851_v12  ;;  %v1856_v17 = vor.u32 %v2008_v14, %v1853_v15  ;;  %v1839_v18 = vld [vmem:[%s3197_s1 + $0x60] sm:$0xf]  ;;  %v2006_v19 = vld [vmem:[%s3197_s1 + $0x68] sm:$0xf0]  ;;  %v2005_v20 = vld [vmem:[%s3197_s1 + $0x64] sm:$0xf] }
  0x10   : > { %v1841_v21 = vld [vmem:[%s3197_s1 + $0x6c] sm:$0xf0]  ;;  %v1840_v22 = vor.u32 %v2006_v19, %v1839_v18  ;;  %v1827_v23 = vld [vmem:[%s3197_s1 + $0x48] sm:$0xf]  ;;  %v2003_v25 = vld [vmem:[%s3197_s1 + $0x50] sm:$0xf0] }
  0x11   : > { %v1844_v24 = vor.u32 %v2005_v20, %v1841_v21  ;;  %v2002_v26 = vld [vmem:[%s3197_s1 + $0x4c] sm:$0xf]  ;;  %v1829_v27 = vld [vmem:[%s3197_s1 + $0x54] sm:$0xf0]  ;;  %v1828_v28 = vor.u32 %v2003_v25, %v1827_v23  ;;  %v1815_v30 = vld [vmem:[%s3197_s1 + $0x30] sm:$0xf] }
  0x12   : > { %465 = vmatpush.bf16.msra.mxu0 %v1864_v10  ;;  %2042 = vmatpush.bf16.msra.mxu2 %v1864_v10  ;;  %v1832_v29 = vor.u32 %v2002_v26, %v1829_v27  ;;  %v2000_v31 = vld [vmem:[%s3197_s1 + $0x38] sm:$0xf0]  ;;  %v1999_v32 = vld [vmem:[%s3197_s1 + $0x34] sm:$0xf]  ;;  %v1817_v33 = vld [vmem:[%s3197_s1 + $0x3c] sm:$0xf0] }
  0x13   : > { %2050 = vmatpush.bf16.msra.mxu3 %v1868_v11  ;;  %514 = vmatpush.bf16.msra.mxu1 %v1868_v11  ;;  %v1816_v34 = vor.u32 %v2000_v31, %v1815_v30  ;;  %v1820_v35 = vor.u32 %v1999_v32, %v1817_v33  ;;  %v1803_v36 = vld [vmem:[%s3197_s1 + $0x18] sm:$0xf]  ;;  %v1997_v37 = vld [vmem:[%s3197_s1 + $0x20] sm:$0xf0]  ;;  %s3203_s12 = smov (!%p220_p3, %s1751_s12), 15 }
  0x14   : > { %v1996_v38 = vld [vmem:[%s3197_s1 + $0x1c] sm:$0xf]  ;;  %v1805_v39 = vld [vmem:[%s3197_s1 + $0x24] sm:$0xf0]  ;;  %v1804_v40 = vor.u32 %v1997_v37, %v1803_v36  ;;  %v1791_v41 = vld [vmem:[%s3197_s1] sm:$0xf] }
  0x15   : > { %v1808_v42 = vor.u32 %v1996_v38, %v1805_v39  ;;  %v1994_v43 = vld [vmem:[%s3197_s1 + $0x8] sm:$0xf0]  ;;  %s1983_s9 = sshll.u32 %s3203_s12, 3  ;;  %v1993_v44 = vld [vmem:[%s3197_s1 + $0x4] sm:$0xf]  ;;  %s1984_s19 = sshll.u32 %s3203_s12, 4 }
  0x16   : > { %466 = vmatpush.bf16.msra.mxu0 %v1852_v16  ;;  %2043 = vmatpush.bf16.msra.mxu2 %v1852_v16  ;;  %v1793_v45 = vld [vmem:[%s3197_s1 + $0xc] sm:$0xf0]  ;;  %v2016_v47 = vld [vmem:[%s3197_s1 + $0xb8] sm:$0xf0]  ;;  %v1792_v48 = vor.u32 %v1994_v43, %v1791_v41  ;;  %s2288_s22 = scalar_lea.vmem %s3196_s0, %s1983_s9  ;;  %v1871_v51 = vld [vmem:[%s3197_s1 + $0x98] sm:$0xf]  ;;  %s3058_s24 = scalar_lea.vmem %s3201_s5, %s1984_s19 }
  0x17   : > { %2051 = vmatpush.bf16.msra.mxu3 %v1856_v17  ;;  %515 = vmatpush.bf16.msra.mxu1 %v1856_v17  ;;  %v1883_v46 = vld [vmem:[%s3197_s1 + $0xb0] sm:$0xf]  ;;  %v1796_v49 = vor.u32 %v1993_v44, %v1793_v45  ;;  %v2013_v52 = vld [vmem:[%s3197_s1 + $0xa0] sm:$0xf0]  ;;  %v1859_v56 = vld [vmem:[%s3197_s1 + $0x80] sm:$0xf]  ;;  %v249_v17 = vlaneseq }
  0x18   : > { %v1884_v50 = vor.u32 %v2016_v47, %v1883_v46  ;;  %v1985_v53 = vld [vmem:[%s2288_s22] sm:$0xff]  ;;  %v1872_v55 = vor.u32 %v2013_v52, %v1871_v51  ;;  %v2010_v57 = vld [vmem:[%s3197_s1 + $0x88] sm:$0xf0]  ;;  %v1847_v59 = vld [vmem:[%s3197_s1 + $0x68] sm:$0xf] }
  0x19   : > { %v1989_v54 = vld [vmem:[%s2288_s22 + $0x20] sm:$0xff]  ;;  %v1860_v58 = vor.u32 %v2010_v57, %v1859_v56  ;;  %v2007_v60 = vld [vmem:[%s3197_s1 + $0x70] sm:$0xf0]  ;;  %v1835_v62 = vld [vmem:[%s3197_s1 + $0x50] sm:$0xf]  ;;  %v2342_v18 = vshrl.u32 %v249_v17, 7 }
  0x1a   : > { %467 = vmatpush.bf16.msra.mxu0 %v1840_v22  ;;  %2044 = vmatpush.bf16.msra.mxu2 %v1840_v22  ;;  %v1848_v61 = vor.u32 %v2007_v60, %v1847_v59  ;;  %v2004_v63 = vld [vmem:[%s3197_s1 + $0x58] sm:$0xf0]  ;;  %v1823_v1 = vld [vmem:[%s3197_s1 + $0x38] sm:$0xf]  ;;  %v2001_v2 = vld [vmem:[%s3197_s1 + $0x40] sm:$0xf0] }
  0x1b   : > { %2052 = vmatpush.bf16.msra.mxu3 %v1844_v24  ;;  %516 = vmatpush.bf16.msra.mxu1 %v1844_v24  ;;  %v1836_v0 = vor.u32 %v2004_v63, %v1835_v62  ;;  %v1986_v3 = vld [vmem:[%s2288_s22 + $0x8] sm:$0xff]  ;;  %v1824_v5 = vor.u32 %v2001_v2, %v1823_v1  ;;  %v1811_v6 = vld [vmem:[%s3197_s1 + $0x20] sm:$0xf]  ;;  %v1995_v10 = vld [vmem:[%s3197_s1 + $0x10] sm:$0xf0]  ;;  %vm627_vm0 = vcmp.lt.s32.totalorder %v2342_v18, 1 }
  0x1c   : > { %v1990_v4 = vld [vmem:[%s2288_s22 + $0x28] sm:$0xff]  ;;  %v1987_v12 = vld [vmem:[%s2288_s22 + $0x10] sm:$0xff]  ;;  %v1988_v14 = vld [vmem:[%s2288_s22 + $0x18] sm:$0xff]  ;;  %vm252_vm1 = vcmp.ne.s32.totalorder %v2342_v18, 0  ;;  %vm692_vm2 = vcmp.lt.s32.totalorder %v2342_v18, 7 }
  0x1d   : > { %v1998_v7 = vld [vmem:[%s3197_s1 + $0x28] sm:$0xf0]  ;;  %v1799_v9 = vld [vmem:[%s3197_s1 + $0x8] sm:$0xf]  ;;  %v1991_v13 = vld [vmem:[%s2288_s22 + $0x30] sm:$0xff] }
  0x1e   : > { %468 = vmatpush.bf16.msra.mxu0 %v1828_v28  ;;  %2045 = vmatpush.bf16.msra.mxu2 %v1828_v28  ;;  %v1812_v8 = vor.u32 %v1998_v7, %v1811_v6  ;;  %v1800_v11 = vor.u32 %v1995_v10, %v1799_v9  ;;  %v1992_v15 = vld [vmem:[%s2288_s22 + $0x38] sm:$0xff]  ;;  %v1971_v32 = vld [vmem:[%s3199_s3 + $0xa8] sm:$0xf]  ;;  %v2039_v33 = vld [vmem:[%s3199_s3 + $0xb0] sm:$0xf0] }
  0x1f   : > { %2053 = vmatpush.bf16.msra.mxu3 %v1832_v29  ;;  %517 = vmatpush.bf16.msra.mxu1 %v1832_v29  ;;  %v1959_v47 = vld [vmem:[%s3199_s3 + $0x90] sm:$0xf]  ;;  %v1973_v59 = vld [vmem:[%s3199_s3 + $0xb4] sm:$0xf0]  ;;  %v2033_v63 = vld [vmem:[%s3199_s3 + $0x80] sm:$0xf0] }
  0x20   : > { %v1947_v60 = vld [vmem:[%s3199_s3 + $0x78] sm:$0xf]  ;;  %v2037_v1 = vld [vmem:[%s3199_s3 + $0xa0] sm:$0xf0]  ;;  %v2434_v7 = vld [vmem:[%s3198_s2] ss:$0 sm:$0xff] }
  0x21   : > { %v2035_v10 = vld [vmem:[%s3199_s3 + $0x94] sm:$0xf]  ;;  %v2030_v17 = vld [vmem:[%s3199_s3 + $0x68] sm:$0xf0] }
  0x22   : > { %469 = vmatpush.bf16.msra.mxu0 %v1816_v34  ;;  %2046 = vmatpush.bf16.msra.mxu2 %v1816_v34  ;;  %v1972_v34 = vor.u32 %v2039_v33, %v1971_v32  ;;  %v1949_v32 = vld [vmem:[%s3199_s3 + $0x84] sm:$0xf0] }
  0x23   : > { %2054 = vmatpush.bf16.msra.mxu3 %v1820_v35  ;;  %518 = vmatpush.bf16.msra.mxu1 %v1820_v35 }
  0x26   : > { %470 = vmatpush.bf16.msra.mxu0 %v1804_v40  ;;  %2047 = vmatpush.bf16.msra.mxu2 %v1804_v40 }
  0x27   : > { %2055 = vmatpush.bf16.msra.mxu3 %v1808_v42  ;;  %519 = vmatpush.bf16.msra.mxu1 %v1808_v42 }
  0x2a   : > { %471 = vmatpush.bf16.msra.mxu0 %v1792_v48  ;;  %2048 = vmatpush.bf16.msra.mxu2 %v1792_v48  ;;  %v2036_v48 = vld [vmem:[%s3199_s3 + $0x98] sm:$0xf0] }
  0x2b   : > { %2056 = vmatpush.bf16.msra.mxu3 %v1796_v49  ;;  %520 = vmatpush.bf16.msra.mxu1 %v1796_v49  ;;  %v1979_v49 = vld [vmem:[%s3199_s3 + $0xb0] sm:$0xf]  ;;  %v1960_v52 = vor.u32 %v2036_v48, %v1959_v47  ;;  %v2031_v47 = vld [vmem:[%s3199_s3 + $0x70] sm:$0xf0] }
  0x2d   : > { %472 = vmatmul.bf16.vlgmr.msra.gmra.mxu0 %v1985_v53  ;;  %492 = vmatmul.bf16.vlgmr.msra.gmra.mxu2 %v1989_v54 }
  0x2e   : > { %562 = vmatpush.bf16.msrb.mxu2 %v1884_v50  ;;  %541 = vmatmul.bf16.vlgmr.msra.gmra.mxu3 %v1989_v54 }
  0x2f   : > { %521 = vmatmul.bf16.vlgmr.msra.gmra.mxu1 %v1985_v53  ;;  %1345 = vmatpush.bf16.msrb.mxu3 %v1972_v34 }
  0x32   : > { %563 = vmatpush.bf16.msrb.mxu2 %v1872_v55 }
  0x33   : > { %1346 = vmatpush.bf16.msrb.mxu3 %v1960_v52  ;;  %v2029_v52 = vld [vmem:[%s3199_s3 + $0x64] sm:$0xf] }
  0x36   : > { %564 = vmatpush.bf16.msrb.mxu2 %v1860_v58  ;;  %v2038_v58 = vld [vmem:[%s3199_s3 + $0xac] sm:$0xf] }
  0x37   : > { %v1976_v62 = vor.u32 %v2038_v58, %v1973_v59  ;;  %v1923_v58 = vld [vmem:[%s3199_s3 + $0x48] sm:$0xf]  ;;  %v2027_v59 = vld [vmem:[%s3199_s3 + $0x50] sm:$0xf0] }
  0x39   : > { %1394 = vmatpush.bf16.msrb.mxu0 %v1976_v62 }
  0x3a   : > { %565 = vmatpush.bf16.msrb.mxu2 %v1848_v61 }
  0x3d   : > { %477 = vmatmul.bf16.gmra.mxu0 %v1986_v3  ;;  %497 = vmatmul.bf16.gmra.mxu2 %v1990_v4 }
  0x3e   : > { %566 = vmatpush.bf16.msrb.mxu2 %v1836_v0  ;;  %546 = vmatmul.bf16.gmra.mxu3 %v1990_v4  ;;  %v1967_v0 = vld [vmem:[%s3199_s3 + $0x98] sm:$0xf] }
  0x3f   : > { %526 = vmatmul.bf16.gmra.mxu1 %v1986_v3 }
  0x42   : > { %567 = vmatpush.bf16.msrb.mxu2 %v1824_v5 }
  0x46   : > { %568 = vmatpush.bf16.msrb.mxu2 %v1812_v8 }
  0x4a   : > { %569 = vmatpush.bf16.msrb.mxu2 %v1800_v11  ;;  %v1961_v11 = vld [vmem:[%s3199_s3 + $0x9c] sm:$0xf0] }
  0x4d   : > { %482 = vmatmul.bf16.gmra.mxu0 %v1987_v12  ;;  %502 = vmatmul.bf16.gmra.mxu2 %v1991_v13 }
  0x4e   : > { %551 = vmatmul.bf16.gmra.mxu3 %v1991_v13 }
  0x4f   : > { %531 = vmatmul.bf16.gmra.mxu1 %v1987_v12 }
  0x5d   : > { %487 = vmatmul.bf16.gmra.mxu0 %v1988_v14  ;;  %507 = vmatmul.bf16.gmra.mxu2 %v1992_v15 }
  0x5e   : > { %556 = vmatmul.bf16.gmra.mxu3 %v1992_v15 }
  0x5f   : > { %536 = vmatmul.bf16.gmra.mxu1 %v1988_v14 }
  0x6d   : > { %570 = vmatmul.bf16.vlgmr.msrb.gmra.mxu2 %v1985_v53  ;;  %v2040_v53 = vld [vmem:[%s3199_s3 + $0xb8] sm:$0xf0] }
  0x7d   : > { %575 = vmatmul.bf16.gmra.mxu2 %v1986_v3  ;;  %v1948_v3 = vor.u32 %v2033_v63, %v1947_v60 }
  0x7f   : > { %1347 = vmatpush.bf16.msrb.mxu3 %v1948_v3  ;;  %v1931_v3 = vld [vmem:[%s3199_s3 + $0x50] sm:$0xf] }
  0x8d   : > { %580 = vmatmul.bf16.gmra.mxu2 %v1987_v12 }
  0x9d   : > { %585 = vmatmul.bf16.gmra.mxu2 %v1988_v14  ;;  %v1964_v14 = vor.u32 %v2035_v10, %v1961_v11  ;;  %v1925_v10 = vld [vmem:[%s3199_s3 + $0x54] sm:$0xf0] }
  0x9f   : > { %1395 = vmatpush.bf16.msrb.mxu0 %v1964_v14 }
  0xaa   : > { %v2360_v29 = vpop.f32.mrf.mxu0 }
  0xab   : > { %v611_v55 = vrot.slane %v2360_v29, 7 }
  0xac   : > { %v522_v44 = vpop.f32.mrf.mxu1 }
  0xad   : > { %590 = vmatmul.bf16.gmra.mxu2 %v1989_v54  ;;  %v1980_v54 = vor.u32 %v2040_v53, %v1979_v49  ;;  %v1937_v53 = vld [vmem:[%s3199_s3 + $0x6c] sm:$0xf0] }
  0xae   : > { %v1940_v60 = vor.u32 %v2029_v52, %v1937_v53 }
  0xaf   : > { %1443 = vmatpush.bf16.msrb.mxu1 %v1980_v54 }
  0xb0   : > { %v2340_v16 = vpop.f32.mrf.mxu2 }
  0xb1   : > { %v619_v20 = vrot.slane %v2340_v16, 7 }
  0xb2   : > { %v2372_v36 = vpop.f32.mrf.mxu0 }
  0xb4   : > { %v524_v57 = vpop.f32.mrf.mxu1 }
  0xb8   : > { %v495_v19 = vpop.f32.mrf.mxu2 }
  0xb9   : > { %v620_v21 = vrot.slane %v495_v19, 7  ;;  %v1955_v19 = vld [vmem:[%s3199_s3 + $0x80] sm:$0xf] }
  0xba   : > { %v2378_v41 = vpop.f32.mrf.mxu0 }
  0xbb   : > { %v2350_v22 = vsel %vm627_vm0, %v619_v20, %v620_v21 }
  0xbd   : > { %595 = vmatmul.bf16.gmra.mxu2 %v1990_v4  ;;  %v1968_v4 = vor.u32 %v2037_v1, %v1967_v0  ;;  %v1924_v0 = vor.u32 %v2027_v59, %v1923_v58  ;;  %v1907_v59 = vld [vmem:[%s3199_s3 + $0x20] sm:$0xf] }
  0xbf   : > { %1444 = vmatpush.bf16.msrb.mxu1 %v1968_v4  ;;  %v2028_v4 = vld [vmem:[%s3199_s3 + $0x58] sm:$0xf0] }
  0xc0   : > { %v498_v23 = vpop.f32.mrf.mxu2 }
  0xc1   : > { %v621_v24 = vrot.slane %v498_v23, 7 }
  0xc2   : > { %v2393_v50 = vpop.f32.mrf.mxu0 }
  0xc3   : > { %v2354_v25 = vsel %vm627_vm0, %v620_v21, %v621_v24 }
  0xc8   : > { %v500_v26 = vpop.f32.mrf.mxu2 }
  0xc9   : > { %v622_v27 = vrot.slane %v500_v26, 7  ;;  %v612_v26 = vrot.slane %v2372_v36, 7 }
  0xca   : > { %v2425_v2 = vpop.f32.mrf.mxu0 }
  0xcb   : > { %v2358_v28 = vsel %vm627_vm0, %v621_v24, %v622_v27  ;;  %v2034_v24 = vld [vmem:[%s3199_s3 + $0x88] sm:$0xf0] }
  0xcc   : > { %v1956_v29 = vor.u32 %v2034_v24, %v1955_v19 }
  0xcd   : > { %600 = vmatmul.bf16.gmra.mxu2 %v1991_v13  ;;  %v2443_v13 = vpop.f32.mrf.mxu1 }
  0xce   : > { %1445 = vmatpush.bf16.msrb.mxu1 %v1956_v29  ;;  %v2025_v29 = vld [vmem:[%s3199_s3 + $0x40] sm:$0xf0] }
  0xd0   : > { %v503_v30 = vpop.f32.mrf.mxu2 }
  0xd1   : > { %v623_v31 = vrot.slane %v503_v30, 7  ;;  %v2463_v30 = vadd.s32 8, %v2342_v18 }
  0xd2   : > { %v2474_v36 = vpop.f32.mrf.mxu0 }
  0xd3   : > { %v2370_v35 = vsel %vm627_vm0, %v622_v27, %v623_v31  ;;  %vm255_vm3 = vcmp.ne.s32.totalorder %v2463_v30, 15 }
  0xd5   : > { %v2515_v63 = vpop.f32.mrf.mxu1 }
  0xd8   : > { %v505_v37 = vpop.f32.mrf.mxu2 }
  0xd9   : > { %v624_v38 = vrot.slane %v505_v37, 7  ;;  %v613_v37 = vrot.slane %v2378_v41, 7 }
  0xdb   : > { %v2376_v39 = vsel %vm627_vm0, %v623_v31, %v624_v38  ;;  %v2032_v31 = vld [vmem:[%s3199_s3 + $0x7c] sm:$0xf]  ;;  %v641_v62 = vsel %vm627_vm0, %v612_v26, %v613_v37 }
  0xdc   : > { %v1952_v34 = vor.u32 %v2032_v31, %v1949_v32  ;;  %v646_v11 = vsel %vm252_vm1, %v641_v62, 0.0 }
  0xdd   : > { %605 = vmatmul.bf16.gmra.mxu2 %v1992_v15  ;;  %v1935_v15 = vld [vmem:[%s3199_s3 + $0x60] sm:$0xf]  ;;  %v662_v24 = vadd.f32 %v646_v11, %v2443_v13  ;;  %v2575_v58 = vpop.f32.mrf.mxu1 }
  0xde   : > { %v1936_v23 = vor.u32 %v2030_v17, %v1935_v15  ;;  %1396 = vmatpush.bf16.msrb.mxu0 %v1952_v34  ;;  %v2534_v17 = vpop.f32.mrf.mxu0 }
  0xe0   : > { %v508_v40 = vpop.f32.mrf.mxu2  ;;  %1348 = vmatpush.bf16.msrb.mxu3 %v1936_v23  ;;  %v1911_v23 = vld [vmem:[%s3199_s3 + $0x30] sm:$0xf] }
  0xe1   : > { %v625_v42 = vrot.slane %v508_v40, 7 }
  0xe2   : > { %1397 = vmatpush.bf16.msrb.mxu0 %v1940_v60  ;;  %v2022_v60 = vld [vmem:[%s3199_s3 + $0x28] sm:$0xf0] }
  0xe3   : > { %v2382_v43 = vsel %vm627_vm0, %v624_v38, %v625_v42  ;;  %v642_v38 = vsel %vm627_vm0, %v611_v55, %v612_v26  ;;  %v2024_v26 = vld [vmem:[%s3199_s3 + $0x38] sm:$0xf0] }
  0xe4   : > { %v661_v54 = vadd.f32 %v642_v38, %v524_v57  ;;  %1349 = vmatpush.bf16.msrb.mxu3 %v1924_v0  ;;  %v1912_v34 = vor.u32 %v2024_v26, %v1911_v23  ;;  %v2020_v0 = vld [vmem:[%s3199_s3 + $0x1c] sm:$0xf]  ;;  %v2017_v23 = vld [vmem:[%s3199_s3 + $0x4] sm:$0xf] }
  0xe8   : > { %v510_v45 = vpop.f32.mrf.mxu2  ;;  %1350 = vmatpush.bf16.msrb.mxu3 %v1912_v34  ;;  %v1895_v34 = vld [vmem:[%s3199_s3 + $0x8] sm:$0xf] }
  0xe9   : > { %v626_v46 = vrot.slane %v510_v45, 7 }
  0xeb   : > { %v2397_v51 = vsel %vm627_vm0, %v625_v42, %v626_v46  ;;  %v643_v61 = vsel %vm627_vm0, %v626_v46, %v611_v55  ;;  %v1943_v46 = vld [vmem:[%s3199_s3 + $0x68] sm:$0xf] }
  0xec   : > { %v644_v5 = vsel %vm252_vm1, %v643_v61, 0.0  ;;  %v1944_v49 = vor.u32 %v2031_v47, %v1943_v46  ;;  %v1913_v46 = vld [vmem:[%s3199_s3 + $0x3c] sm:$0xf0]  ;;  %v614_v47 = vrot.slane %v2393_v50, 7  ;;  %v2021_v50 = vld [vmem:[%s3199_s3 + $0x20] sm:$0xf0] }
  0xed   : > { %v660_v12 = vadd.f32 %v644_v5, %v522_v44  ;;  %v2482_v44 = vpop.f32.mrf.mxu3  ;;  %v2026_v5 = vld [vmem:[%s3199_s3 + $0x4c] sm:$0xf] }
  0xee   : > { %1446 = vmatpush.bf16.msrb.mxu1 %v1944_v49  ;;  %v1928_v14 = vor.u32 %v2026_v5, %v1925_v10 }
  0xf0   : > { %v2403_v56 = vpop.f32.mrf.mxu2  ;;  %1398 = vmatpush.bf16.msrb.mxu0 %v1928_v14  ;;  %v1887_v14 = vld [vmem:[%s3199_s3] sm:$0xf] }
  0xf1   : > { %v676_v8 = vrot.slane %v2403_v56, 1 }
  0xf5   : > { %v2552_v31 = vpop.f32.mrf.mxu3 }
  0xf6   : > { %v2671_v16 = vadd.f32 %v2350_v22, %v2552_v31 }
  0xf8   : > { %v573_v6 = vpop.f32.mrf.mxu2 }
  0xf9   : > { %v677_v9 = vrot.slane %v573_v6, 1 }
  0xfb   : > { %v707_v21 = vsel %vm692_vm2, %v676_v8, %v677_v9 }
  0xfc   : > { %v725_v27 = vadd.f32 %v707_v21, %v660_v12 }
  0xfe   : > { %v2472_v33 = vadd.f32 %v2434_v7, %v725_v27  ;;  %v1919_v27 = vld [vmem:[%s3199_s3 + $0x38] sm:$0xf] }
  0xff   : > { %v1920_v38 = vor.u32 %v2025_v29, %v1919_v27 }
 0x100   : > { %v2480_v40 = vmul.f32 0.70710677, %v2472_v33  ;;  %v576_v42 = vpop.f32.mrf.mxu2 }
 0x101   : > { %v678_v45 = vrot.slane %v576_v42, 1  ;;  %v2023_v42 = vld [vmem:[%s3199_s3 + $0x34] sm:$0xf] }
 0x102   : > { %v2492_v48 = vand.u32 2147483647, %v2480_v40  ;;  %v1916_v52 = vor.u32 %v2023_v42, %v1913_v46  ;;  %vm1097_vm4 = vcmp.ge.f32.partialorder %v2480_v40, 0.0 }
 0x103   : > { %v706_v55 = vsel %vm692_vm2, %v677_v9, %v678_v45  ;;  %v1932_v9 = vor.u32 %v2028_v4, %v1931_v3  ;;  %v615_v3 = vrot.slane %v2425_v2, 7  ;;  %v640_v4 = vsel %vm627_vm0, %v613_v37, %v614_v47  ;;  %v2018_v37 = vld [vmem:[%s3199_s3 + $0x8] sm:$0xf0] }
 0x104   : > { %v809_v61 = vmul.f32 0.3275911, %v2492_v48  ;;  %v710_v57 = vsel %vm255_vm3, %v706_v55, 0.0  ;;  %1399 = vmatpush.bf16.msrb.mxu0 %v1916_v52  ;;  %v1001_v10 = vsub.f32 0.0, %v2492_v48  ;;  %v663_v26 = vadd.f32 %v640_v4, %v2515_v63  ;;  %v534_v4 = vpop.f32.mrf.mxu1 }
 0x105   : > { %v726_v1 = vadd.f32 %v710_v57, %v661_v54  ;;  %1447 = vmatpush.bf16.msrb.mxu1 %v1932_v9  ;;  %v1908_v57 = vor.u32 %v2022_v60, %v1907_v59  ;;  %v1888_v29 = vor.u32 %v2018_v37, %v1887_v14  ;;  %v639_v63 = vsel %vm627_vm0, %v614_v47, %v615_v3 }
 0x106   : > { %v825_v6 = vadd.f32 1.0, %v809_v61  ;;  %v1017_v59 = vmul.f32 %v1001_v10, %v2492_v48  ;;  %v648_v47 = vsel %vm252_vm1, %v639_v63, 0.0  ;;  %v616_v48 = vrot.slane %v2474_v36, 7 }
 0x107   : > { %v2532_v12 = vadd.f32 %v2434_v7, %v726_v1  ;;  %v1901_v1 = vld [vmem:[%s3199_s3 + $0x24] sm:$0xf0]  ;;  %v617_v10 = vrot.slane %v2534_v17, 7 }
 0x108   : > { %2067 = vrcp.f32 %v825_v6  ;;  %v578_v15 = vpop.f32.mrf.mxu2  ;;  %v1904_v9 = vor.u32 %v2020_v0, %v1901_v1  ;;  %v654_v1 = vsel %vm252_vm1, %v2354_v25, 0.0  ;;  %v1033_v36 = vmul.f32 1.442695, %v1017_v59 }
 0x109   : > { %v2537_v19 = vmul.f32 0.70710677, %v2532_v12  ;;  %v679_v21 = vrot.slane %v578_v15, 1  ;;  %1448 = vmatpush.bf16.msrb.mxu1 %v1920_v38  ;;  %v2019_v38 = vld [vmem:[%s3199_s3 + $0x10] sm:$0xf0]  ;;  %v637_v31 = vsel %vm627_vm0, %v616_v48, %v617_v10 }
 0x10a   : > { %1400 = vmatpush.bf16.msrb.mxu0 %v1904_v9 }
 0x10b   : > { %v2555_v32 = vand.u32 2147483647, %v2537_v19  ;;  %v705_v13 = vsel %vm692_vm2, %v678_v45, %v679_v21  ;;  %v1899_v45 = vld [vmem:[%s3199_s3 + $0x18] sm:$0xf]  ;;  %vm1098_vm5 = vcmp.ge.f32.partialorder %v2537_v19, 0.0 }
 0x10c   : > { %v727_v49 = vadd.f32 %v705_v13, %v662_v24  ;;  %v1900_v62 = vor.u32 %v2021_v50, %v1899_v45  ;;  %v2614_v24 = vpop.f32.mrf.mxu0  ;;  %v1889_v13 = vld [vmem:[%s3199_s3 + $0xc] sm:$0xf0] }
 0x10d   : > { %v810_v53 = vmul.f32 0.3275911, %v2555_v32  ;;  %1449 = vmatpush.bf16.msrb.mxu1 %v1908_v57  ;;  %v1892_v46 = vor.u32 %v2017_v23, %v1889_v13  ;;  %v618_v50 = vrot.slane %v2614_v24, 7  ;;  %v664_v23 = vadd.f32 %v648_v47, %v2575_v58 }
 0x10e   : > { %v2570_v54 = vpop.eup %2067  ;;  %v2573_v55 = vadd.f32 %v2434_v7, %v727_v49  ;;  %1351 = vmatpush.bf16.msrb.mxu3 %v1900_v62  ;;  %v547_v49 = vpop.f32.mrf.mxu3  ;;  %v1002_v62 = vsub.f32 0.0, %v2555_v32 }
 0x10f   : > { %v826_v61 = vadd.f32 1.0, %v810_v53  ;;  %v857_v41 = vmul.f32 1.0614054, %v2570_v54  ;;  %v1896_v53 = vor.u32 %v2019_v38, %v1895_v34  ;;  %1401 = vmatpush.bf16.msrb.mxu0 %v1892_v46  ;;  %v635_v25 = vsel %vm627_vm0, %v618_v50, %v619_v20 }
 0x110   : > { %v2598_v5 = vmul.f32 0.70710677, %v2573_v55  ;;  %v581_v6 = vpop.f32.mrf.mxu2  ;;  %v2673_v38 = vadd.f32 %v654_v1, %v547_v49  ;;  %v650_v1 = vsel %vm252_vm1, %v637_v31, 0.0 }
 0x111   : > { %2069 = vrcp.f32 %v826_v61  ;;  %v680_v11 = vrot.slane %v581_v6, 1  ;;  %v873_v45 = vadd.f32 -1.4531521, %v857_v41  ;;  %1450 = vmatpush.bf16.msrb.mxu1 %v1896_v53 }
 0x112   : > { %v2606_v15 = vand.u32 2147483647, %v2598_v5  ;;  %1352 = vmatpush.bf16.msrb.mxu3 %v1888_v29  ;;  %vm1099_vm6 = vcmp.ge.f32.partialorder %v2598_v5, 0.0 }
 0x113   : > { %v704_v27 = vsel %vm692_vm2, %v679_v21, %v680_v11  ;;  %v889_v0 = vmul.f32 %v2570_v54, %v873_v45 }
 0x114   : > { %v811_v42 = vmul.f32 0.3275911, %v2606_v15  ;;  %v712_v21 = vsel %vm255_vm3, %v704_v27, 0.0  ;;  %v1018_v27 = vmul.f32 %v1002_v62, %v2555_v32  ;;  %v2679_v32 = vsel %vm252_vm1, %v2370_v35, 0.0 }
 0x115   : > { %v728_v52 = vadd.f32 %v712_v21, %v663_v26  ;;  %v905_v37 = vadd.f32 1.4214138, %v889_v0  ;;  %v1003_v59 = vsub.f32 0.0, %v2606_v15 }
 0x116   : > { %v827_v60 = vadd.f32 1.0, %v811_v42  ;;  %v2683_v42 = vsel %vm252_vm1, %v635_v25, 0.0  ;;  %v549_v46 = vpop.f32.mrf.mxu3  ;;  %v1035_v49 = vmul.f32 1.442695, %v1018_v27  ;;  %v537_v25 = vpop.f32.mrf.mxu1 }
 0x117   : > { %v2637_v61 = vpop.eup %2069  ;;  %v2643_v57 = vadd.f32 %v2434_v7, %v728_v52  ;;  %v921_v34 = vmul.f32 %v2570_v54, %v905_v37  ;;  %v2709_v37 = vadd.f32 %v2358_v28, %v549_v46 }
 0x118   : > { %2071 = vrcp.f32 %v827_v60  ;;  %v583_v6 = vpop.f32.mrf.mxu2  ;;  %v858_v9 = vmul.f32 1.0614054, %v2637_v61  ;;  %v638_v60 = vsel %vm627_vm0, %v615_v3, %v616_v48 }
 0x119   : > { %v2653_v14 = vmul.f32 0.70710677, %v2643_v57  ;;  %v681_v41 = vrot.slane %v583_v6, 1  ;;  %v937_v63 = vadd.f32 -0.28449672, %v921_v34  ;;  %2073 = vpow2.f32 %v1033_v36 }
 0x11a   : > { %v874_v26 = vadd.f32 -1.4531521, %v858_v9  ;;  %v665_v36 = vadd.f32 %v638_v60, %v534_v4 }
 0x11b   : > { %v2664_v29 = vand.u32 2147483647, %v2653_v14  ;;  %v703_v13 = vsel %vm692_vm2, %v680_v11, %v681_v41  ;;  %v953_v53 = vmul.f32 %v2570_v54, %v937_v63  ;;  %vm1100_vm7 = vcmp.ge.f32.partialorder %v2653_v14, 0.0 }
 0x11c   : > { %v729_v20 = vadd.f32 %v703_v13, %v664_v23  ;;  %v890_v58 = vmul.f32 %v2637_v61, %v874_v26  ;;  %v1019_v13 = vmul.f32 %v1003_v59, %v2606_v15 }
 0x11d   : > { %v812_v11 = vmul.f32 0.3275911, %v2664_v29  ;;  %v969_v9 = vadd.f32 0.2548296, %v953_v53  ;;  %v1004_v31 = vsub.f32 0.0, %v2664_v29 }
 0x11e   : > { %v2686_v21 = vpop.eup %2071  ;;  %v2689_v22 = vadd.f32 %v2434_v7, %v729_v20  ;;  %v906_v35 = vadd.f32 1.4214138, %v890_v58  ;;  %v666_v58 = vadd.f32 %v650_v1, %v537_v25  ;;  %v1037_v53 = vmul.f32 1.442695, %v1019_v13 }
 0x11f   : > { %v828_v52 = vadd.f32 1.0, %v812_v11  ;;  %v859_v45 = vmul.f32 1.0614054, %v2686_v21  ;;  %v985_v26 = vmul.f32 %v2570_v54, %v969_v9  ;;  %v2074_v27 = vpop.eup %2073  ;;  %v761_v54 = vmul.f32 0.5, %v2472_v33 }
 0x120   : > { %v2703_v62 = vmul.f32 0.70710677, %v2689_v22  ;;  %v586_v47 = vpop.f32.mrf.mxu2  ;;  %v922_v0 = vmul.f32 %v2637_v61, %v906_v35  ;;  %v1020_v25 = vmul.f32 %v1004_v31, %v2664_v29 }
 0x121   : > { %2075 = vrcp.f32 %v828_v52  ;;  %v682_v6 = vrot.slane %v586_v47, 1  ;;  %v875_v48 = vadd.f32 -1.4531521, %v859_v45  ;;  %v1065_v63 = vmul.f32 %v2074_v27, %v985_v26 }
 0x122   : > { %v2712_v2 = vand.u32 2147483647, %v2703_v62  ;;  %v938_v3 = vadd.f32 -0.28449672, %v922_v0  ;;  %2077 = vpow2.f32 %v1035_v49  ;;  %v636_v26 = vsel %vm627_vm0, %v617_v10, %v618_v50  ;;  %v539_v10 = vpop.f32.mrf.mxu1 }
 0x123   : > { %v702_v23 = vsel %vm692_vm2, %v681_v41, %v682_v6  ;;  %v891_v4 = vmul.f32 %v2686_v21, %v875_v48  ;;  %v1081_v49 = vsub.f32 1.0, %v1065_v63  ;;  %v1039_v17 = vmul.f32 1.442695, %v1020_v25 }
 0x124   : > { %v813_v34 = vmul.f32 0.3275911, %v2712_v2  ;;  %v714_v28 = vsel %vm255_vm3, %v702_v23, 0.0  ;;  %v954_v20 = vmul.f32 %v2637_v61, %v938_v3  ;;  %v762_v3 = vmul.f32 0.5, %v2532_v12 }
 0x125   : > { %v730_v11 = vadd.f32 %v714_v28, %v665_v36  ;;  %v907_v52 = vadd.f32 1.4214138, %v891_v4  ;;  %v1113_v1 = vsub.f32 0.0, %v1081_v49  ;;  %v1005_v31 = vsub.f32 0.0, %v2712_v2 }
 0x126   : > { %v829_v41 = vadd.f32 1.0, %v813_v34  ;;  %v970_v35 = vadd.f32 0.2548296, %v954_v20  ;;  %vm1101_vm8 = vcmp.ge.f32.partialorder %v2703_v62, 0.0 }
 0x127   : > { %v2725_v46 = vpop.eup %2075  ;;  %v2728_v15 = vadd.f32 %v2434_v7, %v730_v11  ;;  %v923_v9 = vmul.f32 %v2686_v21, %v907_v52  ;;  %v1129_v12 = vsel %vm1097_vm4, %v1081_v49, %v1113_v1  ;;  %v667_v52 = vadd.f32 %v636_v26, %v539_v10 }
 0x128   : > { %2079 = vrcp.f32 %v829_v41  ;;  %v588_v45 = vpop.f32.mrf.mxu2  ;;  %v986_v59 = vmul.f32 %v2637_v61, %v970_v35  ;;  %v860_v60 = vmul.f32 1.0614054, %v2725_v46  ;;  %v2078_v47 = vpop.eup %2077  ;;  %v1145_v11 = vadd.f32 1.0, %v1129_v12 }
 0x129   : > { %v2734_v33 = vmul.f32 0.70710677, %v2728_v15  ;;  %v683_v0 = vrot.slane %v588_v45, 1  ;;  %v939_v27 = vadd.f32 -0.28449672, %v923_v9  ;;  %2081 = vpow2.f32 %v1037_v53 }
 0x12a   : > { %v1066_v48 = vmul.f32 %v2078_v47, %v986_v59  ;;  %v876_v36 = vadd.f32 -1.4531521, %v860_v60 }
 0x12b   : > { %v2740_v23 = vand.u32 2147483647, %v2734_v33  ;;  %v701_v61 = vsel %vm692_vm2, %v682_v6, %v683_v0  ;;  %v955_v24 = vmul.f32 %v2686_v21, %v939_v27  ;;  %vm1102_vm9 = vcmp.ge.f32.partialorder %v2734_v33, 0.0 }
 0x12c   : > { %v731_v13 = vadd.f32 %v701_v61, %v666_v58  ;;  %v1082_v29 = vsub.f32 1.0, %v1066_v48  ;;  %v892_v34 = vmul.f32 %v2725_v46, %v876_v36  ;;  %v1161_v48 = vmul.f32 %v1145_v11, %v761_v54 }
 0x12d   : > { %v814_v28 = vmul.f32 0.3275911, %v2740_v23  ;;  %v971_v63 = vadd.f32 0.2548296, %v955_v24  ;;  %v1021_v61 = vmul.f32 %v1005_v31, %v2712_v2  ;;  %v1006_v54 = vsub.f32 0.0, %v2740_v23 }
 0x12e   : > { %v2756_v6 = vpop.eup %2079  ;;  %v2759_v50 = vadd.f32 %v2434_v7, %v731_v13  ;;  %v1114_v20 = vsub.f32 0.0, %v1082_v29  ;;  %v908_v58 = vadd.f32 1.4214138, %v892_v34 }
 0x12f   : > { %v830_v40 = vadd.f32 1.0, %v814_v28  ;;  %v861_v4 = vmul.f32 1.0614054, %v2756_v6  ;;  %v987_v47 = vmul.f32 %v2686_v21, %v971_v63  ;;  %v2082_v9 = vpop.eup %2081  ;;  %v668_v28 = vadd.f32 %v2683_v42, %v2482_v44 }
 0x130   : > { %v2764_v19 = vmul.f32 0.70710677, %v2759_v50  ;;  %v591_v41 = vpop.f32.mrf.mxu2  ;;  %v1130_v35 = vsel %vm1098_vm5, %v1082_v29, %v1114_v20  ;;  %v924_v49 = vmul.f32 %v2725_v46, %v908_v58  ;;  %v1041_v58 = vmul.f32 1.442695, %v1021_v61 }
 0x131   : > { %2083 = vrcp.f32 %v830_v40  ;;  %v684_v53 = vrot.slane %v591_v41, 1  ;;  %v1146_v45 = vadd.f32 1.0, %v1130_v35  ;;  %v877_v1 = vadd.f32 -1.4531521, %v861_v4 }
 0x132   : > { %v2768_v59 = vand.u32 2147483647, %v2764_v19  ;;  %v940_v60 = vadd.f32 -0.28449672, %v924_v49  ;;  %2085 = vpow2.f32 %v1039_v17  ;;  %v1067_v21 = vmul.f32 %v2082_v9, %v987_v47 }
 0x133   : > { %v700_v25 = vsel %vm692_vm2, %v683_v0, %v684_v53  ;;  %v1162_v36 = vmul.f32 %v1146_v45, %v762_v3  ;;  %v893_v34 = vmul.f32 %v2756_v6, %v877_v1  ;;  %v763_v17 = vmul.f32 0.5, %v2573_v55 }
 0x134   : > { %v815_v26 = vmul.f32 0.3275911, %v2768_v59  ;;  %v716_v27 = vsel %vm255_vm3, %v700_v25, 0.0  ;;  %v956_v13 = vmul.f32 %v2725_v46, %v940_v60  ;;  %v1083_v10 = vsub.f32 1.0, %v1067_v21 }
 0x135   : > { %v732_v29 = vadd.f32 %v716_v27, %v667_v52  ;;  %v1177_v12 = vpack.c.bf16 %v1162_v36, %v1161_v48  ;;  %v909_v20 = vadd.f32 1.4214138, %v893_v34  ;;  %v1022_v55 = vmul.f32 %v1006_v54, %v2740_v23 }
 0x136   : > { %v831_v0 = vadd.f32 1.0, %v815_v26  ;;  %v972_v3 = vadd.f32 0.2548296, %v956_v13  ;;  %v1115_v31 = vsub.f32 0.0, %v1083_v10  ;;  %v764_v45 = vmul.f32 0.5, %v2643_v57  ;;  %v552_v26 = vpop.f32.mrf.mxu3 }
 0x137   : > { %v2782_v2 = vpop.eup %2083  ;;  %v2785_v24 = vadd.f32 %v2434_v7, %v732_v29  ;;  %1353 = vmatmul.bf16.vlgmr.msrb.gmra.mxu3 %v1177_v12  ;;  %1402 = vmatmul.bf16.vlgmr.msrb.gmra.mxu0 %v1177_v12  ;;  %v925_v41 = vmul.f32 %v2756_v6, %v909_v20  ;;  %v1043_v36 = vmul.f32 1.442695, %v1022_v55  ;;  %v1007_v21 = vsub.f32 0.0, %v2768_v59 }
 0x138   : > { %2087 = vrcp.f32 %v831_v0  ;;  %1451 = vmatmul.bf16.vlgmr.msrb.gmra.mxu1 %v1177_v12  ;;  %v593_v40 = vpop.f32.mrf.mxu2  ;;  %v988_v44 = vmul.f32 %v2725_v46, %v972_v3  ;;  %v862_v42 = vmul.f32 1.0614054, %v2782_v2  ;;  %v2086_v11 = vpop.eup %2085  ;;  %v1131_v9 = vsel %vm1099_vm6, %v1083_v10, %v1115_v31 }
 0x139   : > { %v2791_v63 = vmul.f32 0.70710677, %v2785_v24  ;;  %v685_v4 = vrot.slane %v593_v40, 1  ;;  %v941_v60 = vadd.f32 -0.28449672, %v925_v41  ;;  %2089 = vpow2.f32 %v1041_v58 }
 0x13a   : > { %v1068_v35 = vmul.f32 %v2086_v11, %v988_v44  ;;  %v878_v49 = vadd.f32 -1.4531521, %v862_v42  ;;  %v1147_v13 = vadd.f32 1.0, %v1131_v9  ;;  %v1023_v55 = vmul.f32 %v1007_v21, %v2768_v59 }
 0x13b   : > { %v800_v52 = vand.u32 2147483647, %v2791_v63  ;;  %v699_v46 = vsel %vm692_vm2, %v684_v53, %v685_v4  ;;  %v957_v5 = vmul.f32 %v2756_v6, %v941_v60  ;;  %v2828_v9 = vadd.f32 %v2679_v32, %v552_v26 }
 0x13c   : > { %v733_v47 = vadd.f32 %v699_v46, %v668_v28  ;;  %v1084_v1 = vsub.f32 1.0, %v1068_v35  ;;  %v894_v25 = vmul.f32 %v2782_v2, %v878_v49  ;;  %v1163_v31 = vmul.f32 %v1147_v13, %v763_v17 }
 0x13d   : > { %v816_v48 = vmul.f32 0.3275911, %v800_v52  ;;  %v973_v29 = vadd.f32 0.2548296, %v957_v5  ;;  %v1008_v0 = vsub.f32 0.0, %v800_v52  ;;  %v765_v21 = vmul.f32 0.5, %v2689_v22 }
 0x13e   : > { %v2803_v23 = vpop.eup %2087  ;;  %v2806_v61 = vadd.f32 %v2434_v7, %v733_v47  ;;  %v1116_v53 = vsub.f32 0.0, %v1084_v1  ;;  %v910_v57 = vadd.f32 1.4214138, %v894_v25  ;;  %v2835_v25 = vsel %vm252_vm1, %v2382_v43, 0.0  ;;  %v554_v26 = vpop.f32.mrf.mxu3 }
 0x13f   : > { %v832_v27 = vadd.f32 1.0, %v816_v48  ;;  %v863_v12 = vmul.f32 1.0614054, %v2803_v23  ;;  %v989_v40 = vmul.f32 %v2756_v6, %v973_v29  ;;  %v2090_v42 = vpop.eup %2089  ;;  %v1024_v17 = vmul.f32 %v1008_v0, %v800_v52 }
 0x140   : > { %v2811_v14 = vmul.f32 0.70710677, %v2806_v61  ;;  %v596_v34 = vpop.f32.mrf.mxu2  ;;  %v1132_v28 = vsel %vm1100_vm7, %v1084_v1, %v1116_v53  ;;  %v926_v54 = vmul.f32 %v2782_v2, %v910_v57  ;;  %vm1103_vm10 = vcmp.ge.f32.partialorder %v2764_v19, 0.0 }
 0x141   : > { %2091 = vrcp.f32 %v832_v27  ;;  %v686_v3 = vrot.slane %v596_v34, 1  ;;  %v1148_v10 = vadd.f32 1.0, %v1132_v28  ;;  %v879_v44 = vadd.f32 -1.4531521, %v863_v12 }
 0x142   : > { %v2815_v20 = vand.u32 2147483647, %v2811_v14  ;;  %v942_v58 = vadd.f32 -0.28449672, %v926_v54  ;;  %2093 = vpow2.f32 %v1043_v36  ;;  %v1069_v47 = vmul.f32 %v2090_v42, %v989_v40 }
 0x143   : > { %v698_v11 = vsel %vm692_vm2, %v685_v4, %v686_v3  ;;  %v1164_v41 = vmul.f32 %v1148_v10, %v764_v45  ;;  %v895_v1 = vmul.f32 %v2803_v23, %v879_v44  ;;  %v1045_v36 = vmul.f32 1.442695, %v1023_v55 }
 0x144   : > { %v817_v35 = vmul.f32 0.3275911, %v2815_v20  ;;  %v718_v49 = vsel %vm255_vm3, %v698_v11, 0.0  ;;  %v958_v46 = vmul.f32 %v2782_v2, %v942_v58  ;;  %v1047_v12 = vmul.f32 1.442695, %v1024_v17 }
 0x145   : > { %v734_v60 = vadd.f32 %v718_v49, %v2671_v16  ;;  %v1178_v6 = vpack.c.bf16 %v1164_v41, %v1163_v31  ;;  %v1085_v16 = vsub.f32 1.0, %v1069_v47  ;;  %v911_v5 = vadd.f32 1.4214138, %v895_v1 }
 0x146   : > { %v833_v4 = vadd.f32 1.0, %v817_v35  ;;  %v974_v45 = vadd.f32 0.2548296, %v958_v46  ;;  %v1009_v49 = vsub.f32 0.0, %v2815_v20  ;;  %v766_v1 = vmul.f32 0.5, %v2728_v15 }
 0x147   : > { %v2830_v59 = vpop.eup %2091  ;;  %v2838_v48 = vadd.f32 %v2434_v7, %v734_v60  ;;  %1358 = vmatmul.bf16.gmra.mxu3 %v1178_v6  ;;  %1407 = vmatmul.bf16.gmra.mxu0 %v1178_v6  ;;  %v1117_v13 = vsub.f32 0.0, %v1085_v16  ;;  %v927_v29 = vmul.f32 %v2803_v23, %v911_v5  ;;  %vm1104_vm11 = vcmp.ge.f32.partialorder %v2791_v63, 0.0 }
 0x148   : > { %2095 = vrcp.f32 %v833_v4  ;;  %1456 = vmatmul.bf16.gmra.mxu1 %v1178_v6  ;;  %v598_v32 = vpop.f32.mrf.mxu2  ;;  %v990_v52 = vmul.f32 %v2782_v2, %v974_v45  ;;  %v864_v53 = vmul.f32 1.0614054, %v2830_v59  ;;  %v2094_v57 = vpop.eup %2093  ;;  %vm1105_vm12 = vcmp.ge.f32.partialorder %v2811_v14, 0.0 }
 0x149   : > { %v2843_v43 = vmul.f32 0.70710677, %v2838_v48  ;;  %v687_v27 = vrot.slane %v598_v32, 1  ;;  %v943_v0 = vadd.f32 -0.28449672, %v927_v29  ;;  %v1133_v40 = vsel %vm1101_vm8, %v1085_v16, %v1117_v13  ;;  %v557_v32 = vpop.f32.mrf.mxu3 }
 0x14a   : > { %v1070_v34 = vmul.f32 %v2094_v57, %v990_v52  ;;  %v880_v28 = vadd.f32 -1.4531521, %v864_v53  ;;  %2097 = vpow2.f32 %v1045_v36 }
 0x14b   : > { %v802_v54 = vand.u32 2147483647, %v2843_v43  ;;  %v697_v2 = vsel %vm692_vm2, %v686_v3, %v687_v27  ;;  %v959_v22 = vmul.f32 %v2803_v23, %v943_v0  ;;  %2099 = vpow2.f32 %v1047_v12 }
 0x14c   : > { %v735_v10 = vadd.f32 %v697_v2, %v2673_v38  ;;  %v1086_v58 = vsub.f32 1.0, %v1070_v34  ;;  %v896_v44 = vmul.f32 %v2830_v59, %v880_v28  ;;  %v1149_v38 = vadd.f32 1.0, %v1133_v40 }
 0x14d   : > { %v818_v42 = vmul.f32 0.3275911, %v802_v54  ;;  %v975_v55 = vadd.f32 0.2548296, %v959_v22  ;;  %v1010_v52 = vsub.f32 0.0, %v802_v54  ;;  %v1025_v12 = vmul.f32 %v1009_v49, %v2815_v20 }
 0x14e   : > { %v2855_v11 = vpop.eup %2095  ;;  %v2858_v3 = vadd.f32 %v2434_v7, %v735_v10  ;;  %v1118_v62 = vsub.f32 0.0, %v1086_v58  ;;  %v912_v31 = vadd.f32 1.4214138, %v896_v44  ;;  %v1165_v57 = vmul.f32 %v1149_v38, %v765_v21 }
 0x14f   : > { %v834_v41 = vadd.f32 1.0, %v818_v42  ;;  %v865_v35 = vmul.f32 1.0614054, %v2855_v11  ;;  %v991_v16 = vmul.f32 %v2803_v23, %v975_v55  ;;  %v2884_v21 = vadd.f32 %v2835_v25, %v557_v32 }
 0x150   : > { %v2863_v46 = vmul.f32 0.70710677, %v2858_v3  ;;  %v601_v33 = vpop.f32.mrf.mxu2  ;;  %v1134_v60 = vsel %vm1102_vm9, %v1086_v58, %v1118_v62  ;;  %v928_v6 = vmul.f32 %v2830_v59, %v912_v31  ;;  %v2098_v36 = vpop.eup %2097  ;;  %v1026_v44 = vmul.f32 %v1010_v52, %v802_v54 }
 0x151   : > { %2101 = vrcp.f32 %v834_v41  ;;  %v688_v47 = vrot.slane %v601_v33, 1  ;;  %v1150_v17 = vadd.f32 1.0, %v1134_v60  ;;  %v881_v5 = vadd.f32 -1.4531521, %v865_v35  ;;  %v2100_v29 = vpop.eup %2099 }
 0x152   : > { %v2868_v4 = vand.u32 2147483647, %v2863_v46  ;;  %v944_v45 = vadd.f32 -0.28449672, %v928_v6  ;;  %v1071_v0 = vmul.f32 %v2098_v36, %v991_v16  ;;  %v1049_v62 = vmul.f32 1.442695, %v1025_v12 }
 0x153   : > { %v696_v53 = vsel %vm692_vm2, %v687_v27, %v688_v47  ;;  %v1166_v13 = vmul.f32 %v1150_v17, %v766_v1  ;;  %v897_v10 = vmul.f32 %v2855_v11, %v881_v5  ;;  %v2881_v27 = vadd.f32 %v2376_v39, %v554_v26 }
 0x154   : > { %v819_v15 = vmul.f32 0.3275911, %v2868_v4  ;;  %v720_v34 = vsel %vm255_vm3, %v696_v53, 0.0  ;;  %v960_v28 = vmul.f32 %v2830_v59, %v944_v45  ;;  %v767_v55 = vmul.f32 0.5, %v2759_v50 }
 0x155   : > { %v736_v23 = vadd.f32 %v720_v34, %v2709_v37  ;;  %v1179_v2 = vpack.c.bf16 %v1166_v13, %v1165_v57  ;;  %v1087_v37 = vsub.f32 1.0, %v1071_v0  ;;  %v913_v22 = vadd.f32 1.4214138, %v897_v10  ;;  %v559_v34 = vpop.f32.mrf.mxu3 }
 0x156   : > { %v835_v20 = vadd.f32 1.0, %v819_v15  ;;  %v976_v58 = vadd.f32 0.2548296, %v960_v28  ;;  %v1051_v33 = vmul.f32 1.442695, %v1026_v44  ;;  %v1011_v36 = vsub.f32 0.0, %v2868_v4 }
 0x157   : > { %v2886_v40 = vpop.eup %2101  ;;  %v2889_v42 = vadd.f32 %v2434_v7, %v736_v23  ;;  %1363 = vmatmul.bf16.gmra.mxu3 %v1179_v2  ;;  %1412 = vmatmul.bf16.gmra.mxu0 %v1179_v2  ;;  %v1119_v54 = vsub.f32 0.0, %v1087_v37  ;;  %v929_v38 = vmul.f32 %v2855_v11, %v913_v22  ;;  %v768_v23 = vmul.f32 0.5, %v2785_v24 }
 0x158   : > { %2103 = vrcp.f32 %v835_v20  ;;  %1461 = vmatmul.bf16.gmra.mxu1 %v1179_v2  ;;  %v603_v39 = vpop.f32.mrf.mxu2  ;;  %v992_v26 = vmul.f32 %v2830_v59, %v976_v58  ;;  %v866_v25 = vmul.f32 1.0614054, %v2886_v40  ;;  %vm1106_vm13 = vcmp.ge.f32.partialorder %v2843_v43, 0.0 }
 0x159   : > { %v2894_v31 = vmul.f32 0.70710677, %v2889_v42  ;;  %v689_v41 = vrot.slane %v603_v39, 1  ;;  %v945_v6 = vadd.f32 -0.28449672, %v929_v38  ;;  %v1135_v45 = vsel %vm1103_vm10, %v1087_v37, %v1119_v54 }
 0x15a   : > { %v1072_v35 = vmul.f32 %v2100_v29, %v992_v26  ;;  %v882_v49 = vadd.f32 -1.4531521, %v866_v25  ;;  %2105 = vpow2.f32 %v1049_v62  ;;  %v1151_v53 = vadd.f32 1.0, %v1135_v45 }
 0x15b   : > { %v2900_v60 = vand.u32 2147483647, %v2894_v31  ;;  %v695_v59 = vsel %vm692_vm2, %v688_v47, %v689_v41  ;;  %v961_v19 = vmul.f32 %v2855_v11, %v945_v6  ;;  %2107 = vpow2.f32 %v1051_v33 }
 0x15c   : > { %v737_v1 = vadd.f32 %v695_v59, %v2828_v9  ;;  %v1088_v17 = vsub.f32 1.0, %v1072_v35  ;;  %v898_v16 = vmul.f32 %v2886_v40, %v882_v49  ;;  %v1027_v37 = vmul.f32 %v1011_v36, %v2868_v4 }
 0x15d   : > { %v820_v50 = vmul.f32 0.3275911, %v2900_v60  ;;  %v977_v57 = vadd.f32 0.2548296, %v961_v19  ;;  %v1167_v62 = vmul.f32 %v1151_v53, %v767_v55  ;;  %v675_v26 = vadd.f32 %v2397_v51, %v559_v34 }
 0x15e   : > { %v2909_v5 = vpop.eup %2103  ;;  %v2913_v47 = vadd.f32 %v2434_v7, %v737_v1  ;;  %v1120_v32 = vsub.f32 0.0, %v1088_v17  ;;  %v914_v9 = vadd.f32 1.4214138, %v898_v16  ;;  %v1053_v59 = vmul.f32 1.442695, %v1027_v37 }
 0x15f   : > { %v836_v52 = vadd.f32 1.0, %v820_v50  ;;  %v867_v13 = vmul.f32 1.0614054, %v2909_v5  ;;  %v993_v20 = vmul.f32 %v2855_v11, %v977_v57  ;;  %v770_v45 = vmul.f32 0.5, %v2838_v48 }
 0x160   : > { %v2917_v29 = vmul.f32 0.70710677, %v2913_v47  ;;  %v606_v63 = vpop.f32.mrf.mxu2  ;;  %v1136_v12 = vsel %vm1104_vm11, %v1088_v17, %v1120_v32  ;;  %v930_v15 = vmul.f32 %v2886_v40, %v914_v9  ;;  %v2106_v44 = vpop.eup %2105  ;;  %v1012_v50 = vsub.f32 0.0, %v2900_v60 }
 0x161   : > { %2109 = vrcp.f32 %v836_v52  ;;  %v690_v28 = vrot.slane %v606_v63, 1  ;;  %v1152_v2 = vadd.f32 1.0, %v1136_v12  ;;  %v883_v58 = vadd.f32 -1.4531521, %v867_v13  ;;  %v2108_v49 = vpop.eup %2107 }
 0x162   : > { %v2922_v0 = vand.u32 2147483647, %v2917_v29  ;;  %v946_v10 = vadd.f32 -0.28449672, %v930_v15  ;;  %v1073_v35 = vmul.f32 %v2106_v44, %v993_v20  ;;  %v1028_v15 = vmul.f32 %v1012_v50, %v2900_v60 }
 0x163   : > { %v694_v22 = vsel %vm692_vm2, %v689_v41, %v690_v28  ;;  %v1168_v39 = vmul.f32 %v1152_v2, %v768_v23  ;;  %v899_v4 = vmul.f32 %v2909_v5, %v883_v58  ;;  %v769_v41 = vmul.f32 0.5, %v2806_v61  ;;  %v2131_v2 = vld [vmem:[%s3198_s2] ss:$0 sm:$0xff] }
 0x164   : > { %v821_v24 = vmul.f32 0.3275911, %v2922_v0  ;;  %v722_v25 = vsel %vm255_vm3, %v694_v22, 0.0  ;;  %v962_v54 = vmul.f32 %v2886_v40, %v946_v10  ;;  %vm1107_vm14 = vcmp.ge.f32.partialorder %v2863_v46, 0.0 }
 0x165   : > { %v738_v11 = vadd.f32 %v722_v25, %v2881_v27  ;;  %v1180_v38 = vpack.c.bf16 %v1168_v39, %v1167_v62  ;;  %v1089_v27 = vsub.f32 1.0, %v1073_v35  ;;  %v915_v1 = vadd.f32 1.4214138, %v899_v4 }
 0x166   : > { %v837_v33 = vadd.f32 1.0, %v821_v24  ;;  %v978_v55 = vadd.f32 0.2548296, %v962_v54  ;;  %v1055_v24 = vmul.f32 1.442695, %v1028_v15  ;;  %vm1108_vm15 = vcmp.ge.f32.partialorder %v2894_v31, 0.0 }
 0x167   : > { %v2937_v51 = vpop.eup %2109  ;;  %v2940_v6 = vadd.f32 %v2434_v7, %v738_v11  ;;  %1368 = vmatmul.bf16.gmra.mxu3 %v1180_v38  ;;  %1417 = vmatmul.bf16.gmra.mxu0 %v1180_v38  ;;  %v1121_v36 = vsub.f32 0.0, %v1089_v27  ;;  %v931_v52 = vmul.f32 %v2909_v5, %v915_v1  ;;  %vm1109_vm4 = vcmp.ge.f32.partialorder %v2917_v29, 0.0 }
 0x168   : > { %2111 = vrcp.f32 %v837_v33  ;;  %1466 = vmatmul.bf16.gmra.mxu1 %v1180_v38  ;;  %v608_v17 = vpop.f32.mrf.mxu2  ;;  %v994_v61 = vmul.f32 %v2886_v40, %v978_v55  ;;  %v868_v16 = vmul.f32 1.0614054, %v2937_v51 }
 0x169   : > { %v2947_v19 = vmul.f32 0.70710677, %v2940_v6  ;;  %v691_v7 = vrot.slane %v608_v17, 1  ;;  %2113 = vpow2.f32 %v1053_v59  ;;  %v1137_v12 = vsel %vm1105_vm12, %v1089_v27, %v1121_v36 }
 0x16a   : > { %v1074_v32 = vmul.f32 %v2108_v49, %v994_v61  ;;  %v884_v9 = vadd.f32 -1.4531521, %v868_v16  ;;  %v947_v14 = vadd.f32 -0.28449672, %v931_v52  ;;  %v1153_v60 = vadd.f32 1.0, %v1137_v12 }
 0x16b   : > { %v2952_v48 = vand.u32 2147483647, %v2947_v19  ;;  %v693_v40 = vsel %vm692_vm2, %v690_v28, %v691_v7  ;;  %v708_v53 = vsel %vm692_vm2, %v691_v7, %v676_v8  ;;  %v1013_v8 = vsub.f32 0.0, %v2922_v0 }
 0x16c   : > { %v724_v57 = vsel %vm255_vm3, %v708_v53, 0.0  ;;  %v739_v13 = vadd.f32 %v693_v40, %v2884_v21  ;;  %v1090_v63 = vsub.f32 1.0, %v1074_v32  ;;  %v900_v28 = vmul.f32 %v2937_v51, %v884_v9 }
 0x16d   : > { %v822_v34 = vmul.f32 0.3275911, %v2952_v48  ;;  %v740_v23 = vadd.f32 %v724_v57, %v675_v26  ;;  %v963_v62 = vmul.f32 %v2909_v5, %v947_v14  ;;  %v1029_v43 = vmul.f32 %v1013_v8, %v2922_v0 }
 0x16e   : > { %v2968_v56 = vpop.eup %2111  ;;  %v2974_v21 = vadd.f32 %v2131_v2, %v739_v13  ;;  %v1122_v10 = vsub.f32 0.0, %v1090_v63  ;;  %v916_v44 = vadd.f32 1.4214138, %v900_v28  ;;  %v1169_v33 = vmul.f32 %v1153_v60, %v769_v41 }
 0x16f   : > { %v838_v20 = vadd.f32 1.0, %v822_v34  ;;  %v2976_v58 = vadd.f32 %v2131_v2, %v740_v23  ;;  %v869_v39 = vmul.f32 1.0614054, %v2968_v56  ;;  %v2114_v26 = vpop.eup %2113  ;;  %v979_v35 = vadd.f32 0.2548296, %v963_v62 }
 0x170   : > { %v2979_v37 = vmul.f32 0.70710677, %v2974_v21  ;;  %v1138_v22 = vsel %vm1106_vm13, %v1090_v63, %v1122_v10  ;;  %v932_v38 = vmul.f32 %v2937_v51, %v916_v44  ;;  %v1057_v0 = vmul.f32 1.442695, %v1029_v43 }
 0x171   : > { %2115 = vrcp.f32 %v838_v20  ;;  %v2986_v25 = vmul.f32 0.70710677, %v2976_v58  ;;  %v1154_v54 = vadd.f32 1.0, %v1138_v22  ;;  %v885_v4 = vadd.f32 -1.4531521, %v869_v39 }
 0x172   : > { %v2989_v11 = vand.u32 2147483647, %v2979_v37  ;;  %v948_v27 = vadd.f32 -0.28449672, %v932_v38  ;;  %v995_v1 = vmul.f32 %v2909_v5, %v979_v35  ;;  %2117 = vpow2.f32 %v1055_v24 }
 0x173   : > { %v808_v49 = vand.u32 2147483647, %v2986_v25  ;;  %v1170_v55 = vmul.f32 %v1154_v54, %v770_v45  ;;  %v901_v16 = vmul.f32 %v2968_v56, %v885_v4  ;;  %v1014_v45 = vsub.f32 0.0, %v2952_v48 }
 0x174   : > { %v823_v59 = vmul.f32 0.3275911, %v2989_v11  ;;  %v964_v7 = vmul.f32 %v2937_v51, %v948_v27  ;;  %v1075_v36 = vmul.f32 %v2114_v26, %v995_v1  ;;  %v771_v28 = vmul.f32 0.5, %v2858_v3 }
 0x175   : > { %v824_v17 = vmul.f32 0.3275911, %v808_v49  ;;  %v1181_v61 = vpack.c.bf16 %v1170_v55, %v1169_v33  ;;  %v917_v41 = vadd.f32 1.4214138, %v901_v16  ;;  %v1030_v34 = vmul.f32 %v1014_v45, %v2952_v48 }
 0x176   : > { %v839_v50 = vadd.f32 1.0, %v823_v59  ;;  %v980_v5 = vadd.f32 0.2548296, %v964_v7  ;;  %v1091_v52 = vsub.f32 1.0, %v1075_v36  ;;  %v1016_v20 = vsub.f32 0.0, %v808_v49 }
 0x177   : > { %v2998_v32 = vpop.eup %2115  ;;  %v840_v9 = vadd.f32 1.0, %v824_v17  ;;  %1373 = vmatmul.bf16.gmra.mxu3 %v1181_v61  ;;  %1422 = vmatmul.bf16.gmra.mxu0 %v1181_v61  ;;  %v933_v53 = vmul.f32 %v2968_v56, %v917_v41  ;;  %v772_v60 = vmul.f32 0.5, %v2889_v42  ;;  %v1059_v26 = vmul.f32 1.442695, %v1030_v34 }
 0x178   : > { %2119 = vrcp.f32 %v839_v50  ;;  %1471 = vmatmul.bf16.gmra.mxu1 %v1181_v61  ;;  %v870_v40 = vmul.f32 1.0614054, %v2998_v32  ;;  %v996_v57 = vmul.f32 %v2937_v51, %v980_v5  ;;  %v1123_v13 = vsub.f32 0.0, %v1091_v52  ;;  %v2118_v63 = vpop.eup %2117 }
 0x179   : > { %2121 = vrcp.f32 %v840_v9  ;;  %v949_v15 = vadd.f32 -0.28449672, %v933_v53  ;;  %v1015_v51 = vsub.f32 0.0, %v2989_v11  ;;  %v1032_v42 = vmul.f32 %v1016_v20, %v808_v49 }
 0x17a   : > { %v886_v12 = vadd.f32 -1.4531521, %v870_v40  ;;  %2123 = vpow2.f32 %v1057_v0  ;;  %v1076_v23 = vmul.f32 %v2118_v63, %v996_v57  ;;  %v1139_v8 = vsel %vm1107_vm14, %v1091_v52, %v1123_v13 }
 0x17b   : > { %v965_v10 = vmul.f32 %v2968_v56, %v949_v15  ;;  %v1155_v24 = vadd.f32 1.0, %v1139_v8  ;;  %v1031_v43 = vmul.f32 %v1015_v51, %v2989_v11  ;;  %2125 = vpow2.f32 %v1059_v26 }
 0x17c   : > { %v902_v2 = vmul.f32 %v2998_v32, %v886_v12  ;;  %v1092_v44 = vsub.f32 1.0, %v1076_v23  ;;  %v1063_v9 = vmul.f32 1.442695, %v1032_v42  ;;  %vm1110_vm5 = vcmp.ge.f32.partialorder %v2947_v19, 0.0 }
 0x17d   : > { %v981_v48 = vadd.f32 0.2548296, %v965_v10  ;;  %v1171_v61 = vmul.f32 %v1155_v24, %v771_v28  ;;  %vm1111_vm6 = vcmp.ge.f32.partialorder %v2979_v37, 0.0  ;;  %vm1112_vm7 = vcmp.ge.f32.partialorder %v2986_v25, 0.0 }
 0x17e   : > { %v2120_v14 = vpop.eup %2119  ;;  %v918_v62 = vadd.f32 1.4214138, %v902_v2  ;;  %v1124_v46 = vsub.f32 0.0, %v1092_v44 }
 0x17f   : > { %v2122_v22 = vpop.eup %2121  ;;  %v871_v39 = vmul.f32 1.0614054, %v2120_v14  ;;  %v997_v38 = vmul.f32 %v2968_v56, %v981_v48  ;;  %v1061_v56 = vmul.f32 1.442695, %v1031_v43  ;;  %v774_v48 = vmul.f32 0.5, %v2940_v6 }
 0x180   : > { %v872_v3 = vmul.f32 1.0614054, %v2122_v22  ;;  %v934_v54 = vmul.f32 %v2998_v32, %v918_v62  ;;  %v2124_v4 = vpop.eup %2123  ;;  %v1140_v33 = vsel %vm1108_vm15, %v1092_v44, %v1124_v46  ;;  %v773_v62 = vmul.f32 0.5, %v2913_v47 }
 0x181   : > { %v887_v35 = vadd.f32 -1.4531521, %v871_v39  ;;  %v1156_v59 = vadd.f32 1.0, %v1140_v33  ;;  %v1077_v1 = vmul.f32 %v2124_v4, %v997_v38  ;;  %v2126_v53 = vpop.eup %2125  ;;  %2127 = vpow2.f32 %v1061_v56 }
 0x182   : > { %v888_v55 = vadd.f32 -1.4531521, %v872_v3  ;;  %v950_v27 = vadd.f32 -0.28449672, %v934_v54  ;;  %2129 = vpow2.f32 %v1063_v9  ;;  %v775_v38 = vmul.f32 0.5, %v2974_v21 }
 0x183   : > { %v903_v17 = vmul.f32 %v2120_v14, %v887_v35  ;;  %v1172_v50 = vmul.f32 %v1156_v59, %v772_v60  ;;  %v1093_v7 = vsub.f32 1.0, %v1077_v1  ;;  %v776_v6 = vmul.f32 0.5, %v2976_v58 }
 0x184   : > { %v904_v16 = vmul.f32 %v2122_v22, %v888_v55  ;;  %v966_v31 = vmul.f32 %v2998_v32, %v950_v27 }
 0x185   : > { %v919_v36 = vadd.f32 1.4214138, %v903_v17  ;;  %v1182_v41 = vpack.c.bf16 %v1172_v50, %v1171_v61  ;;  %v1125_v52 = vsub.f32 0.0, %v1093_v7 }
 0x186   : > { %v920_v0 = vadd.f32 1.4214138, %v904_v16  ;;  %v982_v11 = vadd.f32 0.2548296, %v966_v31 }
 0x187   : > { %v935_v49 = vmul.f32 %v2120_v14, %v919_v36  ;;  %1378 = vmatmul.bf16.gmra.mxu3 %v1182_v41  ;;  %1427 = vmatmul.bf16.gmra.mxu0 %v1182_v41  ;;  %v1141_v34 = vsel %vm1109_vm4, %v1093_v7, %v1125_v52  ;;  %v2128_v10 = vpop.eup %2127 }
 0x188   : > { %v936_v45 = vmul.f32 %v2122_v22, %v920_v0  ;;  %v998_v5 = vmul.f32 %v2998_v32, %v982_v11  ;;  %1476 = vmatmul.bf16.gmra.mxu1 %v1182_v41  ;;  %v1157_v32 = vadd.f32 1.0, %v1141_v34  ;;  %v2130_v20 = vpop.eup %2129  ;;  %v234_v0 = vld [vmem:[%s2288_s22 + $0x4] sm:$0xff]   ;;  %v3049_v41 = vld [vmem:[%s3200_s4] ss:$0 sm:$0xff] }
 0x189   : > { %v951_v40 = vadd.f32 -0.28449672, %v935_v49 }
 0x18a   : > { %v952_v57 = vadd.f32 -0.28449672, %v936_v45  ;;  %v1078_v13 = vmul.f32 %v2126_v53, %v998_v5  ;;  %v1173_v46 = vmul.f32 %v1157_v32, %v773_v62  ;;  %v1641_v45 = vunpack.c.l.bf16 %v234_v0 }
 0x18b   : > { %v967_v63 = vmul.f32 %v2120_v14, %v951_v40 }
 0x18c   : > { %v968_v12 = vmul.f32 %v2122_v22, %v952_v57  ;;  %v1094_v15 = vsub.f32 1.0, %v1078_v13 }
 0x18d   : > { %v983_v23 = vadd.f32 0.2548296, %v967_v63 }
 0x18e   : > { %v984_v28 = vadd.f32 0.2548296, %v968_v12  ;;  %v1126_v8 = vsub.f32 0.0, %v1094_v15 }
 0x18f   : > { %v999_v2 = vmul.f32 %v2120_v14, %v983_v23 }
 0x190   : > { %v1000_v51 = vmul.f32 %v2122_v22, %v984_v28  ;;  %v1142_v60 = vsel %vm1110_vm5, %v1094_v15, %v1126_v8  ;;  %v1642_v8 = vunpack.c.h.bf16 %v234_v0 }
 0x191   : > { %v1079_v44 = vmul.f32 %v2128_v10, %v999_v2  ;;  %v1158_v29 = vadd.f32 1.0, %v1142_v60 }
 0x192   : > { %v1080_v39 = vmul.f32 %v2130_v20, %v1000_v51 }
 0x193   : > { %v1095_v26 = vsub.f32 1.0, %v1079_v44  ;;  %v1174_v24 = vmul.f32 %v1158_v29, %v774_v48  ;;  %v236_v29 = vld [vmem:[%s2288_s22 + $0xc] sm:$0xff]  }
 0x194   : > { %v1096_v3 = vsub.f32 1.0, %v1080_v39 }
 0x195   : > { %v1127_v54 = vsub.f32 0.0, %v1095_v26  ;;  %v1183_v14 = vpack.c.bf16 %v1174_v24, %v1173_v46  ;;  %v1643_v24 = vunpack.c.l.bf16 %v236_v29 }
 0x196   : > { %v1128_v19 = vsub.f32 0.0, %v1096_v3 }
 0x197   : > { %v1143_v22 = vsel %vm1111_vm6, %v1095_v26, %v1127_v54  ;;  %1383 = vmatmul.bf16.gmra.mxu3 %v1183_v14  ;;  %1432 = vmatmul.bf16.gmra.mxu0 %v1183_v14 }
 0x198   : > { %v1144_v35 = vsel %vm1112_vm7, %v1096_v3, %v1128_v19  ;;  %v1159_v47 = vadd.f32 1.0, %v1143_v22  ;;  %1481 = vmatmul.bf16.gmra.mxu1 %v1183_v14 }
 0x199   : > { %v1160_v4 = vadd.f32 1.0, %v1144_v35 }
 0x19a   : > { %v1175_v43 = vmul.f32 %v1159_v47, %v775_v38 }
 0x19b   : > { %v1176_v42 = vmul.f32 %v1160_v4, %v776_v6 }
 0x19d   : > { %v1184_v33 = vpack.c.bf16 %v1176_v42, %v1175_v43 }
 0x1a7   : > { %1388 = vmatmul.bf16.gmra.mxu3 %v1184_v33  ;;  %1437 = vmatmul.bf16.gmra.mxu0 %v1184_v33 }
 0x1a8   : > { %1486 = vmatmul.bf16.gmra.mxu1 %v1184_v33  ;;  %v1644_v33 = vunpack.c.h.bf16 %v236_v29 }
 0x1b4   : > { %v3025_v37 = vpop.f32.mrf.mxu0 }
 0x1b5   : > { %v3027_v25 = vpop.f32.mrf.mxu1 }
 0x1b6   : > { %v1556_v58 = vrot.slane %v3027_v25, 1 }
 0x1ba   : > { %v3029_v21 = vpop.f32.mrf.mxu3 }
 0x1bb   : > { %v1492_v61 = vrot.slane %v3029_v21, 7 }
 0x1bc   : > { %v1405_v55 = vpop.f32.mrf.mxu0 }
 0x1bd   : > { %v1454_v59 = vpop.f32.mrf.mxu1 }
 0x1be   : > { %v1557_v27 = vrot.slane %v1454_v59, 1 }
 0x1c0   : > { %v3036_v1 = vsel %vm692_vm2, %v1556_v58, %v1557_v27 }
 0x1c2   : > { %v1356_v17 = vpop.f32.mrf.mxu3 }
 0x1c3   : > { %v1493_v16 = vrot.slane %v1356_v17, 7 }
 0x1c4   : > { %v1408_v50 = vpop.f32.mrf.mxu0 }
 0x1c5   : > { %v1522_v31 = vsel %vm627_vm0, %v1492_v61, %v1493_v16  ;;  %v1457_v7 = vpop.f32.mrf.mxu1 }
 0x1c6   : > { %v1541_v36 = vadd.f32 %v1522_v31, %v1405_v55  ;;  %v1558_v56 = vrot.slane %v1457_v7, 1 }
 0x1c8   : > { %v1585_v9 = vsel %vm692_vm2, %v1557_v27, %v1558_v56 }
 0x1c9   : > { %v1589_v11 = vsel %vm255_vm3, %v1585_v9, 0.0 }
 0x1ca   : > { %v1605_v49 = vadd.f32 %v1589_v11, %v1541_v36  ;;  %v1359_v5 = vpop.f32.mrf.mxu3 }
 0x1cb   : > { %v1494_v52 = vrot.slane %v1359_v5, 7 }
 0x1cc   : > { %v1625_v40 = vadd.f32 %v3049_v41, %v1605_v49  ;;  %v1410_v53 = vpop.f32.mrf.mxu0 }
 0x1cd   : > { %v1521_v57 = vsel %vm627_vm0, %v1493_v16, %v1494_v52  ;;  %v1459_v13 = vpop.f32.mrf.mxu1 }
 0x1ce   : > { %v1657_v63 = vadd.f32 %v1641_v45, %v1625_v40  ;;  %v1526_v12 = vsel %vm252_vm1, %v1521_v57, 0.0  ;;  %v1559_v15 = vrot.slane %v1459_v13, 1 }
 0x1cf   : > { %v1542_v34 = vadd.f32 %v1526_v12, %v1408_v50 }
 0x1d0   : > { %1673 = vst [vmem:[%s3058_s24 + $0x8] sm:$0xff] %v1657_v63  ;;  %v1584_v23 = vsel %vm692_vm2, %v1558_v56, %v1559_v15  ;;  %v238_v56 = vld [vmem:[%s2288_s22 + $0x14] sm:$0xff]  }
 0x1d1   : > { %v1606_v28 = vadd.f32 %v1584_v23, %v1542_v34  ;;  %v1645_v49 = vunpack.c.l.bf16 %v238_v56 }
 0x1d2   : > { %v1361_v2 = vpop.f32.mrf.mxu3 }
 0x1d3   : > { %v1626_v10 = vadd.f32 %v3049_v41, %v1606_v28  ;;  %v1495_v32 = vrot.slane %v1361_v2, 7  ;;  %v1646_v28 = vunpack.c.h.bf16 %v238_v56 }
 0x1d4   : > { %v1413_v51 = vpop.f32.mrf.mxu0 }
 0x1d5   : > { %v1658_v20 = vadd.f32 %v1642_v8, %v1626_v10  ;;  %v1520_v60 = vsel %vm627_vm0, %v1494_v52, %v1495_v32  ;;  %v1462_v44 = vpop.f32.mrf.mxu1 }
 0x1d6   : > { %v1543_v62 = vadd.f32 %v1520_v60, %v1410_v53  ;;  %v1560_v48 = vrot.slane %v1462_v44, 1 }
 0x1d7   : > { %1674 = vst [vmem:[%s3058_s24 + $0x10] sm:$0xff] %v1658_v20 }
 0x1d8   : > { %v1583_v39 = vsel %vm692_vm2, %v1559_v15, %v1560_v48 }
 0x1d9   : > { %v1591_v26 = vsel %vm255_vm3, %v1583_v39, 0.0 }
 0x1da   : > { %v1607_v46 = vadd.f32 %v1591_v26, %v1543_v62  ;;  %v1364_v3 = vpop.f32.mrf.mxu3 }
 0x1db   : > { %v1496_v54 = vrot.slane %v1364_v3, 7 }
 0x1dc   : > { %v1627_v14 = vadd.f32 %v3049_v41, %v1607_v46  ;;  %v1415_v19 = vpop.f32.mrf.mxu0 }
 0x1dd   : > { %v1519_v22 = vsel %vm627_vm0, %v1495_v32, %v1496_v54  ;;  %v1464_v38 = vpop.f32.mrf.mxu1 }
 0x1de   : > { %v1659_v35 = vadd.f32 %v1643_v24, %v1627_v14  ;;  %v1528_v47 = vsel %vm252_vm1, %v1519_v22, 0.0  ;;  %v1561_v6 = vrot.slane %v1464_v38, 1 }
 0x1df   : > { %v1544_v4 = vadd.f32 %v1528_v47, %v1413_v51 }
 0x1e0   : > { %1675 = vst [vmem:[%s3058_s24 + $0x18] sm:$0xff] %v1659_v35  ;;  %v1582_v43 = vsel %vm692_vm2, %v1560_v48, %v1561_v6  ;;  %v240_v48 = vld [vmem:[%s2288_s22 + $0x1c] sm:$0xff]  }
 0x1e1   : > { %v1608_v42 = vadd.f32 %v1582_v43, %v1544_v4  ;;  %v1647_v46 = vunpack.c.l.bf16 %v240_v48 }
 0x1e2   : > { %v1366_v55 = vpop.f32.mrf.mxu3 }
 0x1e3   : > { %v1628_v59 = vadd.f32 %v3049_v41, %v1608_v42  ;;  %v1497_v27 = vrot.slane %v1366_v55, 7  ;;  %v1648_v42 = vunpack.c.h.bf16 %v240_v48 }
 0x1e4   : > { %v1418_v17 = vpop.f32.mrf.mxu0 }
 0x1e5   : > { %v1660_v16 = vadd.f32 %v1644_v33, %v1628_v59  ;;  %v1518_v50 = vsel %vm627_vm0, %v1496_v54, %v1497_v27  ;;  %v1467_v31 = vpop.f32.mrf.mxu1 }
 0x1e6   : > { %v1545_v7 = vadd.f32 %v1518_v50, %v1415_v19  ;;  %v1562_v36 = vrot.slane %v1467_v31, 1 }
 0x1e7   : > { %1676 = vst [vmem:[%s3058_s24 + $0x20] sm:$0xff] %v1660_v16 }
 0x1e8   : > { %v1581_v0 = vsel %vm692_vm2, %v1561_v6, %v1562_v36 }
 0x1e9   : > { %v1593_v9 = vsel %vm255_vm3, %v1581_v0, 0.0 }
 0x1ea   : > { %v1609_v11 = vadd.f32 %v1593_v9, %v1545_v7  ;;  %v1369_v45 = vpop.f32.mrf.mxu3 }
 0x1eb   : > { %v1498_v5 = vrot.slane %v1369_v45, 7 }
 0x1ec   : > { %v1629_v52 = vadd.f32 %v3049_v41, %v1609_v11  ;;  %v1420_v40 = vpop.f32.mrf.mxu0 }
 0x1ed   : > { %v1517_v53 = vsel %vm627_vm0, %v1497_v27, %v1498_v5  ;;  %v1469_v57 = vpop.f32.mrf.mxu1 }
 0x1ee   : > { %v1661_v13 = vadd.f32 %v1645_v49, %v1629_v52  ;;  %v1530_v63 = vsel %vm252_vm1, %v1517_v53, 0.0  ;;  %v1563_v12 = vrot.slane %v1469_v57, 1 }
 0x1ef   : > { %v1546_v15 = vadd.f32 %v1530_v63, %v1418_v17 }
 0x1f0   : > { %1677 = vst [vmem:[%s3058_s24 + $0x28] sm:$0xff] %v1661_v13  ;;  %v1580_v34 = vsel %vm692_vm2, %v1562_v36, %v1563_v12  ;;  %v242_v36 = vld [vmem:[%s2288_s22 + $0x24] sm:$0xff]  }
 0x1f1   : > { %v1610_v23 = vadd.f32 %v1580_v34, %v1546_v15  ;;  %v1649_v11 = vunpack.c.l.bf16 %v242_v36 }
 0x1f2   : > { %v1371_v8 = vpop.f32.mrf.mxu3 }
 0x1f3   : > { %v1630_v2 = vadd.f32 %v3049_v41, %v1610_v23  ;;  %v1499_v10 = vrot.slane %v1371_v8, 7  ;;  %v1650_v23 = vunpack.c.h.bf16 %v242_v36 }
 0x1f4   : > { %v1423_v32 = vpop.f32.mrf.mxu0 }
 0x1f5   : > { %v1662_v51 = vadd.f32 %v1646_v28, %v1630_v2  ;;  %v1516_v20 = vsel %vm627_vm0, %v1498_v5, %v1499_v10  ;;  %v1472_v60 = vpop.f32.mrf.mxu1 }
 0x1f6   : > { %v1547_v44 = vadd.f32 %v1516_v20, %v1420_v40  ;;  %v1564_v62 = vrot.slane %v1472_v60, 1 }
 0x1f7   : > { %1678 = vst [vmem:[%s3058_s24 + $0x30] sm:$0xff] %v1662_v51 }
 0x1f8   : > { %v1579_v29 = vsel %vm692_vm2, %v1563_v12, %v1564_v62 }
 0x1f9   : > { %v1595_v39 = vsel %vm255_vm3, %v1579_v29, 0.0 }
 0x1fa   : > { %v1611_v26 = vadd.f32 %v1595_v39, %v1547_v44  ;;  %v1374_v24 = vpop.f32.mrf.mxu3 }
 0x1fb   : > { %v1500_v3 = vrot.slane %v1374_v24, 7 }
 0x1fc   : > { %v1631_v54 = vadd.f32 %v3049_v41, %v1611_v26  ;;  %v1425_v14 = vpop.f32.mrf.mxu0 }
 0x1fd   : > { %v1515_v19 = vsel %vm627_vm0, %v1499_v10, %v1500_v3  ;;  %v1474_v22 = vpop.f32.mrf.mxu1 }
 0x1fe   : > { %v1663_v38 = vadd.f32 %v1647_v46, %v1631_v54  ;;  %v1532_v35 = vsel %vm252_vm1, %v1515_v19, 0.0  ;;  %v1565_v47 = vrot.slane %v1474_v22, 1 }
 0x1ff   : > { %v1548_v6 = vadd.f32 %v1532_v35, %v1423_v32 }
 0x200   : > { %1679 = vst [vmem:[%s3058_s24 + $0x38] sm:$0xff] %v1663_v38  ;;  %v1578_v4 = vsel %vm692_vm2, %v1564_v62, %v1565_v47  ;;  %v244_v62 = vld [vmem:[%s2288_s22 + $0x2c] sm:$0xff]  }
 0x201   : > { %v1612_v43 = vadd.f32 %v1578_v4, %v1548_v6  ;;  %v1651_v26 = vunpack.c.l.bf16 %v244_v62 }
 0x202   : > { %v1376_v33 = vpop.f32.mrf.mxu3 }
 0x203   : > { %v1632_v55 = vadd.f32 %v3049_v41, %v1612_v43  ;;  %v1501_v59 = vrot.slane %v1376_v33, 7  ;;  %v1652_v43 = vunpack.c.h.bf16 %v244_v62 }
 0x204   : > { %v1428_v16 = vpop.f32.mrf.mxu0 }
 0x205   : > { %v1664_v27 = vadd.f32 %v1648_v42, %v1632_v55  ;;  %v1514_v17 = vsel %vm627_vm0, %v1500_v3, %v1501_v59  ;;  %v1477_v50 = vpop.f32.mrf.mxu1 }
 0x206   : > { %v1549_v31 = vadd.f32 %v1514_v17, %v1425_v14  ;;  %v1566_v7 = vrot.slane %v1477_v50, 1 }
 0x207   : > { %1680 = vst [vmem:[%s3058_s24 + $0x40] sm:$0xff] %v1664_v27 }
 0x208   : > { %v1577_v56 = vsel %vm692_vm2, %v1565_v47, %v1566_v7 }
 0x209   : > { %v1597_v0 = vsel %vm255_vm3, %v1577_v56, 0.0 }
 0x20a   : > { %v1613_v9 = vadd.f32 %v1597_v0, %v1549_v31  ;;  %v1379_v49 = vpop.f32.mrf.mxu3  ;;  %v246_v31 = vld [vmem:[%s2288_s22 + $0x34] sm:$0xff]  }
 0x20b   : > { %v1502_v45 = vrot.slane %v1379_v49, 7  ;;  %v1653_v0 = vunpack.c.l.bf16 %v246_v31 }
 0x20c   : > { %v1633_v5 = vadd.f32 %v3049_v41, %v1613_v9  ;;  %v1430_v40 = vpop.f32.mrf.mxu0 }
 0x20d   : > { %v1513_v52 = vsel %vm627_vm0, %v1501_v59, %v1502_v45  ;;  %v1479_v53 = vpop.f32.mrf.mxu1 }
 0x20e   : > { %v1665_v57 = vadd.f32 %v1649_v11, %v1633_v5  ;;  %v1534_v13 = vsel %vm252_vm1, %v1513_v52, 0.0  ;;  %v1567_v63 = vrot.slane %v1479_v53, 1 }
 0x20f   : > { %v1550_v12 = vadd.f32 %v1534_v13, %v1428_v16 }
 0x210   : > { %1681 = vst [vmem:[%s3058_s24 + $0x48] sm:$0xff] %v1665_v57  ;;  %v1576_v15 = vsel %vm692_vm2, %v1566_v7, %v1567_v63 }
 0x211   : > { %v1614_v34 = vadd.f32 %v1576_v15, %v1550_v12  ;;  %v1654_v15 = vunpack.c.h.bf16 %v246_v31 }
 0x212   : > { %v1381_v28 = vpop.f32.mrf.mxu3 }
 0x213   : > { %v1634_v8 = vadd.f32 %v3049_v41, %v1614_v34  ;;  %v1503_v2 = vrot.slane %v1381_v28, 7 }
 0x214   : > { %v1433_v44 = vpop.f32.mrf.mxu0 }
 0x215   : > { %v1666_v10 = vadd.f32 %v1650_v23, %v1634_v8  ;;  %v1512_v32 = vsel %vm627_vm0, %v1502_v45, %v1503_v2  ;;  %v1482_v51 = vpop.f32.mrf.mxu1 }
 0x216   : > { %v1551_v20 = vadd.f32 %v1512_v32, %v1430_v40  ;;  %v1568_v60 = vrot.slane %v1482_v51, 1  ;;  %v248_v32 = vld [vmem:[%s2288_s22 + $0x3c] sm:$0xf] }
 0x217   : > { %1682 = vst [vmem:[%s3058_s24 + $0x50] sm:$0xff] %v1666_v10 }
 0x218   : > { %v1575_v48 = vsel %vm692_vm2, %v1567_v63, %v1568_v60 }
 0x219   : > { %v1599_v29 = vsel %vm255_vm3, %v1575_v48, 0.0 }
 0x21a   : > { %v1615_v39 = vadd.f32 %v1599_v29, %v1551_v20  ;;  %v1384_v46 = vpop.f32.mrf.mxu3  ;;  %v1655_v29 = vunpack.c.l.bf16 %v248_v32 }
 0x21b   : > { %v1504_v24 = vrot.slane %v1384_v46, 7 }
 0x21c   : > { %v1635_v3 = vadd.f32 %v3049_v41, %v1615_v39  ;;  %v1435_v6 = vpop.f32.mrf.mxu0 }
 0x21d   : > { %v1511_v54 = vsel %vm627_vm0, %v1503_v2, %v1504_v24  ;;  %v1484_v14 = vpop.f32.mrf.mxu1 }
 0x21e   : > { %v1667_v19 = vadd.f32 %v1651_v26, %v1635_v3  ;;  %v1536_v22 = vsel %vm252_vm1, %v1511_v54, 0.0  ;;  %v1569_v38 = vrot.slane %v1484_v14, 1 }
 0x21f   : > { %v1552_v35 = vadd.f32 %v1536_v22, %v1433_v44 }
 0x220   : > { %1683 = vst [vmem:[%s3058_s24 + $0x58] sm:$0xff] %v1667_v19  ;;  %v1574_v47 = vsel %vm692_vm2, %v1568_v60, %v1569_v38  ;;  %v233_v60 = vld [vmem:[%s2288_s22] sm:$0xf] }
 0x221   : > { %v1616_v4 = vadd.f32 %v1574_v47, %v1552_v35  ;;  %v1640_v39 = vunpack.c.l.bf16 %v233_v60 }
 0x222   : > { %v1386_v42 = vpop.f32.mrf.mxu3 }
 0x223   : > { %v1636_v33 = vadd.f32 %v3049_v41, %v1616_v4  ;;  %v1505_v55 = vrot.slane %v1386_v42, 7 }
 0x224   : > { %v1438_v11 = vpop.f32.mrf.mxu0 }
 0x225   : > { %v1668_v59 = vadd.f32 %v1652_v43, %v1636_v33  ;;  %v1510_v27 = vsel %vm627_vm0, %v1504_v24, %v1505_v55  ;;  %v1487_v17 = vpop.f32.mrf.mxu1 }
 0x226   : > { %v1553_v16 = vadd.f32 %v1510_v27, %v1435_v6  ;;  %v1570_v50 = vrot.slane %v1487_v17, 1 }
 0x227   : > { %1684 = vst [vmem:[%s3058_s24 + $0x60] sm:$0xff] %v1668_v59 }
 0x228   : > { %v1573_v7 = vsel %vm692_vm2, %v1569_v38, %v1570_v50 }
 0x229   : > { %v1601_v36 = vsel %vm255_vm3, %v1573_v7, 0.0 }
 0x22a   : > { %v1617_v56 = vadd.f32 %v1601_v36, %v1553_v16  ;;  %v1389_v9 = vpop.f32.mrf.mxu3 }
 0x22b   : > { %v1506_v49 = vrot.slane %v1389_v9, 7 }
 0x22c   : > { %v1637_v45 = vadd.f32 %v3049_v41, %v1617_v56  ;;  %v1440_v2 = vpop.f32.mrf.mxu0 }
 0x22d   : > { %v1509_v5 = vsel %vm627_vm0, %v1505_v55, %v1506_v49  ;;  %v1489_v52 = vpop.f32.mrf.mxu1 }
 0x22e   : > { %v1669_v40 = vadd.f32 %v1653_v0, %v1637_v45  ;;  %v1538_v53 = vsel %vm252_vm1, %v1509_v5, 0.0  ;;  %v1571_v57 = vrot.slane %v1489_v52, 1 }
 0x22f   : > { %v1554_v13 = vadd.f32 %v1538_v53, %v1438_v11 }
 0x230   : > { %1685 = vst [vmem:[%s3058_s24 + $0x68] sm:$0xff] %v1669_v40  ;;  %v1572_v63 = vsel %vm692_vm2, %v1570_v50, %v1571_v57  ;;  %v1587_v8 = vsel %vm692_vm2, %v1571_v57, %v1556_v58 }
 0x231   : > { %v1618_v12 = vadd.f32 %v1572_v63, %v1554_v13  ;;  %v1603_v58 = vsel %vm255_vm3, %v1587_v8, 0.0 }
 0x232   : > { %v1391_v34 = vpop.f32.mrf.mxu3 }
 0x233   : > { %v1638_v23 = vadd.f32 %v3049_v41, %v1618_v12  ;;  %v1507_v28 = vrot.slane %v1391_v34, 7 }
 0x235   : > { %v1670_v10 = vadd.f32 %v1654_v15, %v1638_v23  ;;  %v1508_v51 = vsel %vm627_vm0, %v1506_v49, %v1507_v28  ;;  %v1523_v20 = vsel %vm627_vm0, %v1507_v28, %v1492_v61 }
 0x236   : > { %v1524_v25 = vsel %vm252_vm1, %v1523_v20, 0.0  ;;  %v1555_v44 = vadd.f32 %v1508_v51, %v1440_v2 }
 0x237   : > { %1686 = vst [vmem:[%s3058_s24 + $0x70] sm:$0xff] %v1670_v10  ;;  %v1540_v62 = vadd.f32 %v1524_v25, %v3025_v37 }
 0x238   : > { %v1619_v48 = vadd.f32 %v1603_v58, %v1555_v44 }
 0x239   : > { %v1604_v21 = vadd.f32 %v3036_v1, %v1540_v62 }
 0x23a   : > { %v1639_v26 = vadd.f32 %v3049_v41, %v1619_v48 }
 0x23b   : > { %v1624_v61 = vadd.f32 %v3049_v41, %v1604_v21 }
 0x23c   : > { %v1671_v46 = vadd.f32 %v1655_v29, %v1639_v26 }
 0x23d   : > { %v1656_v24 = vadd.f32 %v1640_v39, %v1624_v61 }
 0x23e   : > { %1687 = vst [vmem:[%s3058_s24 + $0x78] sm:$0xff] %v1671_v46 }
 0x23f   : > { %1672 = vst [vmem:[%s3058_s24] sm:$0xff] %v1656_v24 }
 0x240 PF: > { %s15_s18 = sadd.s32 1, %s2138_s18  }
 0x241   : > { %p12_p4 = scmp.ge.s32.totalorder %s15_s18, 4  }
 0x243   :  { %14 = sbr.rel (!%p12_p4) target bundleno = 1 (0x1), region = 70 }

</bundles_post_ra>
